<compile_context>
chip_gen: v5e
topology: v5e:2x2
jax: 0.10.0
libtpu: 0.0.40
codegen_flags: <defaults>
</compile_context>

<pallas_src>
import functools

import jax
import jax.numpy as jnp
from jax import lax
from jax.experimental import pallas as pl
from jax.experimental.pallas import tpu as pltpu


def _round_up(x, m):
    return ((x + m - 1) // m) * m


def _spatial_attention_kernel(x_ref, w_ref, out_ref, maps_ref, *,
                              Nb, C, W, K, pad, HW, HW_r, HWp_r, off0,
                              gate_dtype):
    # x_ref   : (Nb, C, HW)  VMEM, lane-dense (H*W on the lane axis)
    # w_ref   : (2*K*K,)     SMEM f32, layout (channel, kh, kw); ch 0 = avg, 1 = max
    # out_ref : (Nb, C, HW)  VMEM
    # maps_ref: (2, HWp_r)   VMEM f32 scratch.  Lane layout per row:
    #           [ zeros(off0) | interior (HW) | zeros(>= pad*W) ]
    #           The zero lanes provide the conv's vertical zero padding; they are
    #           written once per grid step and never touched by the per-image
    #           interior writes (keep that invariant if this layout changes).
    out_dtype = out_ref.dtype
    inv_c = jnp.float32(1.0 / C)
    unroll_c = min(C, 8)          # partial unroll: LLO overlap without code bloat

    # ---------------- hoisted once per grid step ----------------
    # (a) SMEM weight scalars: read once, not per image / per tap use.
    w_avg = [[w_ref[kh * K + kw] for kw in range(K)] for kh in range(K)]
    w_max = [[w_ref[K * K + kh * K + kw] for kw in range(K)] for kh in range(K)]
    # (b) zero the padded maps (interior is overwritten per image below).
    maps_ref[...] = jnp.zeros_like(maps_ref)
    # (c) column-index masks for the horizontal zero padding of the flattened
    #     conv: a tap whose source column falls outside [0, W) contributes 0.
    f_idx = lax.broadcasted_iota(jnp.int32, (1, HW_r), 1)[0]
    if W & (W - 1) == 0:
        col = jnp.bitwise_and(f_idx, W - 1)
    else:
        col = f_idx % W
    col_masks = []
    for kw in range(K):
        if kw == pad:
            col_masks.append(None)                   # centre column: always in range
        else:
            lo, hi = pad - kw, W + pad - kw
            col_masks.append((col >= lo) & (col < hi))

    def image_body(b):
        # ---- channel-wise mean / max, one flat (HW,) plane live at a time ----
        def red_body(c, carry):
            s, m = carry
            p = x_ref[b, c].astype(jnp.float32)      # (HW,) full-lane load
            return s + p, jnp.maximum(m, p)

        s0 = jnp.zeros((HW,), jnp.float32)
        m0 = jnp.full((HW,), -jnp.inf, jnp.float32)
        s, m = lax.fori_loop(0, C, red_body, (s0, m0), unroll=unroll_c)

        # 128-aligned interior writes (off0 % 128 == 0); the zero border stays
        # untouched and supplies the conv's zero padding.
        maps_ref[0, off0:off0 + HW] = s * inv_c
        maps_ref[1, off0:off0 + HW] = m

        # ---- K x K conv on the flattened zero-padded 2-channel map -----------
        band = maps_ref[...]                          # (2, HWp_r) f32
        acc = jnp.zeros((HW_r,), jnp.float32)
        for kw in range(K):
            acc_kw = jnp.zeros((HW_r,), jnp.float32)
            for kh in range(K):
                t = (kh - pad) * W + (kw - pad)       # flat source offset of this tap
                sh = pltpu.roll(band, shift=(-(off0 + t)) % HWp_r, axis=1)
                acc_kw = (acc_kw
                          + w_avg[kh][kw] * sh[0, :HW_r]
                          + w_max[kh][kw] * sh[1, :HW_r])
            if col_masks[kw] is None:
                acc = acc + acc_kw
            else:
                acc = acc + jnp.where(col_masks[kw], acc_kw, 0.0)

        # bf16 gating on bf16 inputs (native VPU on v6e/v7x); f32 otherwise.
        # TODO(synk): on v5e (no bf16 VPU) force the f32 gating path.
        attn = jax.nn.sigmoid(acc[:HW]).astype(gate_dtype)    # (HW,)

        # ---- gating: out[c] = x[c] * sigmoid(conv), lane-dense stores --------
        def gate_body(c, carry):
            out_ref[b, c] = (x_ref[b, c].astype(gate_dtype) * attn).astype(out_dtype)
            return carry

        lax.fori_loop(0, C, gate_body, 0, unroll=unroll_c)

    if Nb <= 8:
        for b in range(Nb):                 # small blocks: static unroll
            image_body(b)
    else:
        def outer(b, carry):                # big blocks: bounded live ranges
            image_body(b)
            return carry
        lax.fori_loop(0, Nb, outer, 0, unroll=2)


def spatial_attention(x, weight, *, block_n=None, vmem_limit_bytes=None):
    """CBAM SpatialAttention forward. x: (N, C, H, W); weight: (1, 2, K, K) or (2, K, K)."""
    N, C, H, W = x.shape
    w = jnp.asarray(weight)
    if w.ndim == 4:
        w = w[0]                                         # (2, K, K)
    K = int(w.shape[-1])
    assert K % 2 == 1, "SpatialAttention assumes odd kernel_size (padding = K // 2)"
    pad = K // 2
    HW = H * W
    HW_r = _round_up(max(HW, 1), 128)
    off0 = _round_up(pad * W, 128)                       # 128-aligned interior start
    HWp_r = _round_up(off0 + HW + pad * W, 128)
    # Zero-padding invariants of the flattened conv (see kernel comments).
    assert off0 >= pad * W
    assert HWp_r >= off0 + HW + pad * W

    w_flat = w.reshape(-1).astype(jnp.float32)           # (2*K*K,) -> SMEM

    # Lane-dense layout: H*W on the lane axis.
    x2 = x.reshape(N, C, HW)

    itemsize = jnp.dtype(x.dtype).itemsize
    sublane = max(8, 32 // itemsize)                     # 8 (f32), 16 (bf16), 32 (i8)
    per_img_padded = _round_up(C, sublane) * HW_r * itemsize   # padded VMEM bytes / image

    # Per-chip VMEM budget; v7x-safe fallback when the query is unavailable.
    if vmem_limit_bytes is None:
        try:
            vmem_cap = int(pltpu.get_tpu_info().vmem_capacity_bytes)
        except Exception:
            vmem_cap = 64 * 1024 * 1024                  # v7x physical; safe everywhere
        vmem_limit_bytes = min(int(vmem_cap * 0.6), 80 * 1024 * 1024)
    vmem_limit_bytes = int(vmem_limit_bytes)

    if block_n is None:
        # Input AND output blocks are double-buffered -> 4x the block footprint.
        budget = int(vmem_limit_bytes * 0.7)
        block_n = max(1, budget // (4 * per_img_padded))
        # Keep >= 4 grid steps when N allows (>= 2 per v7x TensorCore so the
        # mem-bound pipeline actually overlaps DMA with compute).
        if N >= 4:
            block_n = min(block_n, N // 4)
        elif N >= 2:
            block_n = min(block_n, N // 2)
    block_n = max(1, min(int(block_n), N))
    while N % block_n:
        block_n -= 1
    grid = (N // block_n,)

    gate_dtype = jnp.bfloat16 if jnp.dtype(x.dtype) == jnp.dtype(jnp.bfloat16) else jnp.float32

    kernel = functools.partial(
        _spatial_attention_kernel, Nb=block_n, C=C, W=W, K=K, pad=pad,
        HW=HW, HW_r=HW_r, HWp_r=HWp_r, off0=off0, gate_dtype=gate_dtype)

    out = pl.pallas_call(
        kernel,
        out_shape=jax.ShapeDtypeStruct((N, C, HW), x.dtype),
        grid=grid,
        in_specs=[
            pl.BlockSpec((block_n, C, HW), lambda n: (n, 0, 0)),
            pl.BlockSpec(memory_space=pltpu.MemorySpace.SMEM),
        ],
        out_specs=pl.BlockSpec((block_n, C, HW), lambda n: (n, 0, 0)),
        scratch_shapes=[pltpu.VMEM((2, HWp_r), jnp.float32)],
        # Each x block is fully read before its out block writes back, so the
        # HBM buffer can be reused in place.
        input_output_aliases={0: 0},
        compiler_params=pltpu.CompilerParams(
            dimension_semantics=("parallel",),
            vmem_limit_bytes=vmem_limit_bytes),
    )(x2, w_flat)
    return out.reshape(N, C, H, W)


if __name__ == "__main__":
    key = jax.random.PRNGKey(0)
    kx, kw_key = jax.random.split(key)

    N, C, H, W = 2, 4, 16, 16
    K = 7
    x = jax.random.normal(kx, (N, C, H, W), jnp.float32)

    # Deterministic conv1 weight (out=1, in=2, K, K), kaiming-uniform-ish bound.
    fan_in = 2 * K * K
    bound = (1.0 / fan_in) ** 0.5
    weight = jax.random.uniform(kw_key, (1, 2, K, K), jnp.float32, -bound, bound)

    # Plain-JAX reference of the PyTorch forward pass (computed first; the
    # kernel only aliases its own reshaped input buffer, x stays valid).
    avg = jnp.mean(x, axis=1, keepdims=True)
    mx = jnp.max(x, axis=1, keepdims=True)
    feat = jnp.concatenate([avg, mx], axis=1)
    conv = lax.conv_general_dilated(
        feat, weight, window_strides=(1, 1), padding="SAME",
        dimension_numbers=("NCHW", "OIHW", "NCHW"))
    ref = jax.block_until_ready(x * jax.nn.sigmoid(conv))

    out = spatial_attention(x, weight)
    out = jax.block_until_ready(out)

    err = float(jnp.max(jnp.abs(out - ref)))
    assert jnp.allclose(out, ref, atol=1e-5, rtol=1e-5), f"max abs err {err}"
    print("KERNEL_OK")
</pallas_src>

<mosaic_0001>
module attributes {stable_mosaic.version = 11 : i64} {
  func.func @_spatial_attention_kernel(%arg0: i32, %arg1: memref<1x4x256xf32, #tpu.memory_space<vmem>>, %arg2: memref<98xf32, #tpu.memory_space<smem>>, %arg3: memref<1x4x256xf32, #tpu.memory_space<vmem>>, %arg4: memref<2x512xf32, #tpu.memory_space<vmem>>) attributes {dimension_semantics = [#tpu.dimension_semantics<parallel>], iteration_bounds = array<i64: 2>, scalar_prefetch = 0 : i64, scratch_operands = 1 : i64, tpu.core_type = #tpu.core_type<tc>, window_params = [{transform_indices = @transform_0, window_bounds = array<i64: 1, 4, 256>}, {transform_indices = @transform_1, window_bounds = array<i64: 98>}, {transform_indices = @transform_2, window_bounds = array<i64: 1, 4, 256>}]} {
    %c0 = arith.constant 0 : index
    %0 = memref.load %arg2[%c0] : memref<98xf32, #tpu.memory_space<smem>>
    %c1 = arith.constant 1 : index
    %1 = memref.load %arg2[%c1] : memref<98xf32, #tpu.memory_space<smem>>
    %c2 = arith.constant 2 : index
    %2 = memref.load %arg2[%c2] : memref<98xf32, #tpu.memory_space<smem>>
    %c3 = arith.constant 3 : index
    %3 = memref.load %arg2[%c3] : memref<98xf32, #tpu.memory_space<smem>>
    %c4 = arith.constant 4 : index
    %4 = memref.load %arg2[%c4] : memref<98xf32, #tpu.memory_space<smem>>
    %c5 = arith.constant 5 : index
    %5 = memref.load %arg2[%c5] : memref<98xf32, #tpu.memory_space<smem>>
    %c6 = arith.constant 6 : index
    %6 = memref.load %arg2[%c6] : memref<98xf32, #tpu.memory_space<smem>>
    %c7 = arith.constant 7 : index
    %7 = memref.load %arg2[%c7] : memref<98xf32, #tpu.memory_space<smem>>
    %c8 = arith.constant 8 : index
    %8 = memref.load %arg2[%c8] : memref<98xf32, #tpu.memory_space<smem>>
    %c9 = arith.constant 9 : index
    %9 = memref.load %arg2[%c9] : memref<98xf32, #tpu.memory_space<smem>>
    %c10 = arith.constant 10 : index
    %10 = memref.load %arg2[%c10] : memref<98xf32, #tpu.memory_space<smem>>
    %c11 = arith.constant 11 : index
    %11 = memref.load %arg2[%c11] : memref<98xf32, #tpu.memory_space<smem>>
    %c12 = arith.constant 12 : index
    %12 = memref.load %arg2[%c12] : memref<98xf32, #tpu.memory_space<smem>>
    %c13 = arith.constant 13 : index
    %13 = memref.load %arg2[%c13] : memref<98xf32, #tpu.memory_space<smem>>
    %c14 = arith.constant 14 : index
    %14 = memref.load %arg2[%c14] : memref<98xf32, #tpu.memory_space<smem>>
    %c15 = arith.constant 15 : index
    %15 = memref.load %arg2[%c15] : memref<98xf32, #tpu.memory_space<smem>>
    %c16 = arith.constant 16 : index
    %16 = memref.load %arg2[%c16] : memref<98xf32, #tpu.memory_space<smem>>
    %c17 = arith.constant 17 : index
    %17 = memref.load %arg2[%c17] : memref<98xf32, #tpu.memory_space<smem>>
    %c18 = arith.constant 18 : index
    %18 = memref.load %arg2[%c18] : memref<98xf32, #tpu.memory_space<smem>>
    %c19 = arith.constant 19 : index
    %19 = memref.load %arg2[%c19] : memref<98xf32, #tpu.memory_space<smem>>
    %c20 = arith.constant 20 : index
    %20 = memref.load %arg2[%c20] : memref<98xf32, #tpu.memory_space<smem>>
    %c21 = arith.constant 21 : index
    %21 = memref.load %arg2[%c21] : memref<98xf32, #tpu.memory_space<smem>>
    %c22 = arith.constant 22 : index
    %22 = memref.load %arg2[%c22] : memref<98xf32, #tpu.memory_space<smem>>
    %c23 = arith.constant 23 : index
    %23 = memref.load %arg2[%c23] : memref<98xf32, #tpu.memory_space<smem>>
    %c24 = arith.constant 24 : index
    %24 = memref.load %arg2[%c24] : memref<98xf32, #tpu.memory_space<smem>>
    %c25 = arith.constant 25 : index
    %25 = memref.load %arg2[%c25] : memref<98xf32, #tpu.memory_space<smem>>
    %c26 = arith.constant 26 : index
    %26 = memref.load %arg2[%c26] : memref<98xf32, #tpu.memory_space<smem>>
    %c27 = arith.constant 27 : index
    %27 = memref.load %arg2[%c27] : memref<98xf32, #tpu.memory_space<smem>>
    %c28 = arith.constant 28 : index
    %28 = memref.load %arg2[%c28] : memref<98xf32, #tpu.memory_space<smem>>
    %c29 = arith.constant 29 : index
    %29 = memref.load %arg2[%c29] : memref<98xf32, #tpu.memory_space<smem>>
    %c30 = arith.constant 30 : index
    %30 = memref.load %arg2[%c30] : memref<98xf32, #tpu.memory_space<smem>>
    %c31 = arith.constant 31 : index
    %31 = memref.load %arg2[%c31] : memref<98xf32, #tpu.memory_space<smem>>
    %c32 = arith.constant 32 : index
    %32 = memref.load %arg2[%c32] : memref<98xf32, #tpu.memory_space<smem>>
    %c33 = arith.constant 33 : index
    %33 = memref.load %arg2[%c33] : memref<98xf32, #tpu.memory_space<smem>>
    %c34 = arith.constant 34 : index
    %34 = memref.load %arg2[%c34] : memref<98xf32, #tpu.memory_space<smem>>
    %c35 = arith.constant 35 : index
    %35 = memref.load %arg2[%c35] : memref<98xf32, #tpu.memory_space<smem>>
    %c36 = arith.constant 36 : index
    %36 = memref.load %arg2[%c36] : memref<98xf32, #tpu.memory_space<smem>>
    %c37 = arith.constant 37 : index
    %37 = memref.load %arg2[%c37] : memref<98xf32, #tpu.memory_space<smem>>
    %c38 = arith.constant 38 : index
    %38 = memref.load %arg2[%c38] : memref<98xf32, #tpu.memory_space<smem>>
    %c39 = arith.constant 39 : index
    %39 = memref.load %arg2[%c39] : memref<98xf32, #tpu.memory_space<smem>>
    %c40 = arith.constant 40 : index
    %40 = memref.load %arg2[%c40] : memref<98xf32, #tpu.memory_space<smem>>
    %c41 = arith.constant 41 : index
    %41 = memref.load %arg2[%c41] : memref<98xf32, #tpu.memory_space<smem>>
    %c42 = arith.constant 42 : index
    %42 = memref.load %arg2[%c42] : memref<98xf32, #tpu.memory_space<smem>>
    %c43 = arith.constant 43 : index
    %43 = memref.load %arg2[%c43] : memref<98xf32, #tpu.memory_space<smem>>
    %c44 = arith.constant 44 : index
    %44 = memref.load %arg2[%c44] : memref<98xf32, #tpu.memory_space<smem>>
    %c45 = arith.constant 45 : index
    %45 = memref.load %arg2[%c45] : memref<98xf32, #tpu.memory_space<smem>>
    %c46 = arith.constant 46 : index
    %46 = memref.load %arg2[%c46] : memref<98xf32, #tpu.memory_space<smem>>
    %c47 = arith.constant 47 : index
    %47 = memref.load %arg2[%c47] : memref<98xf32, #tpu.memory_space<smem>>
    %c48 = arith.constant 48 : index
    %48 = memref.load %arg2[%c48] : memref<98xf32, #tpu.memory_space<smem>>
    %c49 = arith.constant 49 : index
    %49 = memref.load %arg2[%c49] : memref<98xf32, #tpu.memory_space<smem>>
    %c50 = arith.constant 50 : index
    %50 = memref.load %arg2[%c50] : memref<98xf32, #tpu.memory_space<smem>>
    %c51 = arith.constant 51 : index
    %51 = memref.load %arg2[%c51] : memref<98xf32, #tpu.memory_space<smem>>
    %c52 = arith.constant 52 : index
    %52 = memref.load %arg2[%c52] : memref<98xf32, #tpu.memory_space<smem>>
    %c53 = arith.constant 53 : index
    %53 = memref.load %arg2[%c53] : memref<98xf32, #tpu.memory_space<smem>>
    %c54 = arith.constant 54 : index
    %54 = memref.load %arg2[%c54] : memref<98xf32, #tpu.memory_space<smem>>
    %c55 = arith.constant 55 : index
    %55 = memref.load %arg2[%c55] : memref<98xf32, #tpu.memory_space<smem>>
    %c56 = arith.constant 56 : index
    %56 = memref.load %arg2[%c56] : memref<98xf32, #tpu.memory_space<smem>>
    %c57 = arith.constant 57 : index
    %57 = memref.load %arg2[%c57] : memref<98xf32, #tpu.memory_space<smem>>
    %c58 = arith.constant 58 : index
    %58 = memref.load %arg2[%c58] : memref<98xf32, #tpu.memory_space<smem>>
    %c59 = arith.constant 59 : index
    %59 = memref.load %arg2[%c59] : memref<98xf32, #tpu.memory_space<smem>>
    %c60 = arith.constant 60 : index
    %60 = memref.load %arg2[%c60] : memref<98xf32, #tpu.memory_space<smem>>
    %c61 = arith.constant 61 : index
    %61 = memref.load %arg2[%c61] : memref<98xf32, #tpu.memory_space<smem>>
    %c62 = arith.constant 62 : index
    %62 = memref.load %arg2[%c62] : memref<98xf32, #tpu.memory_space<smem>>
    %c63 = arith.constant 63 : index
    %63 = memref.load %arg2[%c63] : memref<98xf32, #tpu.memory_space<smem>>
    %c64 = arith.constant 64 : index
    %64 = memref.load %arg2[%c64] : memref<98xf32, #tpu.memory_space<smem>>
    %c65 = arith.constant 65 : index
    %65 = memref.load %arg2[%c65] : memref<98xf32, #tpu.memory_space<smem>>
    %c66 = arith.constant 66 : index
    %66 = memref.load %arg2[%c66] : memref<98xf32, #tpu.memory_space<smem>>
    %c67 = arith.constant 67 : index
    %67 = memref.load %arg2[%c67] : memref<98xf32, #tpu.memory_space<smem>>
    %c68 = arith.constant 68 : index
    %68 = memref.load %arg2[%c68] : memref<98xf32, #tpu.memory_space<smem>>
    %c69 = arith.constant 69 : index
    %69 = memref.load %arg2[%c69] : memref<98xf32, #tpu.memory_space<smem>>
    %c70 = arith.constant 70 : index
    %70 = memref.load %arg2[%c70] : memref<98xf32, #tpu.memory_space<smem>>
    %c71 = arith.constant 71 : index
    %71 = memref.load %arg2[%c71] : memref<98xf32, #tpu.memory_space<smem>>
    %c72 = arith.constant 72 : index
    %72 = memref.load %arg2[%c72] : memref<98xf32, #tpu.memory_space<smem>>
    %c73 = arith.constant 73 : index
    %73 = memref.load %arg2[%c73] : memref<98xf32, #tpu.memory_space<smem>>
    %c74 = arith.constant 74 : index
    %74 = memref.load %arg2[%c74] : memref<98xf32, #tpu.memory_space<smem>>
    %c75 = arith.constant 75 : index
    %75 = memref.load %arg2[%c75] : memref<98xf32, #tpu.memory_space<smem>>
    %c76 = arith.constant 76 : index
    %76 = memref.load %arg2[%c76] : memref<98xf32, #tpu.memory_space<smem>>
    %c77 = arith.constant 77 : index
    %77 = memref.load %arg2[%c77] : memref<98xf32, #tpu.memory_space<smem>>
    %c78 = arith.constant 78 : index
    %78 = memref.load %arg2[%c78] : memref<98xf32, #tpu.memory_space<smem>>
    %c79 = arith.constant 79 : index
    %79 = memref.load %arg2[%c79] : memref<98xf32, #tpu.memory_space<smem>>
    %c80 = arith.constant 80 : index
    %80 = memref.load %arg2[%c80] : memref<98xf32, #tpu.memory_space<smem>>
    %c81 = arith.constant 81 : index
    %81 = memref.load %arg2[%c81] : memref<98xf32, #tpu.memory_space<smem>>
    %c82 = arith.constant 82 : index
    %82 = memref.load %arg2[%c82] : memref<98xf32, #tpu.memory_space<smem>>
    %c83 = arith.constant 83 : index
    %83 = memref.load %arg2[%c83] : memref<98xf32, #tpu.memory_space<smem>>
    %c84 = arith.constant 84 : index
    %84 = memref.load %arg2[%c84] : memref<98xf32, #tpu.memory_space<smem>>
    %c85 = arith.constant 85 : index
    %85 = memref.load %arg2[%c85] : memref<98xf32, #tpu.memory_space<smem>>
    %c86 = arith.constant 86 : index
    %86 = memref.load %arg2[%c86] : memref<98xf32, #tpu.memory_space<smem>>
    %c87 = arith.constant 87 : index
    %87 = memref.load %arg2[%c87] : memref<98xf32, #tpu.memory_space<smem>>
    %c88 = arith.constant 88 : index
    %88 = memref.load %arg2[%c88] : memref<98xf32, #tpu.memory_space<smem>>
    %c89 = arith.constant 89 : index
    %89 = memref.load %arg2[%c89] : memref<98xf32, #tpu.memory_space<smem>>
    %c90 = arith.constant 90 : index
    %90 = memref.load %arg2[%c90] : memref<98xf32, #tpu.memory_space<smem>>
    %c91 = arith.constant 91 : index
    %91 = memref.load %arg2[%c91] : memref<98xf32, #tpu.memory_space<smem>>
    %c92 = arith.constant 92 : index
    %92 = memref.load %arg2[%c92] : memref<98xf32, #tpu.memory_space<smem>>
    %c93 = arith.constant 93 : index
    %93 = memref.load %arg2[%c93] : memref<98xf32, #tpu.memory_space<smem>>
    %c94 = arith.constant 94 : index
    %94 = memref.load %arg2[%c94] : memref<98xf32, #tpu.memory_space<smem>>
    %c95 = arith.constant 95 : index
    %95 = memref.load %arg2[%c95] : memref<98xf32, #tpu.memory_space<smem>>
    %c96 = arith.constant 96 : index
    %96 = memref.load %arg2[%c96] : memref<98xf32, #tpu.memory_space<smem>>
    %c97 = arith.constant 97 : index
    %97 = memref.load %arg2[%c97] : memref<98xf32, #tpu.memory_space<smem>>
    %cst = arith.constant 0.000000e+00 : f32
    %98 = vector.broadcast %cst : f32 to vector<2x512xf32>
    %c0_0 = arith.constant 0 : index
    %c0_1 = arith.constant 0 : index
    %99 = vector.load %arg4[%c0_0, %c0_1] : memref<2x512xf32, #tpu.memory_space<vmem>>, vector<2x512xf32>
    tpu.vector_store %arg4[%c0_0, %c0_1], %98 {strides = array<i32>} : memref<2x512xf32, #tpu.memory_space<vmem>>, vector<2x512xf32>,
    %100 = tpu.iota {dimensions = array<i32: 1>} : vector<1x256xi32>
    %101 = vector.shape_cast %100 : vector<1x256xi32> to vector<256xi32>
    %c15_i32 = arith.constant 15 : i32
    %102 = vector.broadcast %c15_i32 : i32 to vector<256xi32>
    %103 = arith.andi %101, %102 : vector<256xi32>
    %c3_i32 = arith.constant 3 : i32
    %104 = vector.broadcast %c3_i32 : i32 to vector<256xi32>
    %105 = arith.cmpi sge, %103, %104 : vector<256xi32>
    %c19_i32 = arith.constant 19 : i32
    %106 = vector.broadcast %c19_i32 : i32 to vector<256xi32>
    %107 = arith.cmpi slt, %103, %106 : vector<256xi32>
    %108 = arith.andi %105, %107 : vector<256xi1>
    %c2_i32 = arith.constant 2 : i32
    %109 = vector.broadcast %c2_i32 : i32 to vector<256xi32>
    %110 = arith.cmpi sge, %103, %109 : vector<256xi32>
    %c18_i32 = arith.constant 18 : i32
    %111 = vector.broadcast %c18_i32 : i32 to vector<256xi32>
    %112 = arith.cmpi slt, %103, %111 : vector<256xi32>
    %113 = arith.andi %110, %112 : vector<256xi1>
    %c1_i32 = arith.constant 1 : i32
    %114 = vector.broadcast %c1_i32 : i32 to vector<256xi32>
    %115 = arith.cmpi sge, %103, %114 : vector<256xi32>
    %c17_i32 = arith.constant 17 : i32
    %116 = vector.broadcast %c17_i32 : i32 to vector<256xi32>
    %117 = arith.cmpi slt, %103, %116 : vector<256xi32>
    %118 = arith.andi %115, %117 : vector<256xi1>
    %c-1_i32 = arith.constant -1 : i32
    %119 = vector.broadcast %c-1_i32 : i32 to vector<256xi32>
    %120 = arith.cmpi sge, %103, %119 : vector<256xi32>
    %c15_i32_2 = arith.constant 15 : i32
    %121 = vector.broadcast %c15_i32_2 : i32 to vector<256xi32>
    %122 = arith.cmpi slt, %103, %121 : vector<256xi32>
    %123 = arith.andi %120, %122 : vector<256xi1>
    %c-2_i32 = arith.constant -2 : i32
    %124 = vector.broadcast %c-2_i32 : i32 to vector<256xi32>
    %125 = arith.cmpi sge, %103, %124 : vector<256xi32>
    %c14_i32 = arith.constant 14 : i32
    %126 = vector.broadcast %c14_i32 : i32 to vector<256xi32>
    %127 = arith.cmpi slt, %103, %126 : vector<256xi32>
    %128 = arith.andi %125, %127 : vector<256xi1>
    %c-3_i32 = arith.constant -3 : i32
    %129 = vector.broadcast %c-3_i32 : i32 to vector<256xi32>
    %130 = arith.cmpi sge, %103, %129 : vector<256xi32>
    %c13_i32 = arith.constant 13 : i32
    %131 = vector.broadcast %c13_i32 : i32 to vector<256xi32>
    %132 = arith.cmpi slt, %103, %131 : vector<256xi32>
    %133 = arith.andi %130, %132 : vector<256xi1>
    %cst_3 = arith.constant 0.000000e+00 : f32
    %134 = vector.broadcast %cst_3 : f32 to vector<256xf32>
    %cst_4 = arith.constant 0xFF800000 : f32
    %135 = vector.broadcast %cst_4 : f32 to vector<256xf32>
    %c0_i32 = arith.constant 0 : i32
    %c0_5 = arith.constant 0 : index
    %136 = arith.index_cast %c0_i32 : i32 to index
    %c0_6 = arith.constant 0 : index
    %137 = vector.load %arg1[%c0_5, %136, %c0_6] : memref<1x4x256xf32, #tpu.memory_space<vmem>>, vector<1x1x256xf32>
    %138 = vector.shape_cast %137 : vector<1x1x256xf32> to vector<256xf32>
    %139 = arith.addf %134, %138 : vector<256xf32>
    %140 = arith.maximumf %135, %138 : vector<256xf32>
    %c1_i32_7 = arith.constant 1 : i32
    %c0_8 = arith.constant 0 : index
    %141 = arith.index_cast %c1_i32_7 : i32 to index
    %c0_9 = arith.constant 0 : index
    %142 = vector.load %arg1[%c0_8, %141, %c0_9] : memref<1x4x256xf32, #tpu.memory_space<vmem>>, vector<1x1x256xf32>
    %143 = vector.shape_cast %142 : vector<1x1x256xf32> to vector<256xf32>
    %144 = arith.addf %139, %143 : vector<256xf32>
    %145 = arith.maximumf %140, %143 : vector<256xf32>
    %c2_i32_10 = arith.constant 2 : i32
    %c0_11 = arith.constant 0 : index
    %146 = arith.index_cast %c2_i32_10 : i32 to index
    %c0_12 = arith.constant 0 : index
    %147 = vector.load %arg1[%c0_11, %146, %c0_12] : memref<1x4x256xf32, #tpu.memory_space<vmem>>, vector<1x1x256xf32>
    %148 = vector.shape_cast %147 : vector<1x1x256xf32> to vector<256xf32>
    %149 = arith.addf %144, %148 : vector<256xf32>
    %150 = arith.maximumf %145, %148 : vector<256xf32>
    %c3_i32_13 = arith.constant 3 : i32
    %c0_14 = arith.constant 0 : index
    %151 = arith.index_cast %c3_i32_13 : i32 to index
    %c0_15 = arith.constant 0 : index
    %152 = vector.load %arg1[%c0_14, %151, %c0_15] : memref<1x4x256xf32, #tpu.memory_space<vmem>>, vector<1x1x256xf32>
    %153 = vector.shape_cast %152 : vector<1x1x256xf32> to vector<256xf32>
    %154 = arith.addf %149, %153 : vector<256xf32>
    %155 = arith.maximumf %150, %153 : vector<256xf32>
    %c4_i32 = arith.constant 4 : i32
    %cst_16 = arith.constant 2.500000e-01 : f32
    %156 = vector.broadcast %cst_16 : f32 to vector<256xf32>
    %157 = arith.mulf %154, %156 : vector<256xf32>
    %c0_17 = arith.constant 0 : index
    %c128 = arith.constant 128 : index
    %158 = vector.load %arg4[%c0_17, %c128] : memref<2x512xf32, #tpu.memory_space<vmem>>, vector<1x256xf32>
    %159 = vector.shape_cast %158 : vector<1x256xf32> to vector<256xf32>
    %160 = vector.shape_cast %157 : vector<256xf32> to vector<1x256xf32>
    tpu.vector_store %arg4[%c0_17, %c128], %160 {strides = array<i32>} : memref<2x512xf32, #tpu.memory_space<vmem>>, vector<1x256xf32>,
    %c1_18 = arith.constant 1 : index
    %c128_19 = arith.constant 128 : index
    %161 = vector.load %arg4[%c1_18, %c128_19] : memref<2x512xf32, #tpu.memory_space<vmem>>, vector<1x256xf32>
    %162 = vector.shape_cast %161 : vector<1x256xf32> to vector<256xf32>
    %163 = vector.shape_cast %155 : vector<256xf32> to vector<1x256xf32>
    tpu.vector_store %arg4[%c1_18, %c128_19], %163 {strides = array<i32>} : memref<2x512xf32, #tpu.memory_space<vmem>>, vector<1x256xf32>,
    %c0_20 = arith.constant 0 : index
    %c0_21 = arith.constant 0 : index
    %164 = vector.load %arg4[%c0_20, %c0_21] : memref<2x512xf32, #tpu.memory_space<vmem>>, vector<2x512xf32>
    %cst_22 = arith.constant 0.000000e+00 : f32
    %165 = vector.broadcast %cst_22 : f32 to vector<256xf32>
    %cst_23 = arith.constant 0.000000e+00 : f32
    %166 = vector.broadcast %cst_23 : f32 to vector<256xf32>
    %c435_i32 = arith.constant 435 : i32
    %167 = tpu.dynamic_rotate %164 by %c435_i32 dim 1 : vector<2x512xf32>, i32 -> vector<2x512xf32>
    %168 = vector.extract_strided_slice %167 {offsets = [0, 0], sizes = [1, 256], strides = [1, 1]} : vector<2x512xf32> to vector<1x256xf32>
    %169 = vector.shape_cast %168 : vector<1x256xf32> to vector<256xf32>
    %170 = vector.broadcast %0 : f32 to vector<256xf32>
    %171 = arith.mulf %170, %169 : vector<256xf32>
    %172 = arith.addf %166, %171 : vector<256xf32>
    %173 = vector.extract_strided_slice %167 {offsets = [1, 0], sizes = [1, 256], strides = [1, 1]} : vector<2x512xf32> to vector<1x256xf32>
    %174 = vector.shape_cast %173 : vector<1x256xf32> to vector<256xf32>
    %175 = vector.broadcast %49 : f32 to vector<256xf32>
    %176 = arith.mulf %175, %174 : vector<256xf32>
    %177 = arith.addf %172, %176 : vector<256xf32>
    %c419_i32 = arith.constant 419 : i32
    %178 = tpu.dynamic_rotate %164 by %c419_i32 dim 1 : vector<2x512xf32>, i32 -> vector<2x512xf32>
    %179 = vector.extract_strided_slice %178 {offsets = [0, 0], sizes = [1, 256], strides = [1, 1]} : vector<2x512xf32> to vector<1x256xf32>
    %180 = vector.shape_cast %179 : vector<1x256xf32> to vector<256xf32>
    %181 = vector.broadcast %7 : f32 to vector<256xf32>
    %182 = arith.mulf %181, %180 : vector<256xf32>
    %183 = arith.addf %177, %182 : vector<256xf32>
    %184 = vector.extract_strided_slice %178 {offsets = [1, 0], sizes = [1, 256], strides = [1, 1]} : vector<2x512xf32> to vector<1x256xf32>
    %185 = vector.shape_cast %184 : vector<1x256xf32> to vector<256xf32>
    %186 = vector.broadcast %56 : f32 to vector<256xf32>
    %187 = arith.mulf %186, %185 : vector<256xf32>
    %188 = arith.addf %183, %187 : vector<256xf32>
    %c403_i32 = arith.constant 403 : i32
    %189 = tpu.dynamic_rotate %164 by %c403_i32 dim 1 : vector<2x512xf32>, i32 -> vector<2x512xf32>
    %190 = vector.extract_strided_slice %189 {offsets = [0, 0], sizes = [1, 256], strides = [1, 1]} : vector<2x512xf32> to vector<1x256xf32>
    %191 = vector.shape_cast %190 : vector<1x256xf32> to vector<256xf32>
    %192 = vector.broadcast %14 : f32 to vector<256xf32>
    %193 = arith.mulf %192, %191 : vector<256xf32>
    %194 = arith.addf %188, %193 : vector<256xf32>
    %195 = vector.extract_strided_slice %189 {offsets = [1, 0], sizes = [1, 256], strides = [1, 1]} : vector<2x512xf32> to vector<1x256xf32>
    %196 = vector.shape_cast %195 : vector<1x256xf32> to vector<256xf32>
    %197 = vector.broadcast %63 : f32 to vector<256xf32>
    %198 = arith.mulf %197, %196 : vector<256xf32>
    %199 = arith.addf %194, %198 : vector<256xf32>
    %c387_i32 = arith.constant 387 : i32
    %200 = tpu.dynamic_rotate %164 by %c387_i32 dim 1 : vector<2x512xf32>, i32 -> vector<2x512xf32>
    %201 = vector.extract_strided_slice %200 {offsets = [0, 0], sizes = [1, 256], strides = [1, 1]} : vector<2x512xf32> to vector<1x256xf32>
    %202 = vector.shape_cast %201 : vector<1x256xf32> to vector<256xf32>
    %203 = vector.broadcast %21 : f32 to vector<256xf32>
    %204 = arith.mulf %203, %202 : vector<256xf32>
    %205 = arith.addf %199, %204 : vector<256xf32>
    %206 = vector.extract_strided_slice %200 {offsets = [1, 0], sizes = [1, 256], strides = [1, 1]} : vector<2x512xf32> to vector<1x256xf32>
    %207 = vector.shape_cast %206 : vector<1x256xf32> to vector<256xf32>
    %208 = vector.broadcast %70 : f32 to vector<256xf32>
    %209 = arith.mulf %208, %207 : vector<256xf32>
    %210 = arith.addf %205, %209 : vector<256xf32>
    %c371_i32 = arith.constant 371 : i32
    %211 = tpu.dynamic_rotate %164 by %c371_i32 dim 1 : vector<2x512xf32>, i32 -> vector<2x512xf32>
    %212 = vector.extract_strided_slice %211 {offsets = [0, 0], sizes = [1, 256], strides = [1, 1]} : vector<2x512xf32> to vector<1x256xf32>
    %213 = vector.shape_cast %212 : vector<1x256xf32> to vector<256xf32>
    %214 = vector.broadcast %28 : f32 to vector<256xf32>
    %215 = arith.mulf %214, %213 : vector<256xf32>
    %216 = arith.addf %210, %215 : vector<256xf32>
    %217 = vector.extract_strided_slice %211 {offsets = [1, 0], sizes = [1, 256], strides = [1, 1]} : vector<2x512xf32> to vector<1x256xf32>
    %218 = vector.shape_cast %217 : vector<1x256xf32> to vector<256xf32>
    %219 = vector.broadcast %77 : f32 to vector<256xf32>
    %220 = arith.mulf %219, %218 : vector<256xf32>
    %221 = arith.addf %216, %220 : vector<256xf32>
    %c355_i32 = arith.constant 355 : i32
    %222 = tpu.dynamic_rotate %164 by %c355_i32 dim 1 : vector<2x512xf32>, i32 -> vector<2x512xf32>
    %223 = vector.extract_strided_slice %222 {offsets = [0, 0], sizes = [1, 256], strides = [1, 1]} : vector<2x512xf32> to vector<1x256xf32>
    %224 = vector.shape_cast %223 : vector<1x256xf32> to vector<256xf32>
    %225 = vector.broadcast %35 : f32 to vector<256xf32>
    %226 = arith.mulf %225, %224 : vector<256xf32>
    %227 = arith.addf %221, %226 : vector<256xf32>
    %228 = vector.extract_strided_slice %222 {offsets = [1, 0], sizes = [1, 256], strides = [1, 1]} : vector<2x512xf32> to vector<1x256xf32>
    %229 = vector.shape_cast %228 : vector<1x256xf32> to vector<256xf32>
    %230 = vector.broadcast %84 : f32 to vector<256xf32>
    %231 = arith.mulf %230, %229 : vector<256xf32>
    %232 = arith.addf %227, %231 : vector<256xf32>
    %c339_i32 = arith.constant 339 : i32
    %233 = tpu.dynamic_rotate %164 by %c339_i32 dim 1 : vector<2x512xf32>, i32 -> vector<2x512xf32>
    %234 = vector.extract_strided_slice %233 {offsets = [0, 0], sizes = [1, 256], strides = [1, 1]} : vector<2x512xf32> to vector<1x256xf32>
    %235 = vector.shape_cast %234 : vector<1x256xf32> to vector<256xf32>
    %236 = vector.broadcast %42 : f32 to vector<256xf32>
    %237 = arith.mulf %236, %235 : vector<256xf32>
    %238 = arith.addf %232, %237 : vector<256xf32>
    %239 = vector.extract_strided_slice %233 {offsets = [1, 0], sizes = [1, 256], strides = [1, 1]} : vector<2x512xf32> to vector<1x256xf32>
    %240 = vector.shape_cast %239 : vector<1x256xf32> to vector<256xf32>
    %241 = vector.broadcast %91 : f32 to vector<256xf32>
    %242 = arith.mulf %241, %240 : vector<256xf32>
    %243 = arith.addf %238, %242 : vector<256xf32>
    %cst_24 = arith.constant 0.000000e+00 : f32
    %244 = vector.broadcast %cst_24 : f32 to vector<256xf32>
    %245 = arith.select %108, %243, %244 : vector<256xi1>, vector<256xf32>
    %246 = arith.addf %165, %245 : vector<256xf32>
    %cst_25 = arith.constant 0.000000e+00 : f32
    %247 = vector.broadcast %cst_25 : f32 to vector<256xf32>
    %c434_i32 = arith.constant 434 : i32
    %248 = tpu.dynamic_rotate %164 by %c434_i32 dim 1 : vector<2x512xf32>, i32 -> vector<2x512xf32>
    %249 = vector.extract_strided_slice %248 {offsets = [0, 0], sizes = [1, 256], strides = [1, 1]} : vector<2x512xf32> to vector<1x256xf32>
    %250 = vector.shape_cast %249 : vector<1x256xf32> to vector<256xf32>
    %251 = vector.broadcast %1 : f32 to vector<256xf32>
    %252 = arith.mulf %251, %250 : vector<256xf32>
    %253 = arith.addf %247, %252 : vector<256xf32>
    %254 = vector.extract_strided_slice %248 {offsets = [1, 0], sizes = [1, 256], strides = [1, 1]} : vector<2x512xf32> to vector<1x256xf32>
    %255 = vector.shape_cast %254 : vector<1x256xf32> to vector<256xf32>
    %256 = vector.broadcast %50 : f32 to vector<256xf32>
    %257 = arith.mulf %256, %255 : vector<256xf32>
    %258 = arith.addf %253, %257 : vector<256xf32>
    %c418_i32 = arith.constant 418 : i32
    %259 = tpu.dynamic_rotate %164 by %c418_i32 dim 1 : vector<2x512xf32>, i32 -> vector<2x512xf32>
    %260 = vector.extract_strided_slice %259 {offsets = [0, 0], sizes = [1, 256], strides = [1, 1]} : vector<2x512xf32> to vector<1x256xf32>
    %261 = vector.shape_cast %260 : vector<1x256xf32> to vector<256xf32>
    %262 = vector.broadcast %8 : f32 to vector<256xf32>
    %263 = arith.mulf %262, %261 : vector<256xf32>
    %264 = arith.addf %258, %263 : vector<256xf32>
    %265 = vector.extract_strided_slice %259 {offsets = [1, 0], sizes = [1, 256], strides = [1, 1]} : vector<2x512xf32> to vector<1x256xf32>
    %266 = vector.shape_cast %265 : vector<1x256xf32> to vector<256xf32>
    %267 = vector.broadcast %57 : f32 to vector<256xf32>
    %268 = arith.mulf %267, %266 : vector<256xf32>
    %269 = arith.addf %264, %268 : vector<256xf32>
    %c402_i32 = arith.constant 402 : i32
    %270 = tpu.dynamic_rotate %164 by %c402_i32 dim 1 : vector<2x512xf32>, i32 -> vector<2x512xf32>
    %271 = vector.extract_strided_slice %270 {offsets = [0, 0], sizes = [1, 256], strides = [1, 1]} : vector<2x512xf32> to vector<1x256xf32>
    %272 = vector.shape_cast %271 : vector<1x256xf32> to vector<256xf32>
    %273 = vector.broadcast %15 : f32 to vector<256xf32>
    %274 = arith.mulf %273, %272 : vector<256xf32>
    %275 = arith.addf %269, %274 : vector<256xf32>
    %276 = vector.extract_strided_slice %270 {offsets = [1, 0], sizes = [1, 256], strides = [1, 1]} : vector<2x512xf32> to vector<1x256xf32>
    %277 = vector.shape_cast %276 : vector<1x256xf32> to vector<256xf32>
    %278 = vector.broadcast %64 : f32 to vector<256xf32>
    %279 = arith.mulf %278, %277 : vector<256xf32>
    %280 = arith.addf %275, %279 : vector<256xf32>
    %c386_i32 = arith.constant 386 : i32
    %281 = tpu.dynamic_rotate %164 by %c386_i32 dim 1 : vector<2x512xf32>, i32 -> vector<2x512xf32>
    %282 = vector.extract_strided_slice %281 {offsets = [0, 0], sizes = [1, 256], strides = [1, 1]} : vector<2x512xf32> to vector<1x256xf32>
    %283 = vector.shape_cast %282 : vector<1x256xf32> to vector<256xf32>
    %284 = vector.broadcast %22 : f32 to vector<256xf32>
    %285 = arith.mulf %284, %283 : vector<256xf32>
    %286 = arith.addf %280, %285 : vector<256xf32>
    %287 = vector.extract_strided_slice %281 {offsets = [1, 0], sizes = [1, 256], strides = [1, 1]} : vector<2x512xf32> to vector<1x256xf32>
    %288 = vector.shape_cast %287 : vector<1x256xf32> to vector<256xf32>
    %289 = vector.broadcast %71 : f32 to vector<256xf32>
    %290 = arith.mulf %289, %288 : vector<256xf32>
    %291 = arith.addf %286, %290 : vector<256xf32>
    %c370_i32 = arith.constant 370 : i32
    %292 = tpu.dynamic_rotate %164 by %c370_i32 dim 1 : vector<2x512xf32>, i32 -> vector<2x512xf32>
    %293 = vector.extract_strided_slice %292 {offsets = [0, 0], sizes = [1, 256], strides = [1, 1]} : vector<2x512xf32> to vector<1x256xf32>
    %294 = vector.shape_cast %293 : vector<1x256xf32> to vector<256xf32>
    %295 = vector.broadcast %29 : f32 to vector<256xf32>
    %296 = arith.mulf %295, %294 : vector<256xf32>
    %297 = arith.addf %291, %296 : vector<256xf32>
    %298 = vector.extract_strided_slice %292 {offsets = [1, 0], sizes = [1, 256], strides = [1, 1]} : vector<2x512xf32> to vector<1x256xf32>
    %299 = vector.shape_cast %298 : vector<1x256xf32> to vector<256xf32>
    %300 = vector.broadcast %78 : f32 to vector<256xf32>
    %301 = arith.mulf %300, %299 : vector<256xf32>
    %302 = arith.addf %297, %301 : vector<256xf32>
    %c354_i32 = arith.constant 354 : i32
    %303 = tpu.dynamic_rotate %164 by %c354_i32 dim 1 : vector<2x512xf32>, i32 -> vector<2x512xf32>
    %304 = vector.extract_strided_slice %303 {offsets = [0, 0], sizes = [1, 256], strides = [1, 1]} : vector<2x512xf32> to vector<1x256xf32>
    %305 = vector.shape_cast %304 : vector<1x256xf32> to vector<256xf32>
    %306 = vector.broadcast %36 : f32 to vector<256xf32>
    %307 = arith.mulf %306, %305 : vector<256xf32>
    %308 = arith.addf %302, %307 : vector<256xf32>
    %309 = vector.extract_strided_slice %303 {offsets = [1, 0], sizes = [1, 256], strides = [1, 1]} : vector<2x512xf32> to vector<1x256xf32>
    %310 = vector.shape_cast %309 : vector<1x256xf32> to vector<256xf32>
    %311 = vector.broadcast %85 : f32 to vector<256xf32>
    %312 = arith.mulf %311, %310 : vector<256xf32>
    %313 = arith.addf %308, %312 : vector<256xf32>
    %c338_i32 = arith.constant 338 : i32
    %314 = tpu.dynamic_rotate %164 by %c338_i32 dim 1 : vector<2x512xf32>, i32 -> vector<2x512xf32>
    %315 = vector.extract_strided_slice %314 {offsets = [0, 0], sizes = [1, 256], strides = [1, 1]} : vector<2x512xf32> to vector<1x256xf32>
    %316 = vector.shape_cast %315 : vector<1x256xf32> to vector<256xf32>
    %317 = vector.broadcast %43 : f32 to vector<256xf32>
    %318 = arith.mulf %317, %316 : vector<256xf32>
    %319 = arith.addf %313, %318 : vector<256xf32>
    %320 = vector.extract_strided_slice %314 {offsets = [1, 0], sizes = [1, 256], strides = [1, 1]} : vector<2x512xf32> to vector<1x256xf32>
    %321 = vector.shape_cast %320 : vector<1x256xf32> to vector<256xf32>
    %322 = vector.broadcast %92 : f32 to vector<256xf32>
    %323 = arith.mulf %322, %321 : vector<256xf32>
    %324 = arith.addf %319, %323 : vector<256xf32>
    %cst_26 = arith.constant 0.000000e+00 : f32
    %325 = vector.broadcast %cst_26 : f32 to vector<256xf32>
    %326 = arith.select %113, %324, %325 : vector<256xi1>, vector<256xf32>
    %327 = arith.addf %246, %326 : vector<256xf32>
    %cst_27 = arith.constant 0.000000e+00 : f32
    %328 = vector.broadcast %cst_27 : f32 to vector<256xf32>
    %c433_i32 = arith.constant 433 : i32
    %329 = tpu.dynamic_rotate %164 by %c433_i32 dim 1 : vector<2x512xf32>, i32 -> vector<2x512xf32>
    %330 = vector.extract_strided_slice %329 {offsets = [0, 0], sizes = [1, 256], strides = [1, 1]} : vector<2x512xf32> to vector<1x256xf32>
    %331 = vector.shape_cast %330 : vector<1x256xf32> to vector<256xf32>
    %332 = vector.broadcast %2 : f32 to vector<256xf32>
    %333 = arith.mulf %332, %331 : vector<256xf32>
    %334 = arith.addf %328, %333 : vector<256xf32>
    %335 = vector.extract_strided_slice %329 {offsets = [1, 0], sizes = [1, 256], strides = [1, 1]} : vector<2x512xf32> to vector<1x256xf32>
    %336 = vector.shape_cast %335 : vector<1x256xf32> to vector<256xf32>
    %337 = vector.broadcast %51 : f32 to vector<256xf32>
    %338 = arith.mulf %337, %336 : vector<256xf32>
    %339 = arith.addf %334, %338 : vector<256xf32>
    %c417_i32 = arith.constant 417 : i32
    %340 = tpu.dynamic_rotate %164 by %c417_i32 dim 1 : vector<2x512xf32>, i32 -> vector<2x512xf32>
    %341 = vector.extract_strided_slice %340 {offsets = [0, 0], sizes = [1, 256], strides = [1, 1]} : vector<2x512xf32> to vector<1x256xf32>
    %342 = vector.shape_cast %341 : vector<1x256xf32> to vector<256xf32>
    %343 = vector.broadcast %9 : f32 to vector<256xf32>
    %344 = arith.mulf %343, %342 : vector<256xf32>
    %345 = arith.addf %339, %344 : vector<256xf32>
    %346 = vector.extract_strided_slice %340 {offsets = [1, 0], sizes = [1, 256], strides = [1, 1]} : vector<2x512xf32> to vector<1x256xf32>
    %347 = vector.shape_cast %346 : vector<1x256xf32> to vector<256xf32>
    %348 = vector.broadcast %58 : f32 to vector<256xf32>
    %349 = arith.mulf %348, %347 : vector<256xf32>
    %350 = arith.addf %345, %349 : vector<256xf32>
    %c401_i32 = arith.constant 401 : i32
    %351 = tpu.dynamic_rotate %164 by %c401_i32 dim 1 : vector<2x512xf32>, i32 -> vector<2x512xf32>
    %352 = vector.extract_strided_slice %351 {offsets = [0, 0], sizes = [1, 256], strides = [1, 1]} : vector<2x512xf32> to vector<1x256xf32>
    %353 = vector.shape_cast %352 : vector<1x256xf32> to vector<256xf32>
    %354 = vector.broadcast %16 : f32 to vector<256xf32>
    %355 = arith.mulf %354, %353 : vector<256xf32>
    %356 = arith.addf %350, %355 : vector<256xf32>
    %357 = vector.extract_strided_slice %351 {offsets = [1, 0], sizes = [1, 256], strides = [1, 1]} : vector<2x512xf32> to vector<1x256xf32>
    %358 = vector.shape_cast %357 : vector<1x256xf32> to vector<256xf32>
    %359 = vector.broadcast %65 : f32 to vector<256xf32>
    %360 = arith.mulf %359, %358 : vector<256xf32>
    %361 = arith.addf %356, %360 : vector<256xf32>
    %c385_i32 = arith.constant 385 : i32
    %362 = tpu.dynamic_rotate %164 by %c385_i32 dim 1 : vector<2x512xf32>, i32 -> vector<2x512xf32>
    %363 = vector.extract_strided_slice %362 {offsets = [0, 0], sizes = [1, 256], strides = [1, 1]} : vector<2x512xf32> to vector<1x256xf32>
    %364 = vector.shape_cast %363 : vector<1x256xf32> to vector<256xf32>
    %365 = vector.broadcast %23 : f32 to vector<256xf32>
    %366 = arith.mulf %365, %364 : vector<256xf32>
    %367 = arith.addf %361, %366 : vector<256xf32>
    %368 = vector.extract_strided_slice %362 {offsets = [1, 0], sizes = [1, 256], strides = [1, 1]} : vector<2x512xf32> to vector<1x256xf32>
    %369 = vector.shape_cast %368 : vector<1x256xf32> to vector<256xf32>
    %370 = vector.broadcast %72 : f32 to vector<256xf32>
    %371 = arith.mulf %370, %369 : vector<256xf32>
    %372 = arith.addf %367, %371 : vector<256xf32>
    %c369_i32 = arith.constant 369 : i32
    %373 = tpu.dynamic_rotate %164 by %c369_i32 dim 1 : vector<2x512xf32>, i32 -> vector<2x512xf32>
    %374 = vector.extract_strided_slice %373 {offsets = [0, 0], sizes = [1, 256], strides = [1, 1]} : vector<2x512xf32> to vector<1x256xf32>
    %375 = vector.shape_cast %374 : vector<1x256xf32> to vector<256xf32>
    %376 = vector.broadcast %30 : f32 to vector<256xf32>
    %377 = arith.mulf %376, %375 : vector<256xf32>
    %378 = arith.addf %372, %377 : vector<256xf32>
    %379 = vector.extract_strided_slice %373 {offsets = [1, 0], sizes = [1, 256], strides = [1, 1]} : vector<2x512xf32> to vector<1x256xf32>
    %380 = vector.shape_cast %379 : vector<1x256xf32> to vector<256xf32>
    %381 = vector.broadcast %79 : f32 to vector<256xf32>
    %382 = arith.mulf %381, %380 : vector<256xf32>
    %383 = arith.addf %378, %382 : vector<256xf32>
    %c353_i32 = arith.constant 353 : i32
    %384 = tpu.dynamic_rotate %164 by %c353_i32 dim 1 : vector<2x512xf32>, i32 -> vector<2x512xf32>
    %385 = vector.extract_strided_slice %384 {offsets = [0, 0], sizes = [1, 256], strides = [1, 1]} : vector<2x512xf32> to vector<1x256xf32>
    %386 = vector.shape_cast %385 : vector<1x256xf32> to vector<256xf32>
    %387 = vector.broadcast %37 : f32 to vector<256xf32>
    %388 = arith.mulf %387, %386 : vector<256xf32>
    %389 = arith.addf %383, %388 : vector<256xf32>
    %390 = vector.extract_strided_slice %384 {offsets = [1, 0], sizes = [1, 256], strides = [1, 1]} : vector<2x512xf32> to vector<1x256xf32>
    %391 = vector.shape_cast %390 : vector<1x256xf32> to vector<256xf32>
    %392 = vector.broadcast %86 : f32 to vector<256xf32>
    %393 = arith.mulf %392, %391 : vector<256xf32>
    %394 = arith.addf %389, %393 : vector<256xf32>
    %c337_i32 = arith.constant 337 : i32
    %395 = tpu.dynamic_rotate %164 by %c337_i32 dim 1 : vector<2x512xf32>, i32 -> vector<2x512xf32>
    %396 = vector.extract_strided_slice %395 {offsets = [0, 0], sizes = [1, 256], strides = [1, 1]} : vector<2x512xf32> to vector<1x256xf32>
    %397 = vector.shape_cast %396 : vector<1x256xf32> to vector<256xf32>
    %398 = vector.broadcast %44 : f32 to vector<256xf32>
    %399 = arith.mulf %398, %397 : vector<256xf32>
    %400 = arith.addf %394, %399 : vector<256xf32>
    %401 = vector.extract_strided_slice %395 {offsets = [1, 0], sizes = [1, 256], strides = [1, 1]} : vector<2x512xf32> to vector<1x256xf32>
    %402 = vector.shape_cast %401 : vector<1x256xf32> to vector<256xf32>
    %403 = vector.broadcast %93 : f32 to vector<256xf32>
    %404 = arith.mulf %403, %402 : vector<256xf32>
    %405 = arith.addf %400, %404 : vector<256xf32>
    %cst_28 = arith.constant 0.000000e+00 : f32
    %406 = vector.broadcast %cst_28 : f32 to vector<256xf32>
    %407 = arith.select %118, %405, %406 : vector<256xi1>, vector<256xf32>
    %408 = arith.addf %327, %407 : vector<256xf32>
    %cst_29 = arith.constant 0.000000e+00 : f32
    %409 = vector.broadcast %cst_29 : f32 to vector<256xf32>
    %c432_i32 = arith.constant 432 : i32
    %410 = tpu.dynamic_rotate %164 by %c432_i32 dim 1 : vector<2x512xf32>, i32 -> vector<2x512xf32>
    %411 = vector.extract_strided_slice %410 {offsets = [0, 0], sizes = [1, 256], strides = [1, 1]} : vector<2x512xf32> to vector<1x256xf32>
    %412 = vector.shape_cast %411 : vector<1x256xf32> to vector<256xf32>
    %413 = vector.broadcast %3 : f32 to vector<256xf32>
    %414 = arith.mulf %413, %412 : vector<256xf32>
    %415 = arith.addf %409, %414 : vector<256xf32>
    %416 = vector.extract_strided_slice %410 {offsets = [1, 0], sizes = [1, 256], strides = [1, 1]} : vector<2x512xf32> to vector<1x256xf32>
    %417 = vector.shape_cast %416 : vector<1x256xf32> to vector<256xf32>
    %418 = vector.broadcast %52 : f32 to vector<256xf32>
    %419 = arith.mulf %418, %417 : vector<256xf32>
    %420 = arith.addf %415, %419 : vector<256xf32>
    %c416_i32 = arith.constant 416 : i32
    %421 = tpu.dynamic_rotate %164 by %c416_i32 dim 1 : vector<2x512xf32>, i32 -> vector<2x512xf32>
    %422 = vector.extract_strided_slice %421 {offsets = [0, 0], sizes = [1, 256], strides = [1, 1]} : vector<2x512xf32> to vector<1x256xf32>
    %423 = vector.shape_cast %422 : vector<1x256xf32> to vector<256xf32>
    %424 = vector.broadcast %10 : f32 to vector<256xf32>
    %425 = arith.mulf %424, %423 : vector<256xf32>
    %426 = arith.addf %420, %425 : vector<256xf32>
    %427 = vector.extract_strided_slice %421 {offsets = [1, 0], sizes = [1, 256], strides = [1, 1]} : vector<2x512xf32> to vector<1x256xf32>
    %428 = vector.shape_cast %427 : vector<1x256xf32> to vector<256xf32>
    %429 = vector.broadcast %59 : f32 to vector<256xf32>
    %430 = arith.mulf %429, %428 : vector<256xf32>
    %431 = arith.addf %426, %430 : vector<256xf32>
    %c400_i32 = arith.constant 400 : i32
    %432 = tpu.dynamic_rotate %164 by %c400_i32 dim 1 : vector<2x512xf32>, i32 -> vector<2x512xf32>
    %433 = vector.extract_strided_slice %432 {offsets = [0, 0], sizes = [1, 256], strides = [1, 1]} : vector<2x512xf32> to vector<1x256xf32>
    %434 = vector.shape_cast %433 : vector<1x256xf32> to vector<256xf32>
    %435 = vector.broadcast %17 : f32 to vector<256xf32>
    %436 = arith.mulf %435, %434 : vector<256xf32>
    %437 = arith.addf %431, %436 : vector<256xf32>
    %438 = vector.extract_strided_slice %432 {offsets = [1, 0], sizes = [1, 256], strides = [1, 1]} : vector<2x512xf32> to vector<1x256xf32>
    %439 = vector.shape_cast %438 : vector<1x256xf32> to vector<256xf32>
    %440 = vector.broadcast %66 : f32 to vector<256xf32>
    %441 = arith.mulf %440, %439 : vector<256xf32>
    %442 = arith.addf %437, %441 : vector<256xf32>
    %c384_i32 = arith.constant 384 : i32
    %443 = tpu.dynamic_rotate %164 by %c384_i32 dim 1 : vector<2x512xf32>, i32 -> vector<2x512xf32>
    %444 = vector.extract_strided_slice %443 {offsets = [0, 0], sizes = [1, 256], strides = [1, 1]} : vector<2x512xf32> to vector<1x256xf32>
    %445 = vector.shape_cast %444 : vector<1x256xf32> to vector<256xf32>
    %446 = vector.broadcast %24 : f32 to vector<256xf32>
    %447 = arith.mulf %446, %445 : vector<256xf32>
    %448 = arith.addf %442, %447 : vector<256xf32>
    %449 = vector.extract_strided_slice %443 {offsets = [1, 0], sizes = [1, 256], strides = [1, 1]} : vector<2x512xf32> to vector<1x256xf32>
    %450 = vector.shape_cast %449 : vector<1x256xf32> to vector<256xf32>
    %451 = vector.broadcast %73 : f32 to vector<256xf32>
    %452 = arith.mulf %451, %450 : vector<256xf32>
    %453 = arith.addf %448, %452 : vector<256xf32>
    %c368_i32 = arith.constant 368 : i32
    %454 = tpu.dynamic_rotate %164 by %c368_i32 dim 1 : vector<2x512xf32>, i32 -> vector<2x512xf32>
    %455 = vector.extract_strided_slice %454 {offsets = [0, 0], sizes = [1, 256], strides = [1, 1]} : vector<2x512xf32> to vector<1x256xf32>
    %456 = vector.shape_cast %455 : vector<1x256xf32> to vector<256xf32>
    %457 = vector.broadcast %31 : f32 to vector<256xf32>
    %458 = arith.mulf %457, %456 : vector<256xf32>
    %459 = arith.addf %453, %458 : vector<256xf32>
    %460 = vector.extract_strided_slice %454 {offsets = [1, 0], sizes = [1, 256], strides = [1, 1]} : vector<2x512xf32> to vector<1x256xf32>
    %461 = vector.shape_cast %460 : vector<1x256xf32> to vector<256xf32>
    %462 = vector.broadcast %80 : f32 to vector<256xf32>
    %463 = arith.mulf %462, %461 : vector<256xf32>
    %464 = arith.addf %459, %463 : vector<256xf32>
    %c352_i32 = arith.constant 352 : i32
    %465 = tpu.dynamic_rotate %164 by %c352_i32 dim 1 : vector<2x512xf32>, i32 -> vector<2x512xf32>
    %466 = vector.extract_strided_slice %465 {offsets = [0, 0], sizes = [1, 256], strides = [1, 1]} : vector<2x512xf32> to vector<1x256xf32>
    %467 = vector.shape_cast %466 : vector<1x256xf32> to vector<256xf32>
    %468 = vector.broadcast %38 : f32 to vector<256xf32>
    %469 = arith.mulf %468, %467 : vector<256xf32>
    %470 = arith.addf %464, %469 : vector<256xf32>
    %471 = vector.extract_strided_slice %465 {offsets = [1, 0], sizes = [1, 256], strides = [1, 1]} : vector<2x512xf32> to vector<1x256xf32>
    %472 = vector.shape_cast %471 : vector<1x256xf32> to vector<256xf32>
    %473 = vector.broadcast %87 : f32 to vector<256xf32>
    %474 = arith.mulf %473, %472 : vector<256xf32>
    %475 = arith.addf %470, %474 : vector<256xf32>
    %c336_i32 = arith.constant 336 : i32
    %476 = tpu.dynamic_rotate %164 by %c336_i32 dim 1 : vector<2x512xf32>, i32 -> vector<2x512xf32>
    %477 = vector.extract_strided_slice %476 {offsets = [0, 0], sizes = [1, 256], strides = [1, 1]} : vector<2x512xf32> to vector<1x256xf32>
    %478 = vector.shape_cast %477 : vector<1x256xf32> to vector<256xf32>
    %479 = vector.broadcast %45 : f32 to vector<256xf32>
    %480 = arith.mulf %479, %478 : vector<256xf32>
    %481 = arith.addf %475, %480 : vector<256xf32>
    %482 = vector.extract_strided_slice %476 {offsets = [1, 0], sizes = [1, 256], strides = [1, 1]} : vector<2x512xf32> to vector<1x256xf32>
    %483 = vector.shape_cast %482 : vector<1x256xf32> to vector<256xf32>
    %484 = vector.broadcast %94 : f32 to vector<256xf32>
    %485 = arith.mulf %484, %483 : vector<256xf32>
    %486 = arith.addf %481, %485 : vector<256xf32>
    %487 = arith.addf %408, %486 : vector<256xf32>
    %cst_30 = arith.constant 0.000000e+00 : f32
    %488 = vector.broadcast %cst_30 : f32 to vector<256xf32>
    %c431_i32 = arith.constant 431 : i32
    %489 = tpu.dynamic_rotate %164 by %c431_i32 dim 1 : vector<2x512xf32>, i32 -> vector<2x512xf32>
    %490 = vector.extract_strided_slice %489 {offsets = [0, 0], sizes = [1, 256], strides = [1, 1]} : vector<2x512xf32> to vector<1x256xf32>
    %491 = vector.shape_cast %490 : vector<1x256xf32> to vector<256xf32>
    %492 = vector.broadcast %4 : f32 to vector<256xf32>
    %493 = arith.mulf %492, %491 : vector<256xf32>
    %494 = arith.addf %488, %493 : vector<256xf32>
    %495 = vector.extract_strided_slice %489 {offsets = [1, 0], sizes = [1, 256], strides = [1, 1]} : vector<2x512xf32> to vector<1x256xf32>
    %496 = vector.shape_cast %495 : vector<1x256xf32> to vector<256xf32>
    %497 = vector.broadcast %53 : f32 to vector<256xf32>
    %498 = arith.mulf %497, %496 : vector<256xf32>
    %499 = arith.addf %494, %498 : vector<256xf32>
    %c415_i32 = arith.constant 415 : i32
    %500 = tpu.dynamic_rotate %164 by %c415_i32 dim 1 : vector<2x512xf32>, i32 -> vector<2x512xf32>
    %501 = vector.extract_strided_slice %500 {offsets = [0, 0], sizes = [1, 256], strides = [1, 1]} : vector<2x512xf32> to vector<1x256xf32>
    %502 = vector.shape_cast %501 : vector<1x256xf32> to vector<256xf32>
    %503 = vector.broadcast %11 : f32 to vector<256xf32>
    %504 = arith.mulf %503, %502 : vector<256xf32>
    %505 = arith.addf %499, %504 : vector<256xf32>
    %506 = vector.extract_strided_slice %500 {offsets = [1, 0], sizes = [1, 256], strides = [1, 1]} : vector<2x512xf32> to vector<1x256xf32>
    %507 = vector.shape_cast %506 : vector<1x256xf32> to vector<256xf32>
    %508 = vector.broadcast %60 : f32 to vector<256xf32>
    %509 = arith.mulf %508, %507 : vector<256xf32>
    %510 = arith.addf %505, %509 : vector<256xf32>
    %c399_i32 = arith.constant 399 : i32
    %511 = tpu.dynamic_rotate %164 by %c399_i32 dim 1 : vector<2x512xf32>, i32 -> vector<2x512xf32>
    %512 = vector.extract_strided_slice %511 {offsets = [0, 0], sizes = [1, 256], strides = [1, 1]} : vector<2x512xf32> to vector<1x256xf32>
    %513 = vector.shape_cast %512 : vector<1x256xf32> to vector<256xf32>
    %514 = vector.broadcast %18 : f32 to vector<256xf32>
    %515 = arith.mulf %514, %513 : vector<256xf32>
    %516 = arith.addf %510, %515 : vector<256xf32>
    %517 = vector.extract_strided_slice %511 {offsets = [1, 0], sizes = [1, 256], strides = [1, 1]} : vector<2x512xf32> to vector<1x256xf32>
    %518 = vector.shape_cast %517 : vector<1x256xf32> to vector<256xf32>
    %519 = vector.broadcast %67 : f32 to vector<256xf32>
    %520 = arith.mulf %519, %518 : vector<256xf32>
    %521 = arith.addf %516, %520 : vector<256xf32>
    %c383_i32 = arith.constant 383 : i32
    %522 = tpu.dynamic_rotate %164 by %c383_i32 dim 1 : vector<2x512xf32>, i32 -> vector<2x512xf32>
    %523 = vector.extract_strided_slice %522 {offsets = [0, 0], sizes = [1, 256], strides = [1, 1]} : vector<2x512xf32> to vector<1x256xf32>
    %524 = vector.shape_cast %523 : vector<1x256xf32> to vector<256xf32>
    %525 = vector.broadcast %25 : f32 to vector<256xf32>
    %526 = arith.mulf %525, %524 : vector<256xf32>
    %527 = arith.addf %521, %526 : vector<256xf32>
    %528 = vector.extract_strided_slice %522 {offsets = [1, 0], sizes = [1, 256], strides = [1, 1]} : vector<2x512xf32> to vector<1x256xf32>
    %529 = vector.shape_cast %528 : vector<1x256xf32> to vector<256xf32>
    %530 = vector.broadcast %74 : f32 to vector<256xf32>
    %531 = arith.mulf %530, %529 : vector<256xf32>
    %532 = arith.addf %527, %531 : vector<256xf32>
    %c367_i32 = arith.constant 367 : i32
    %533 = tpu.dynamic_rotate %164 by %c367_i32 dim 1 : vector<2x512xf32>, i32 -> vector<2x512xf32>
    %534 = vector.extract_strided_slice %533 {offsets = [0, 0], sizes = [1, 256], strides = [1, 1]} : vector<2x512xf32> to vector<1x256xf32>
    %535 = vector.shape_cast %534 : vector<1x256xf32> to vector<256xf32>
    %536 = vector.broadcast %32 : f32 to vector<256xf32>
    %537 = arith.mulf %536, %535 : vector<256xf32>
    %538 = arith.addf %532, %537 : vector<256xf32>
    %539 = vector.extract_strided_slice %533 {offsets = [1, 0], sizes = [1, 256], strides = [1, 1]} : vector<2x512xf32> to vector<1x256xf32>
    %540 = vector.shape_cast %539 : vector<1x256xf32> to vector<256xf32>
    %541 = vector.broadcast %81 : f32 to vector<256xf32>
    %542 = arith.mulf %541, %540 : vector<256xf32>
    %543 = arith.addf %538, %542 : vector<256xf32>
    %c351_i32 = arith.constant 351 : i32
    %544 = tpu.dynamic_rotate %164 by %c351_i32 dim 1 : vector<2x512xf32>, i32 -> vector<2x512xf32>
    %545 = vector.extract_strided_slice %544 {offsets = [0, 0], sizes = [1, 256], strides = [1, 1]} : vector<2x512xf32> to vector<1x256xf32>
    %546 = vector.shape_cast %545 : vector<1x256xf32> to vector<256xf32>
    %547 = vector.broadcast %39 : f32 to vector<256xf32>
    %548 = arith.mulf %547, %546 : vector<256xf32>
    %549 = arith.addf %543, %548 : vector<256xf32>
    %550 = vector.extract_strided_slice %544 {offsets = [1, 0], sizes = [1, 256], strides = [1, 1]} : vector<2x512xf32> to vector<1x256xf32>
    %551 = vector.shape_cast %550 : vector<1x256xf32> to vector<256xf32>
    %552 = vector.broadcast %88 : f32 to vector<256xf32>
    %553 = arith.mulf %552, %551 : vector<256xf32>
    %554 = arith.addf %549, %553 : vector<256xf32>
    %c335_i32 = arith.constant 335 : i32
    %555 = tpu.dynamic_rotate %164 by %c335_i32 dim 1 : vector<2x512xf32>, i32 -> vector<2x512xf32>
    %556 = vector.extract_strided_slice %555 {offsets = [0, 0], sizes = [1, 256], strides = [1, 1]} : vector<2x512xf32> to vector<1x256xf32>
    %557 = vector.shape_cast %556 : vector<1x256xf32> to vector<256xf32>
    %558 = vector.broadcast %46 : f32 to vector<256xf32>
    %559 = arith.mulf %558, %557 : vector<256xf32>
    %560 = arith.addf %554, %559 : vector<256xf32>
    %561 = vector.extract_strided_slice %555 {offsets = [1, 0], sizes = [1, 256], strides = [1, 1]} : vector<2x512xf32> to vector<1x256xf32>
    %562 = vector.shape_cast %561 : vector<1x256xf32> to vector<256xf32>
    %563 = vector.broadcast %95 : f32 to vector<256xf32>
    %564 = arith.mulf %563, %562 : vector<256xf32>
    %565 = arith.addf %560, %564 : vector<256xf32>
    %cst_31 = arith.constant 0.000000e+00 : f32
    %566 = vector.broadcast %cst_31 : f32 to vector<256xf32>
    %567 = arith.select %123, %565, %566 : vector<256xi1>, vector<256xf32>
    %568 = arith.addf %487, %567 : vector<256xf32>
    %cst_32 = arith.constant 0.000000e+00 : f32
    %569 = vector.broadcast %cst_32 : f32 to vector<256xf32>
    %c430_i32 = arith.constant 430 : i32
    %570 = tpu.dynamic_rotate %164 by %c430_i32 dim 1 : vector<2x512xf32>, i32 -> vector<2x512xf32>
    %571 = vector.extract_strided_slice %570 {offsets = [0, 0], sizes = [1, 256], strides = [1, 1]} : vector<2x512xf32> to vector<1x256xf32>
    %572 = vector.shape_cast %571 : vector<1x256xf32> to vector<256xf32>
    %573 = vector.broadcast %5 : f32 to vector<256xf32>
    %574 = arith.mulf %573, %572 : vector<256xf32>
    %575 = arith.addf %569, %574 : vector<256xf32>
    %576 = vector.extract_strided_slice %570 {offsets = [1, 0], sizes = [1, 256], strides = [1, 1]} : vector<2x512xf32> to vector<1x256xf32>
    %577 = vector.shape_cast %576 : vector<1x256xf32> to vector<256xf32>
    %578 = vector.broadcast %54 : f32 to vector<256xf32>
    %579 = arith.mulf %578, %577 : vector<256xf32>
    %580 = arith.addf %575, %579 : vector<256xf32>
    %c414_i32 = arith.constant 414 : i32
    %581 = tpu.dynamic_rotate %164 by %c414_i32 dim 1 : vector<2x512xf32>, i32 -> vector<2x512xf32>
    %582 = vector.extract_strided_slice %581 {offsets = [0, 0], sizes = [1, 256], strides = [1, 1]} : vector<2x512xf32> to vector<1x256xf32>
    %583 = vector.shape_cast %582 : vector<1x256xf32> to vector<256xf32>
    %584 = vector.broadcast %12 : f32 to vector<256xf32>
    %585 = arith.mulf %584, %583 : vector<256xf32>
    %586 = arith.addf %580, %585 : vector<256xf32>
    %587 = vector.extract_strided_slice %581 {offsets = [1, 0], sizes = [1, 256], strides = [1, 1]} : vector<2x512xf32> to vector<1x256xf32>
    %588 = vector.shape_cast %587 : vector<1x256xf32> to vector<256xf32>
    %589 = vector.broadcast %61 : f32 to vector<256xf32>
    %590 = arith.mulf %589, %588 : vector<256xf32>
    %591 = arith.addf %586, %590 : vector<256xf32>
    %c398_i32 = arith.constant 398 : i32
    %592 = tpu.dynamic_rotate %164 by %c398_i32 dim 1 : vector<2x512xf32>, i32 -> vector<2x512xf32>
    %593 = vector.extract_strided_slice %592 {offsets = [0, 0], sizes = [1, 256], strides = [1, 1]} : vector<2x512xf32> to vector<1x256xf32>
    %594 = vector.shape_cast %593 : vector<1x256xf32> to vector<256xf32>
    %595 = vector.broadcast %19 : f32 to vector<256xf32>
    %596 = arith.mulf %595, %594 : vector<256xf32>
    %597 = arith.addf %591, %596 : vector<256xf32>
    %598 = vector.extract_strided_slice %592 {offsets = [1, 0], sizes = [1, 256], strides = [1, 1]} : vector<2x512xf32> to vector<1x256xf32>
    %599 = vector.shape_cast %598 : vector<1x256xf32> to vector<256xf32>
    %600 = vector.broadcast %68 : f32 to vector<256xf32>
    %601 = arith.mulf %600, %599 : vector<256xf32>
    %602 = arith.addf %597, %601 : vector<256xf32>
    %c382_i32 = arith.constant 382 : i32
    %603 = tpu.dynamic_rotate %164 by %c382_i32 dim 1 : vector<2x512xf32>, i32 -> vector<2x512xf32>
    %604 = vector.extract_strided_slice %603 {offsets = [0, 0], sizes = [1, 256], strides = [1, 1]} : vector<2x512xf32> to vector<1x256xf32>
    %605 = vector.shape_cast %604 : vector<1x256xf32> to vector<256xf32>
    %606 = vector.broadcast %26 : f32 to vector<256xf32>
    %607 = arith.mulf %606, %605 : vector<256xf32>
    %608 = arith.addf %602, %607 : vector<256xf32>
    %609 = vector.extract_strided_slice %603 {offsets = [1, 0], sizes = [1, 256], strides = [1, 1]} : vector<2x512xf32> to vector<1x256xf32>
    %610 = vector.shape_cast %609 : vector<1x256xf32> to vector<256xf32>
    %611 = vector.broadcast %75 : f32 to vector<256xf32>
    %612 = arith.mulf %611, %610 : vector<256xf32>
    %613 = arith.addf %608, %612 : vector<256xf32>
    %c366_i32 = arith.constant 366 : i32
    %614 = tpu.dynamic_rotate %164 by %c366_i32 dim 1 : vector<2x512xf32>, i32 -> vector<2x512xf32>
    %615 = vector.extract_strided_slice %614 {offsets = [0, 0], sizes = [1, 256], strides = [1, 1]} : vector<2x512xf32> to vector<1x256xf32>
    %616 = vector.shape_cast %615 : vector<1x256xf32> to vector<256xf32>
    %617 = vector.broadcast %33 : f32 to vector<256xf32>
    %618 = arith.mulf %617, %616 : vector<256xf32>
    %619 = arith.addf %613, %618 : vector<256xf32>
    %620 = vector.extract_strided_slice %614 {offsets = [1, 0], sizes = [1, 256], strides = [1, 1]} : vector<2x512xf32> to vector<1x256xf32>
    %621 = vector.shape_cast %620 : vector<1x256xf32> to vector<256xf32>
    %622 = vector.broadcast %82 : f32 to vector<256xf32>
    %623 = arith.mulf %622, %621 : vector<256xf32>
    %624 = arith.addf %619, %623 : vector<256xf32>
    %c350_i32 = arith.constant 350 : i32
    %625 = tpu.dynamic_rotate %164 by %c350_i32 dim 1 : vector<2x512xf32>, i32 -> vector<2x512xf32>
    %626 = vector.extract_strided_slice %625 {offsets = [0, 0], sizes = [1, 256], strides = [1, 1]} : vector<2x512xf32> to vector<1x256xf32>
    %627 = vector.shape_cast %626 : vector<1x256xf32> to vector<256xf32>
    %628 = vector.broadcast %40 : f32 to vector<256xf32>
    %629 = arith.mulf %628, %627 : vector<256xf32>
    %630 = arith.addf %624, %629 : vector<256xf32>
    %631 = vector.extract_strided_slice %625 {offsets = [1, 0], sizes = [1, 256], strides = [1, 1]} : vector<2x512xf32> to vector<1x256xf32>
    %632 = vector.shape_cast %631 : vector<1x256xf32> to vector<256xf32>
    %633 = vector.broadcast %89 : f32 to vector<256xf32>
    %634 = arith.mulf %633, %632 : vector<256xf32>
    %635 = arith.addf %630, %634 : vector<256xf32>
    %c334_i32 = arith.constant 334 : i32
    %636 = tpu.dynamic_rotate %164 by %c334_i32 dim 1 : vector<2x512xf32>, i32 -> vector<2x512xf32>
    %637 = vector.extract_strided_slice %636 {offsets = [0, 0], sizes = [1, 256], strides = [1, 1]} : vector<2x512xf32> to vector<1x256xf32>
    %638 = vector.shape_cast %637 : vector<1x256xf32> to vector<256xf32>
    %639 = vector.broadcast %47 : f32 to vector<256xf32>
    %640 = arith.mulf %639, %638 : vector<256xf32>
    %641 = arith.addf %635, %640 : vector<256xf32>
    %642 = vector.extract_strided_slice %636 {offsets = [1, 0], sizes = [1, 256], strides = [1, 1]} : vector<2x512xf32> to vector<1x256xf32>
    %643 = vector.shape_cast %642 : vector<1x256xf32> to vector<256xf32>
    %644 = vector.broadcast %96 : f32 to vector<256xf32>
    %645 = arith.mulf %644, %643 : vector<256xf32>
    %646 = arith.addf %641, %645 : vector<256xf32>
    %cst_33 = arith.constant 0.000000e+00 : f32
    %647 = vector.broadcast %cst_33 : f32 to vector<256xf32>
    %648 = arith.select %128, %646, %647 : vector<256xi1>, vector<256xf32>
    %649 = arith.addf %568, %648 : vector<256xf32>
    %cst_34 = arith.constant 0.000000e+00 : f32
    %650 = vector.broadcast %cst_34 : f32 to vector<256xf32>
    %c429_i32 = arith.constant 429 : i32
    %651 = tpu.dynamic_rotate %164 by %c429_i32 dim 1 : vector<2x512xf32>, i32 -> vector<2x512xf32>
    %652 = vector.extract_strided_slice %651 {offsets = [0, 0], sizes = [1, 256], strides = [1, 1]} : vector<2x512xf32> to vector<1x256xf32>
    %653 = vector.shape_cast %652 : vector<1x256xf32> to vector<256xf32>
    %654 = vector.broadcast %6 : f32 to vector<256xf32>
    %655 = arith.mulf %654, %653 : vector<256xf32>
    %656 = arith.addf %650, %655 : vector<256xf32>
    %657 = vector.extract_strided_slice %651 {offsets = [1, 0], sizes = [1, 256], strides = [1, 1]} : vector<2x512xf32> to vector<1x256xf32>
    %658 = vector.shape_cast %657 : vector<1x256xf32> to vector<256xf32>
    %659 = vector.broadcast %55 : f32 to vector<256xf32>
    %660 = arith.mulf %659, %658 : vector<256xf32>
    %661 = arith.addf %656, %660 : vector<256xf32>
    %c413_i32 = arith.constant 413 : i32
    %662 = tpu.dynamic_rotate %164 by %c413_i32 dim 1 : vector<2x512xf32>, i32 -> vector<2x512xf32>
    %663 = vector.extract_strided_slice %662 {offsets = [0, 0], sizes = [1, 256], strides = [1, 1]} : vector<2x512xf32> to vector<1x256xf32>
    %664 = vector.shape_cast %663 : vector<1x256xf32> to vector<256xf32>
    %665 = vector.broadcast %13 : f32 to vector<256xf32>
    %666 = arith.mulf %665, %664 : vector<256xf32>
    %667 = arith.addf %661, %666 : vector<256xf32>
    %668 = vector.extract_strided_slice %662 {offsets = [1, 0], sizes = [1, 256], strides = [1, 1]} : vector<2x512xf32> to vector<1x256xf32>
    %669 = vector.shape_cast %668 : vector<1x256xf32> to vector<256xf32>
    %670 = vector.broadcast %62 : f32 to vector<256xf32>
    %671 = arith.mulf %670, %669 : vector<256xf32>
    %672 = arith.addf %667, %671 : vector<256xf32>
    %c397_i32 = arith.constant 397 : i32
    %673 = tpu.dynamic_rotate %164 by %c397_i32 dim 1 : vector<2x512xf32>, i32 -> vector<2x512xf32>
    %674 = vector.extract_strided_slice %673 {offsets = [0, 0], sizes = [1, 256], strides = [1, 1]} : vector<2x512xf32> to vector<1x256xf32>
    %675 = vector.shape_cast %674 : vector<1x256xf32> to vector<256xf32>
    %676 = vector.broadcast %20 : f32 to vector<256xf32>
    %677 = arith.mulf %676, %675 : vector<256xf32>
    %678 = arith.addf %672, %677 : vector<256xf32>
    %679 = vector.extract_strided_slice %673 {offsets = [1, 0], sizes = [1, 256], strides = [1, 1]} : vector<2x512xf32> to vector<1x256xf32>
    %680 = vector.shape_cast %679 : vector<1x256xf32> to vector<256xf32>
    %681 = vector.broadcast %69 : f32 to vector<256xf32>
    %682 = arith.mulf %681, %680 : vector<256xf32>
    %683 = arith.addf %678, %682 : vector<256xf32>
    %c381_i32 = arith.constant 381 : i32
    %684 = tpu.dynamic_rotate %164 by %c381_i32 dim 1 : vector<2x512xf32>, i32 -> vector<2x512xf32>
    %685 = vector.extract_strided_slice %684 {offsets = [0, 0], sizes = [1, 256], strides = [1, 1]} : vector<2x512xf32> to vector<1x256xf32>
    %686 = vector.shape_cast %685 : vector<1x256xf32> to vector<256xf32>
    %687 = vector.broadcast %27 : f32 to vector<256xf32>
    %688 = arith.mulf %687, %686 : vector<256xf32>
    %689 = arith.addf %683, %688 : vector<256xf32>
    %690 = vector.extract_strided_slice %684 {offsets = [1, 0], sizes = [1, 256], strides = [1, 1]} : vector<2x512xf32> to vector<1x256xf32>
    %691 = vector.shape_cast %690 : vector<1x256xf32> to vector<256xf32>
    %692 = vector.broadcast %76 : f32 to vector<256xf32>
    %693 = arith.mulf %692, %691 : vector<256xf32>
    %694 = arith.addf %689, %693 : vector<256xf32>
    %c365_i32 = arith.constant 365 : i32
    %695 = tpu.dynamic_rotate %164 by %c365_i32 dim 1 : vector<2x512xf32>, i32 -> vector<2x512xf32>
    %696 = vector.extract_strided_slice %695 {offsets = [0, 0], sizes = [1, 256], strides = [1, 1]} : vector<2x512xf32> to vector<1x256xf32>
    %697 = vector.shape_cast %696 : vector<1x256xf32> to vector<256xf32>
    %698 = vector.broadcast %34 : f32 to vector<256xf32>
    %699 = arith.mulf %698, %697 : vector<256xf32>
    %700 = arith.addf %694, %699 : vector<256xf32>
    %701 = vector.extract_strided_slice %695 {offsets = [1, 0], sizes = [1, 256], strides = [1, 1]} : vector<2x512xf32> to vector<1x256xf32>
    %702 = vector.shape_cast %701 : vector<1x256xf32> to vector<256xf32>
    %703 = vector.broadcast %83 : f32 to vector<256xf32>
    %704 = arith.mulf %703, %702 : vector<256xf32>
    %705 = arith.addf %700, %704 : vector<256xf32>
    %c349_i32 = arith.constant 349 : i32
    %706 = tpu.dynamic_rotate %164 by %c349_i32 dim 1 : vector<2x512xf32>, i32 -> vector<2x512xf32>
    %707 = vector.extract_strided_slice %706 {offsets = [0, 0], sizes = [1, 256], strides = [1, 1]} : vector<2x512xf32> to vector<1x256xf32>
    %708 = vector.shape_cast %707 : vector<1x256xf32> to vector<256xf32>
    %709 = vector.broadcast %41 : f32 to vector<256xf32>
    %710 = arith.mulf %709, %708 : vector<256xf32>
    %711 = arith.addf %705, %710 : vector<256xf32>
    %712 = vector.extract_strided_slice %706 {offsets = [1, 0], sizes = [1, 256], strides = [1, 1]} : vector<2x512xf32> to vector<1x256xf32>
    %713 = vector.shape_cast %712 : vector<1x256xf32> to vector<256xf32>
    %714 = vector.broadcast %90 : f32 to vector<256xf32>
    %715 = arith.mulf %714, %713 : vector<256xf32>
    %716 = arith.addf %711, %715 : vector<256xf32>
    %c333_i32 = arith.constant 333 : i32
    %717 = tpu.dynamic_rotate %164 by %c333_i32 dim 1 : vector<2x512xf32>, i32 -> vector<2x512xf32>
    %718 = vector.extract_strided_slice %717 {offsets = [0, 0], sizes = [1, 256], strides = [1, 1]} : vector<2x512xf32> to vector<1x256xf32>
    %719 = vector.shape_cast %718 : vector<1x256xf32> to vector<256xf32>
    %720 = vector.broadcast %48 : f32 to vector<256xf32>
    %721 = arith.mulf %720, %719 : vector<256xf32>
    %722 = arith.addf %716, %721 : vector<256xf32>
    %723 = vector.extract_strided_slice %717 {offsets = [1, 0], sizes = [1, 256], strides = [1, 1]} : vector<2x512xf32> to vector<1x256xf32>
    %724 = vector.shape_cast %723 : vector<1x256xf32> to vector<256xf32>
    %725 = vector.broadcast %97 : f32 to vector<256xf32>
    %726 = arith.mulf %725, %724 : vector<256xf32>
    %727 = arith.addf %722, %726 : vector<256xf32>
    %cst_35 = arith.constant 0.000000e+00 : f32
    %728 = vector.broadcast %cst_35 : f32 to vector<256xf32>
    %729 = arith.select %133, %727, %728 : vector<256xi1>, vector<256xf32>
    %730 = arith.addf %649, %729 : vector<256xf32>
    %731 = arith.negf %730 : vector<256xf32>
    %732 = math.exp %731 : vector<256xf32>
    %cst_36 = arith.constant 1.000000e+00 : f32
    %733 = vector.broadcast %cst_36 : f32 to vector<256xf32>
    %734 = arith.addf %733, %732 : vector<256xf32>
    %735 = arith.divf %733, %734 : vector<256xf32>
    %c0_i32_37 = arith.constant 0 : i32
    %c0_38 = arith.constant 0 : index
    %736 = arith.index_cast %c0_i32_37 : i32 to index
    %c0_39 = arith.constant 0 : index
    %737 = vector.load %arg1[%c0_38, %736, %c0_39] : memref<1x4x256xf32, #tpu.memory_space<vmem>>, vector<1x1x256xf32>
    %738 = vector.shape_cast %737 : vector<1x1x256xf32> to vector<256xf32>
    %739 = arith.mulf %738, %735 : vector<256xf32>
    %c0_40 = arith.constant 0 : index
    %740 = arith.index_cast %c0_i32_37 : i32 to index
    %c0_41 = arith.constant 0 : index
    %741 = vector.load %arg3[%c0_40, %740, %c0_41] : memref<1x4x256xf32, #tpu.memory_space<vmem>>, vector<1x1x256xf32>
    %742 = vector.shape_cast %741 : vector<1x1x256xf32> to vector<256xf32>
    %743 = vector.shape_cast %739 : vector<256xf32> to vector<1x1x256xf32>
    tpu.vector_store %arg3[%c0_40, %740, %c0_41], %743 {strides = array<i32>} : memref<1x4x256xf32, #tpu.memory_space<vmem>>, vector<1x1x256xf32>,
    %c1_i32_42 = arith.constant 1 : i32
    %c0_43 = arith.constant 0 : index
    %744 = arith.index_cast %c1_i32_42 : i32 to index
    %c0_44 = arith.constant 0 : index
    %745 = vector.load %arg1[%c0_43, %744, %c0_44] : memref<1x4x256xf32, #tpu.memory_space<vmem>>, vector<1x1x256xf32>
    %746 = vector.shape_cast %745 : vector<1x1x256xf32> to vector<256xf32>
    %747 = arith.mulf %746, %735 : vector<256xf32>
    %c0_45 = arith.constant 0 : index
    %748 = arith.index_cast %c1_i32_42 : i32 to index
    %c0_46 = arith.constant 0 : index
    %749 = vector.load %arg3[%c0_45, %748, %c0_46] : memref<1x4x256xf32, #tpu.memory_space<vmem>>, vector<1x1x256xf32>
    %750 = vector.shape_cast %749 : vector<1x1x256xf32> to vector<256xf32>
    %751 = vector.shape_cast %747 : vector<256xf32> to vector<1x1x256xf32>
    tpu.vector_store %arg3[%c0_45, %748, %c0_46], %751 {strides = array<i32>} : memref<1x4x256xf32, #tpu.memory_space<vmem>>, vector<1x1x256xf32>,
    %c2_i32_47 = arith.constant 2 : i32
    %c0_48 = arith.constant 0 : index
    %752 = arith.index_cast %c2_i32_47 : i32 to index
    %c0_49 = arith.constant 0 : index
    %753 = vector.load %arg1[%c0_48, %752, %c0_49] : memref<1x4x256xf32, #tpu.memory_space<vmem>>, vector<1x1x256xf32>
    %754 = vector.shape_cast %753 : vector<1x1x256xf32> to vector<256xf32>
    %755 = arith.mulf %754, %735 : vector<256xf32>
    %c0_50 = arith.constant 0 : index
    %756 = arith.index_cast %c2_i32_47 : i32 to index
    %c0_51 = arith.constant 0 : index
    %757 = vector.load %arg3[%c0_50, %756, %c0_51] : memref<1x4x256xf32, #tpu.memory_space<vmem>>, vector<1x1x256xf32>
    %758 = vector.shape_cast %757 : vector<1x1x256xf32> to vector<256xf32>
    %759 = vector.shape_cast %755 : vector<256xf32> to vector<1x1x256xf32>
    tpu.vector_store %arg3[%c0_50, %756, %c0_51], %759 {strides = array<i32>} : memref<1x4x256xf32, #tpu.memory_space<vmem>>, vector<1x1x256xf32>,
    %c3_i32_52 = arith.constant 3 : i32
    %c0_53 = arith.constant 0 : index
    %760 = arith.index_cast %c3_i32_52 : i32 to index
    %c0_54 = arith.constant 0 : index
    %761 = vector.load %arg1[%c0_53, %760, %c0_54] : memref<1x4x256xf32, #tpu.memory_space<vmem>>, vector<1x1x256xf32>
    %762 = vector.shape_cast %761 : vector<1x1x256xf32> to vector<256xf32>
    %763 = arith.mulf %762, %735 : vector<256xf32>
    %c0_55 = arith.constant 0 : index
    %764 = arith.index_cast %c3_i32_52 : i32 to index
    %c0_56 = arith.constant 0 : index
    %765 = vector.load %arg3[%c0_55, %764, %c0_56] : memref<1x4x256xf32, #tpu.memory_space<vmem>>, vector<1x1x256xf32>
    %766 = vector.shape_cast %765 : vector<1x1x256xf32> to vector<256xf32>
    %767 = vector.shape_cast %763 : vector<256xf32> to vector<1x1x256xf32>
    tpu.vector_store %arg3[%c0_55, %764, %c0_56], %767 {strides = array<i32>} : memref<1x4x256xf32, #tpu.memory_space<vmem>>, vector<1x1x256xf32>,
    %c4_i32_57 = arith.constant 4 : i32
    return
  }
  func.func @transform_0(%arg0: i32) -> (i32, i32, i32) {
    %c0_i32 = arith.constant 0 : i32
    %c0_i32_0 = arith.constant 0 : i32
    %c0_i32_1 = arith.constant 0 : i32
    return %arg0, %c0_i32, %c0_i32_0 : i32, i32, i32
  }
  func.func @transform_1(%arg0: i32) -> i32 {
    %c0_i32 = arith.constant 0 : i32
    %c0_i32_0 = arith.constant 0 : i32
    return %c0_i32 : i32
  }
  func.func @transform_2(%arg0: i32) -> (i32, i32, i32) {
    %c0_i32 = arith.constant 0 : i32
    %c0_i32_0 = arith.constant 0 : i32
    %c0_i32_1 = arith.constant 0 : i32
    return %arg0, %c0_i32, %c0_i32_0 : i32, i32, i32
  }
}

</mosaic_0001>

<bundles_post_ra>
// kernel: tpu_custom_call.1
= control target key start
LH: loop header
LB: loop body
LE: loop exit
PB: predicated region body
PF: predicated region fallthrough
CT: control target
= control target key end

     0   :  { %7 = vsyncpa [#allocation4], 0  ;;  %s3279_s0 = inlined_call_operand.hbm [shape: f32[2,4,256], index: 0, kind: input, shape index: {}, may-alias: {0,2}]   ;;  %s3280_s1 = inlined_call_operand.vmem [shape: f32[98], index: 1, kind: input, shape index: {}]   ;;  %s3281_s2 = inlined_call_operand.hbm [shape: f32[2,4,256], index: 2, kind: output, shape index: {}, may-alias: {0,2}]  }
   0x1   :  { %9 = vsyncpa [#allocation4 + $0x1], 0 }
   0x2   :  { %10 = vsyncpa [#allocation6], 0 }
   0x3   :  { %11 = vsyncpa [#allocation5], 0 }
   0x4   :  { %13 = vsyncpa [#allocation5 + $0x1], 0  ;;  %s2504_s9 = smov 0   ;;  %s2506_s10 = smov 0  }
   0x5   :  { %s2508_s11 = smov 0   ;;  %s2510_s12 = smov 0  }
   0x6 LB: > { %s2525_s13 = sadd.s32 4294967295, %s2437_s12   ;;  %s2082_s14 = sadd.s32 4294967294, %s2437_s12   ;;  %s2437_s12 = sphi %s2510_s12, %s3295_s12   ;;  %s2433_s11 = sphi %s2508_s11, %s3294_s11   ;;  %s2429_s10 = sphi %s2506_s10, %s3293_s10   ;;  %s2425_s9 = sphi %s2504_s9, %s3292_s9  }
   0x7   : > { %p39_p0 = scmp.ne.s32.totalorder %s2429_s10, %s2425_s9  ;;  %p40_p1 = scmp.eq.s32.totalorder %s2525_s13, 0 }
   0x8   : > { %p84_p2 = scmp.eq.s32.totalorder %s2525_s13, 1  ;;  %p90_p3 = scmp.eq.s32.totalorder %s2082_s14, 1 }
   0x9   : > { %p2534_p4 = por %p40_p1, %p39_p0  ;;  %p2083_p5 = scmp.ge.s32.totalorder %s2437_s12, 1 }
   0xa   : > { %p2539_p6 = por %p90_p3, %p39_p0  ;;  %p97_p7 = scmp.lt.s32.totalorder %s2437_s12, 3 }
   0xb   : > { %s109_s19 = sshll.u32 %s3280_s1, 4  ;;  %s2555_s21 = sadd.s32 1, %s2437_s12   ;;  %s110_s19 = int_to_ptr.vmem [resolvable:$true] %s109_s19 }
   0xc   : > { %p2547_p8 = pnand %p2083_p5, %p97_p7  ;;  %s23_s22 = ssub.s32 %s2437_s12, %s2555_s21 }
   0xd   : > { %p24_p12 = scmp.eq.s32.totalorder %s23_s22, 0  ;;  %s26_s23 = sadd.s32 1, %s2433_s11 }
   0xe   : > { %p2216_p10 = pneg %p2547_p8  ;;  %p33_p13 = scmp.ne.s32.totalorder %s2433_s11, %s2429_s10 }
   0xf   : > { %s2439_s24 = smov [#allocation7]   ;;  %p34_p0 = scmp.eq.s32.totalorder %s2437_s12, 0 }
  0x10   : > { %p2217_p11 = pnand %p2216_p10, %p40_p1  ;;  %p2570_p3 = por %p84_p2, %p33_p13 }
  0x11   : > { %s2565_s25 = scalar_select %p24_p12, %s2433_s11, %s26_s23  }
  0x12   : > { %2219 = dma.vmem_to_smem (!%p2217_p11), %s110_s19, 16, %s2439_s24, [#allocation6]  }
  0x13   : > { %s120_s27 = sand.u32 1, %s2433_s11   ;;  %p35_p5 = por %p34_p0, %p33_p13 }
  0x14   : > { %p2229_p7 = scmp.lt.s32.totalorder %s2437_s12, 2  ;;  %s2086_s28 = sshll.u32 %s120_s27, 3 }
  0x15   : > { %s2206_s29 = sshll.u32 %s2437_s12, 3  ;;  %s124_s6 = scalar_lea.vmem [#allocation3], %s2086_s28 }
  0x16   : > { %s129_s4 = scalar_lea.hbm %s3279_s0, %s2206_s29  ;;  %s133_s7 = sshll.u32 %s124_s6, 4  ;;  %s134_s7 = int_to_ptr.vmem [resolvable:$true] %s133_s7 }
  0x17   : > { %s131_s5 = sshll.u32 %s129_s4, 4  ;;  %p2580_p10 = pnand %p2229_p7, %p35_p5  ;;  %s132_s5 = int_to_ptr.hbm [resolvable:$true] %s131_s5 }
  0x18   : > { %s121_s14 = scalar_lea.sflag [#allocation4], %s120_s27  ;;  %s2337_s17 = sshra.s32 %s132_s5, 4  ;;  %s2338_s17 = int_to_ptr.hbm [resolvable:$true] %s2337_s17 }
  0x19   : > { %s2339_s18 = scalar_lea.hbm %s2338_s17, 8  ;;  %p2341_p11 = pneg %p2580_p10 }
  0x1a   : > { %p2340_p2 = scmp.ne.s32.totalorder %s2338_s17, %s2339_s18  ;;  %s2344_s23 = scalar_lea.hbm %s3279_s0, 16 }
  0x1b   : > { %p2345_p0 = scmp.lt.s32.totalorder %s2338_s17, %s3279_s0  ;;  %p2346_p5 = scmp.lt.s32.totalorder %s2344_s23, %s2339_s18 }
  0x1c   : > { %p2342_p12 = pnand %p2341_p11, %p2340_p2 }
  0x1d   : > { %p2347_p7 = por %p2346_p5, %p2345_p0 }
  0x1e   : > { %p2343_p13 = pneg %p2342_p12 }
  0x20   : > { %p2348_p9 = pnand %p2347_p7, %p2343_p13 }
  0x22   : > { %2351 = shalt.err (!%p2348_p9)
}
  0x23   : > { %2223 = dma.hbm_to_vmem [thread:$0]  (!%p2580_p10), %s132_s5, 128, %s134_s7, %s121_s14  }
  0x24   : > { %142 = sbr.rel (%p2547_p8) target bundleno = 695 (0x2b7), region = 28  ;;  %s2597_s27 = sand.u32 (!%p2547_p8), 1, %s2429_s10  }
  0x25   : > { %s2090_s29 = sshll.u32 (!%p2547_p8), %s2597_s27, 3  ;;  %s145_s30 = scalar_lea.sflag (!%p2547_p8), [#allocation4], %s2597_s27 }
  0x26   : > { %s2603_s3 = scalar_lea.vmem (!%p2547_p8), [#allocation3], %s2090_s29 }
  0x29   : > { %2412 = dma.done.wait (%p2534_p4), %s145_s30, 128  }
  0x2a   : > { %2414 = vsyncadd (%p2534_p4), %s145_s30, 4294967168 }
  0x2b   : > { %2416 = dma.done.wait (%p40_p1), [#allocation6], 16  }
  0x2c   : > { %2418 = vsyncadd (%p40_p1), [#allocation6], 4294967280 }
  0x2d   : > { %159 = sfence }
  0x2e   : > { %v316_v0 = vld [vmem:[%s2603_s3] ss:$4 sm:$0x3]  ;;  %v2440_v1 = vmov 0.0   ;;  %v275_v2 = vlaneseq  ;;  %s2441_s15 = smov 51   ;;  %s2442_s20 = smov 35  }
  0x2f   : > { %274 = vst [vmem:[#allocation2] sm:$0xff] %v2440_v1  ;;  %v2190_v3 = vld [vmem:[%s2603_s3 + $0x1] ss:$4 sm:$0x3]  ;;  %s2443_s4 = smov 19   ;;  %s2444_s5 = smov 3  }
  0x30   : > { %v320_v4 = vadd.f32 %v2190_v3, %v316_v0  ;;  %v321_v5 = vmax.f32 %v316_v0, %v2190_v3  ;;  %v2191_v6 = vld [vmem:[%s2603_s3 + $0x2] ss:$4 sm:$0x3]  ;;  %v2192_v7 = vld [vmem:[%s2603_s3 + $0x3] ss:$4 sm:$0x3] }
  0x31   : > { %vm2618_vm0 = vcmp.lt.s32.totalorder %v275_v2, 256  ;;  %s2445_s6 = smov 115   ;;  %s2446_s7 = smov 99   ;;  %v2642_v52 = vand.u32 127, %v275_v2 }
  0x32   : > { %v324_v8 = vadd.f32 %v2191_v6, %v320_v4  ;;  %v325_v9 = vmax.f32 %v321_v5, %v2191_v6  ;;  %s2447_s8 = smov 83   ;;  %s2448_s14 = smov 50  }
  0x33   : > { %s2449_s17 = smov 34   ;;  %s2450_s18 = smov 18   ;;  %vm386_vm1 = vcmp.lt.s32.totalorder %v2642_v52, 35  ;;  %vm354_vm2 = vcmp.lt.s32.totalorder %v2642_v52, 51  ;;  %vm418_vm3 = vcmp.lt.s32.totalorder %v2642_v52, 19  ;;  %vm450_vm4 = vcmp.lt.s32.totalorder %v2642_v52, 3 }
  0x34   : > { %v328_v11 = vadd.f32 %v2192_v7, %v324_v8  ;;  %v329_v12 = vmax.f32 %v325_v9, %v2192_v7  ;;  %s2451_s19 = smov 2   ;;  %s2452_s22 = smov 114   ;;  %vm482_vm5 = vcmp.lt.s32.totalorder %v2642_v52, 115  ;;  %vm514_vm6 = vcmp.lt.s32.totalorder %v2642_v52, 99 }
  0x35   : > { %s2453_s23 = smov 98   ;;  %s2648_s24 = sld [smem:[#allocation7 + $0x38]]  ;;  %vm546_vm7 = vcmp.lt.s32.totalorder %v2642_v52, 83  ;;  %vm582_vm8 = vcmp.lt.s32.totalorder %v2642_v52, 50  ;;  %vm614_vm9 = vcmp.lt.s32.totalorder %v2642_v52, 34  ;;  %vm646_vm10 = vcmp.lt.s32.totalorder %v2642_v52, 18 }
  0x36   : > { %v330_v13 = vmul.f32 0.25, %v328_v11  ;;  %338 = vst.msk [vmem:[#allocation2 + $0x3] ss:$2 sm:$0x3] %vm2618_vm0, %v329_v12  ;;  %s176_s28 = sld [smem:[#allocation7]]  ;;  %vm678_vm11 = vcmp.lt.s32.totalorder %v2642_v52, 2 }
  0x37   : > { %s2141_s30 = sld [smem:[#allocation7 + $0x31]]  ;;  %vm710_vm12 = vcmp.lt.s32.totalorder %v2642_v52, 114  ;;  %vm742_vm13 = vcmp.lt.s32.totalorder %v2642_v52, 98  ;;  %vm774_vm14 = vcmp.lt.s32.totalorder %v2642_v52, 82 }
  0x38   : > { %336 = vst.msk [vmem:[#allocation2 + $0x2] ss:$2 sm:$0x3] %vm2618_vm0, %v330_v13 }
  0x3b   : > { %v394_v0 = vstv %s2648_s24  ;;  %s2458_s24 = smov 1  }
  0x3c   : > { %v357_v1 = vstv %s176_s28  ;;  %s2692_s28 = sld [smem:[#allocation7 + $0x2a]] }
  0x3d   : > { %v362_v2 = vstv %s2141_s30  ;;  %s2694_s30 = sld [smem:[#allocation7 + $0x5b]] }
  0x3f   : > { %v2626_v14 = vld [vmem:[#allocation2] sm:$0xff] }
  0x40   : > { %341 = vst [vmem:[#allocation1] ss:$4 sm:$0xff] %v2626_v14 }
  0x47   : > { %v344_v15 = vld.sshfl [vmem:[#allocation1 + $0x10] sm:$0xff pattern:$0x73625140]  ;;  %v342_v16 = vld.sshfl [vmem:[#allocation1] sm:$0xff pattern:$0x73625140] }
  0x48   : > { %352 = vrot.lane.b32.xlu1 %v344_v15, %s2441_s15  ;;  %348 = vrot.lane.b32.xlu0 %v342_v16, %s2441_s15  ;;  %v343_v17 = vld.sshfl [vmem:[#allocation1 + $0x8] sm:$0xff pattern:$0x73625140] }
  0x49   : > { %373 = vst [vmem:[#allocation1] ss:$4 sm:$0xff] %v2626_v14 }
  0x50   : > { %350 = vrot.lane.b32.xlu0 %v343_v17, %s2441_s15  ;;  %v374_v18 = vld.sshfl [vmem:[#allocation1] sm:$0xff pattern:$0x73625140]  ;;  %v376_v19 = vld.sshfl [vmem:[#allocation1 + $0x10] sm:$0xff pattern:$0x73625140] }
  0x51   : > { %380 = vrot.lane.b32.xlu1 %v374_v18, %s2442_s20  ;;  %v375_v20 = vld.sshfl [vmem:[#allocation1 + $0x8] sm:$0xff pattern:$0x73625140]  ;;  %s2650_s15 = sld [smem:[#allocation7 + $0x7]] }
  0x52   : > { %382 = vrot.lane.b32.xlu2 %v375_v20, %s2442_s20  ;;  %405 = vst [vmem:[#allocation1] ss:$4 sm:$0xff] %v2626_v14 }
  0x57   : > { %v389_v3 = vstv %s2650_s15  ;;  %s2459_s15 = smov 113  }
  0x59   : > { %v407_v21 = vld.sshfl [vmem:[#allocation1 + $0x8] sm:$0xff pattern:$0x73625140]  ;;  %v408_v22 = vld.sshfl [vmem:[#allocation1 + $0x10] sm:$0xff pattern:$0x73625140] }
  0x5a   : > { %414 = vrot.lane.b32.xlu1 %v407_v21, %s2443_s4  ;;  %v406_v23 = vld.sshfl [vmem:[#allocation1] sm:$0xff pattern:$0x73625140]  ;;  %384 = vrot.lane.b32.xlu2 %v376_v19, %s2442_s20  ;;  %s2454_s20 = smov 82  }
  0x5b   : > { %412 = vrot.lane.b32.xlu0 %v406_v23, %s2443_s4  ;;  %437 = vst [vmem:[#allocation1] ss:$4 sm:$0xff] %v2626_v14 }
  0x62   : > { %v439_v24 = vld.sshfl [vmem:[#allocation1 + $0x8] sm:$0xff pattern:$0x73625140]  ;;  %v440_v25 = vld.sshfl [vmem:[#allocation1 + $0x10] sm:$0xff pattern:$0x73625140]  ;;  %416 = vrot.lane.b32.xlu2 %v408_v22, %s2443_s4 }
  0x63   : > { %446 = vrot.lane.b32.xlu1 %v439_v24, %s2444_s5  ;;  %v438_v26 = vld.sshfl [vmem:[#allocation1] sm:$0xff pattern:$0x73625140]  ;;  %s2656_s4 = sld [smem:[#allocation7 + $0xe]] }
  0x64   : > { %444 = vrot.lane.b32.xlu0 %v438_v26, %s2444_s5  ;;  %469 = vst [vmem:[#allocation1] ss:$4 sm:$0xff] %v2626_v14 }
  0x6a   : > { %448 = vrot.lane.b32.xlu2 %v440_v25, %s2444_s5  ;;  %s2658_s5 = sld [smem:[#allocation7 + $0x3f]] }
  0x6b   : > { %v471_v27 = vld.sshfl [vmem:[#allocation1 + $0x10] sm:$0xff pattern:$0x73625140]  ;;  %v472_v28 = vld.sshfl [vmem:[#allocation1 + $0x18] sm:$0xff pattern:$0x73625140] }
  0x6c   : > { %478 = vrot.lane.b32.xlu1 %v471_v27, %s2445_s6  ;;  %v470_v29 = vld.sshfl [vmem:[#allocation1 + $0x8] sm:$0xff pattern:$0x73625140] }
  0x6d   : > { %476 = vrot.lane.b32.xlu0 %v470_v29, %s2445_s6  ;;  %501 = vst [vmem:[#allocation1] ss:$4 sm:$0xff] %v2626_v14 }
  0x72   : > { %480 = vrot.lane.b32.xlu2 %v472_v28, %s2445_s6  ;;  %s2455_s6 = smov 49  }
  0x74   : > { %v503_v30 = vld.sshfl [vmem:[#allocation1 + $0x10] sm:$0xff pattern:$0x73625140]  ;;  %v504_v31 = vld.sshfl [vmem:[#allocation1 + $0x18] sm:$0xff pattern:$0x73625140] }
  0x75   : > { %510 = vrot.lane.b32.xlu1 %v503_v30, %s2446_s7  ;;  %v502_v32 = vld.sshfl [vmem:[#allocation1 + $0x8] sm:$0xff pattern:$0x73625140] }
  0x76   : > { %508 = vrot.lane.b32.xlu0 %v502_v32, %s2446_s7  ;;  %533 = vst [vmem:[#allocation1] ss:$4 sm:$0xff] %v2626_v14  ;;  %v426_v32 = vstv %s2658_s5  ;;  %s2704_s5 = sld [smem:[#allocation7 + $0x1]] }
  0x7a   : > { %512 = vrot.lane.b32.xlu2 %v504_v31, %s2446_s7  ;;  %v421_v31 = vstv %s2656_s4  ;;  %s2666_s7 = sld [smem:[#allocation7 + $0x15]]  ;;  %s2460_s4 = smov 97  }
  0x7d   : > { %v535_v33 = vld.sshfl [vmem:[#allocation1 + $0x10] sm:$0xff pattern:$0x73625140]  ;;  %v536_v34 = vld.sshfl [vmem:[#allocation1 + $0x18] sm:$0xff pattern:$0x73625140] }
  0x7e   : > { %542 = vrot.lane.b32.xlu1 %v535_v33, %s2447_s8  ;;  %v534_v35 = vld.sshfl [vmem:[#allocation1 + $0x8] sm:$0xff pattern:$0x73625140] }
  0x7f   : > { %540 = vrot.lane.b32.xlu0 %v534_v35, %s2447_s8  ;;  %569 = vst [vmem:[#allocation1] ss:$4 sm:$0xff] %v2626_v14 }
  0x82   : > { %544 = vrot.lane.b32.xlu2 %v536_v34, %s2447_s8  ;;  %s2668_s8 = sld [smem:[#allocation7 + $0x46]] }
  0x86   : > { %v571_v36 = vld.sshfl [vmem:[#allocation1 + $0x8] sm:$0xff pattern:$0x73625140]  ;;  %v572_v37 = vld.sshfl [vmem:[#allocation1 + $0x10] sm:$0xff pattern:$0x73625140] }
  0x87   : > { %578 = vrot.lane.b32.xlu1 %v571_v36, %s2448_s14  ;;  %v570_v38 = vld.sshfl [vmem:[#allocation1] sm:$0xff pattern:$0x73625140] }
  0x88   : > { %576 = vrot.lane.b32.xlu0 %v570_v38, %s2448_s14  ;;  %601 = vst [vmem:[#allocation1] ss:$4 sm:$0xff] %v2626_v14 }
  0x8a   : > { %580 = vrot.lane.b32.xlu2 %v572_v37, %s2448_s14  ;;  %s2456_s14 = smov 33  }
  0x8f   : > { %v603_v39 = vld.sshfl [vmem:[#allocation1 + $0x8] sm:$0xff pattern:$0x73625140]  ;;  %v604_v40 = vld.sshfl [vmem:[#allocation1 + $0x10] sm:$0xff pattern:$0x73625140] }
  0x90   : > { %610 = vrot.lane.b32.xlu1 %v603_v39, %s2449_s17  ;;  %v602_v41 = vld.sshfl [vmem:[#allocation1] sm:$0xff pattern:$0x73625140] }
  0x91   : > { %608 = vrot.lane.b32.xlu0 %v602_v41, %s2449_s17  ;;  %633 = vst [vmem:[#allocation1] ss:$4 sm:$0xff] %v2626_v14 }
  0x92   : > { %612 = vrot.lane.b32.xlu2 %v604_v40, %s2449_s17  ;;  %s2674_s17 = sld [smem:[#allocation7 + $0x1c]] }
  0x98   : > { %v635_v42 = vld.sshfl [vmem:[#allocation1 + $0x8] sm:$0xff pattern:$0x73625140]  ;;  %v636_v43 = vld.sshfl [vmem:[#allocation1 + $0x10] sm:$0xff pattern:$0x73625140] }
  0x99   : > { %642 = vrot.lane.b32.xlu1 %v635_v42, %s2450_s18  ;;  %v634_v44 = vld.sshfl [vmem:[#allocation1] sm:$0xff pattern:$0x73625140] }
  0x9a   : > { %640 = vrot.lane.b32.xlu0 %v634_v44, %s2450_s18  ;;  %665 = vst [vmem:[#allocation1] ss:$4 sm:$0xff] %v2626_v14  ;;  %644 = vrot.lane.b32.xlu2 %v636_v43, %s2450_s18  ;;  %s2676_s18 = sld [smem:[#allocation7 + $0x4d]] }
  0xa1   : > { %v667_v45 = vld.sshfl [vmem:[#allocation1 + $0x8] sm:$0xff pattern:$0x73625140]  ;;  %v668_v46 = vld.sshfl [vmem:[#allocation1 + $0x10] sm:$0xff pattern:$0x73625140] }
  0xa2   : > { %674 = vrot.lane.b32.xlu1 %v667_v45, %s2451_s19  ;;  %v666_v47 = vld.sshfl [vmem:[#allocation1] sm:$0xff pattern:$0x73625140]  ;;  %676 = vrot.lane.b32.xlu2 %v668_v46, %s2451_s19 }
  0xa3   : > { %672 = vrot.lane.b32.xlu0 %v666_v47, %s2451_s19  ;;  %697 = vst [vmem:[#allocation1] ss:$4 sm:$0xff] %v2626_v14  ;;  %s2457_s19 = smov 17  }
  0xaa   : > { %v699_v48 = vld.sshfl [vmem:[#allocation1 + $0x10] sm:$0xff pattern:$0x73625140]  ;;  %v700_v49 = vld.sshfl [vmem:[#allocation1 + $0x18] sm:$0xff pattern:$0x73625140] }
  0xab   : > { %706 = vrot.lane.b32.xlu1 %v699_v48, %s2452_s22  ;;  %v698_v50 = vld.sshfl [vmem:[#allocation1 + $0x8] sm:$0xff pattern:$0x73625140]  ;;  %708 = vrot.lane.b32.xlu2 %v700_v49, %s2452_s22 }
  0xac   : > { %704 = vrot.lane.b32.xlu0 %v698_v50, %s2452_s22  ;;  %729 = vst [vmem:[#allocation1] ss:$4 sm:$0xff] %v2626_v14  ;;  %v383_v51 = vpop.permute.xlu2 %382  ;;  %s2682_s22 = sld [smem:[#allocation7 + $0x23]] }
  0xb3   : > { %v731_v53 = vld.sshfl [vmem:[#allocation1 + $0x10] sm:$0xff pattern:$0x73625140]  ;;  %v732_v54 = vld.sshfl [vmem:[#allocation1 + $0x18] sm:$0xff pattern:$0x73625140] }
  0xb4   : > { %738 = vrot.lane.b32.xlu1 %v731_v53, %s2453_s23  ;;  %v730_v55 = vld.sshfl [vmem:[#allocation1 + $0x8] sm:$0xff pattern:$0x73625140]  ;;  %740 = vrot.lane.b32.xlu2 %v732_v54, %s2453_s23  ;;  %v385_v56 = vpop.permute.xlu2 %384  ;;  %v453_v54 = vstv %s2666_s7  ;;  %s2717_s7 = sld [smem:[#allocation7 + $0x39]] }
  0xb5   : > { %736 = vrot.lane.b32.xlu0 %v730_v55, %s2453_s23  ;;  %761 = vst [vmem:[#allocation1] ss:$4 sm:$0xff] %v2626_v14  ;;  %v387_v57 = vsel %vm386_vm1, %v383_v51, %v385_v56  ;;  %v458_v55 = vstv %s2668_s8  ;;  %s2684_s23 = sld [smem:[#allocation7 + $0x54]]  ;;  %s2461_s8 = smov 81  }
  0xb6   : > { %v396_v5 = vmul.f32 %v394_v0, %v387_v57  ;;  %v391_v18 = vmul.f32 %v389_v3, %v387_v57 }
  0xb8   : > { %v400_v25 = vrot.slane %v396_v5, 1 }
  0xba   : > { %v353_v58 = vpop.permute.xlu1 %352  ;;  %v349_v59 = vpop.permute.xlu0 %348 }
  0xbc   : > { %v763_v60 = vld.sshfl [vmem:[#allocation1 + $0x10] sm:$0xff pattern:$0x73625140]  ;;  %v764_v61 = vld.sshfl [vmem:[#allocation1 + $0x18] sm:$0xff pattern:$0x73625140]  ;;  %v417_v62 = vpop.permute.xlu2 %416 }
  0xbd   : > { %770 = vrot.lane.b32.xlu1 %v763_v60, %s2454_s20  ;;  %v762_v63 = vld.sshfl [vmem:[#allocation1 + $0x8] sm:$0xff pattern:$0x73625140]  ;;  %772 = vrot.lane.b32.xlu2 %v764_v61, %s2454_s20 }
  0xbe   : > { %768 = vrot.lane.b32.xlu0 %v762_v63, %s2454_s20  ;;  %797 = vst [vmem:[#allocation1] ss:$4 sm:$0xff] %v2626_v14  ;;  %s2702_s20 = sld [smem:[#allocation7 + $0x32]] }
  0xc2   : > { %v351_v4 = vpop.permute.xlu0 %350 }
  0xc3   : > { %v355_v6 = vsel %vm354_vm2, %v351_v4, %v353_v58  ;;  %v356_v7 = vsel %vm354_vm2, %v349_v59, %v351_v4  ;;  %v381_v8 = vpop.permute.xlu1 %380 }
  0xc4   : > { %v358_v9 = vmul.f32 %v357_v1, %v356_v7  ;;  %v359_v11 = vmul.f32 %v357_v1, %v355_v6  ;;  %v363_v12 = vmul.f32 %v362_v2, %v356_v7  ;;  %v364_v13 = vmul.f32 %v362_v2, %v355_v6  ;;  %v449_v15 = vpop.permute.xlu2 %448 }
  0xc5   : > { %v799_v16 = vld.sshfl [vmem:[#allocation1 + $0x8] sm:$0xff pattern:$0x73625140]  ;;  %v800_v17 = vld.sshfl [vmem:[#allocation1 + $0x10] sm:$0xff pattern:$0x73625140]  ;;  %v388_v19 = vsel %vm386_vm1, %v381_v8, %v383_v51 }
  0xc6   : > { %806 = vrot.lane.b32.xlu1 %v799_v16, %s2455_s6  ;;  %v798_v20 = vld.sshfl [vmem:[#allocation1] sm:$0xff pattern:$0x73625140]  ;;  %v367_v21 = vrot.slane %v363_v12, 1  ;;  %v368_v22 = vrot.slane %v364_v13, 1  ;;  %v390_v23 = vmul.f32 %v389_v3, %v388_v19  ;;  %v395_v24 = vmul.f32 %v394_v0, %v388_v19  ;;  %808 = vrot.lane.b32.xlu2 %v800_v17, %s2455_s6 }
  0xc7   : > { %804 = vrot.lane.b32.xlu0 %v798_v20, %s2455_s6  ;;  %829 = vst [vmem:[#allocation1] ss:$4 sm:$0xff] %v2626_v14  ;;  %v485_v12 = vstv %s2674_s17  ;;  %v490_v13 = vstv %s2676_s18  ;;  %s2715_s6 = sld [smem:[#allocation7 + $0x8]]  ;;  %s2462_s18 = smov 48  }
  0xc8   : > { %v371_v26 = vadd.f32 %v367_v21, %v358_v9  ;;  %v372_v27 = vadd.f32 %v368_v22, %v359_v11  ;;  %v399_v28 = vrot.slane %v395_v24, 1  ;;  %s2729_s17 = sld [smem:[#allocation7 + $0x40]] }
  0xca   : > { %v393_v29 = vadd.f32 %v391_v18, %v372_v27  ;;  %v392_v30 = vadd.f32 %v390_v23, %v371_v26 }
  0xcc   : > { %v403_v33 = vadd.f32 %v399_v28, %v392_v30  ;;  %v415_v34 = vpop.permute.xlu1 %414  ;;  %v404_v35 = vadd.f32 %v400_v25, %v393_v29  ;;  %v481_v36 = vpop.permute.xlu2 %480 }
  0xcd   : > { %v419_v37 = vsel %vm418_vm3, %v415_v34, %v417_v62  ;;  %v413_v38 = vpop.permute.xlu0 %412 }
  0xce   : > { %v831_v39 = vld.sshfl [vmem:[#allocation1 + $0x8] sm:$0xff pattern:$0x73625140]  ;;  %v832_v40 = vld.sshfl [vmem:[#allocation1 + $0x10] sm:$0xff pattern:$0x73625140]  ;;  %v423_v41 = vmul.f32 %v421_v31, %v419_v37  ;;  %v428_v42 = vmul.f32 %v426_v32, %v419_v37  ;;  %v420_v43 = vsel %vm418_vm3, %v413_v38, %v415_v34  ;;  %v522_v34 = vstv %s2684_s23 }
  0xcf   : > { %838 = vrot.lane.b32.xlu1 %v831_v39, %s2456_s14  ;;  %v830_v44 = vld.sshfl [vmem:[#allocation1] sm:$0xff pattern:$0x73625140]  ;;  %v422_v45 = vmul.f32 %v421_v31, %v420_v43  ;;  %v427_v46 = vmul.f32 %v426_v32, %v420_v43  ;;  %840 = vrot.lane.b32.xlu2 %v832_v40, %s2456_s14  ;;  %s2463_s23 = smov 32  }
  0xd0   : > { %836 = vrot.lane.b32.xlu0 %v830_v44, %s2456_s14  ;;  %861 = vst [vmem:[#allocation1] ss:$4 sm:$0xff] %v2626_v14  ;;  %v425_v47 = vadd.f32 %v423_v41, %v404_v35  ;;  %v432_v48 = vrot.slane %v428_v42, 1  ;;  %s2727_s14 = sld [smem:[#allocation7 + $0xf]] }
  0xd1   : > { %v424_v49 = vadd.f32 %v422_v45, %v403_v33  ;;  %v431_v50 = vrot.slane %v427_v46, 1  ;;  %v517_v33 = vstv %s2682_s22  ;;  %s2740_s22 = sld [smem:[#allocation7 + $0x47]] }
  0xd2   : > { %v436_v51 = vadd.f32 %v432_v48, %v425_v47 }
  0xd3   : > { %v435_v53 = vadd.f32 %v431_v50, %v424_v49 }
  0xd4   : > { %v513_v56 = vpop.permute.xlu2 %512 }
  0xd5   : > { %v447_v57 = vpop.permute.xlu1 %446 }
  0xd6   : > { %v451_v58 = vsel %vm450_vm4, %v447_v57, %v449_v15  ;;  %v445_v59 = vpop.permute.xlu0 %444 }
  0xd7   : > { %v863_v60 = vld.sshfl [vmem:[#allocation1 + $0x8] sm:$0xff pattern:$0x73625140]  ;;  %v864_v61 = vld.sshfl [vmem:[#allocation1 + $0x10] sm:$0xff pattern:$0x73625140]  ;;  %v455_v62 = vmul.f32 %v453_v54, %v451_v58  ;;  %v460_v63 = vmul.f32 %v458_v55, %v451_v58  ;;  %v452_v0 = vsel %vm450_vm4, %v445_v59, %v447_v57 }
  0xd8   : > { %870 = vrot.lane.b32.xlu1 %v863_v60, %s2457_s19  ;;  %v862_v1 = vld.sshfl [vmem:[#allocation1] sm:$0xff pattern:$0x73625140]  ;;  %v454_v2 = vmul.f32 %v453_v54, %v452_v0  ;;  %v459_v3 = vmul.f32 %v458_v55, %v452_v0  ;;  %872 = vrot.lane.b32.xlu2 %v864_v61, %s2457_s19  ;;  %v549_v54 = vstv %s2692_s28  ;;  %v554_v55 = vstv %s2694_s30  ;;  %s2751_s28 = sld [smem:[#allocation7 + $0x4e]]  ;;  %s2464_s30 = smov 16  }
  0xd9   : > { %868 = vrot.lane.b32.xlu0 %v862_v1, %s2457_s19  ;;  %893 = vst [vmem:[#allocation1] ss:$4 sm:$0xff] %v2626_v14  ;;  %v457_v4 = vadd.f32 %v455_v62, %v436_v51  ;;  %v464_v5 = vrot.slane %v460_v63, 1  ;;  %s2738_s19 = sld [smem:[#allocation7 + $0x16]]  ;;  %vm810_vm4 = vcmp.lt.s32.totalorder %v2642_v52, 49 }
  0xda   : > { %v456_v6 = vadd.f32 %v454_v2, %v435_v53  ;;  %v463_v7 = vrot.slane %v459_v3, 1 }
  0xdb   : > { %v468_v8 = vadd.f32 %v464_v5, %v457_v4 }
  0xdc   : > { %v467_v9 = vadd.f32 %v463_v7, %v456_v6  ;;  %v545_v11 = vpop.permute.xlu2 %544 }
  0xde   : > { %v479_v15 = vpop.permute.xlu1 %478 }
  0xdf   : > { %v483_v16 = vsel %vm482_vm5, %v479_v15, %v481_v36  ;;  %v477_v17 = vpop.permute.xlu0 %476 }
  0xe0   : > { %v895_v18 = vld.sshfl [vmem:[#allocation1 + $0x8] sm:$0xff pattern:$0x73625140]  ;;  %v896_v19 = vld.sshfl [vmem:[#allocation1 + $0x10] sm:$0xff pattern:$0x73625140]  ;;  %v487_v20 = vmul.f32 %v485_v12, %v483_v16  ;;  %v492_v21 = vmul.f32 %v490_v13, %v483_v16  ;;  %v484_v22 = vsel %vm482_vm5, %v477_v17, %v479_v15 }
  0xe1   : > { %902 = vrot.lane.b32.xlu1 %v895_v18, %s2458_s24  ;;  %v894_v23 = vld.sshfl [vmem:[#allocation1] sm:$0xff pattern:$0x73625140]  ;;  %v486_v24 = vmul.f32 %v485_v12, %v484_v22  ;;  %v491_v25 = vmul.f32 %v490_v13, %v484_v22  ;;  %904 = vrot.lane.b32.xlu2 %v896_v19, %s2458_s24  ;;  %v585_v18 = vstv %s2704_s5  ;;  %s2777_s5 = sld [smem:[#allocation7 + $0x5c]]  ;;  %vm842_vm5 = vcmp.lt.s32.totalorder %v2642_v52, 33 }
  0xe2   : > { %900 = vrot.lane.b32.xlu0 %v894_v23, %s2458_s24  ;;  %925 = vst [vmem:[#allocation1] ss:$4 sm:$0xff] %v2626_v14  ;;  %v489_v26 = vadd.f32 %v487_v20, %v468_v8  ;;  %v496_v27 = vrot.slane %v492_v21, 1  ;;  %s2749_s24 = sld [smem:[#allocation7 + $0x1d]] }
  0xe3   : > { %v488_v28 = vadd.f32 %v486_v24, %v467_v9  ;;  %v495_v29 = vrot.slane %v491_v25, 1 }
  0xe4   : > { %v500_v30 = vadd.f32 %v496_v27, %v489_v26  ;;  %v2687_v31 = vpop.permute.xlu2 %580 }
  0xe5   : > { %v499_v32 = vadd.f32 %v495_v29, %v488_v28  ;;  %v617_v28 = vstv %s2715_s6  ;;  %v622_v29 = vstv %s2717_s7  ;;  %s2465_s6 = smov 112   ;;  %s2793_s7 = sld [smem:[#allocation7 + $0x33]] }
  0xe7   : > { %v511_v35 = vpop.permute.xlu1 %510 }
  0xe8   : > { %v515_v36 = vsel %vm514_vm6, %v511_v35, %v513_v56  ;;  %v509_v37 = vpop.permute.xlu0 %508 }
  0xe9   : > { %v927_v38 = vld.sshfl [vmem:[#allocation1 + $0x10] sm:$0xff pattern:$0x73625140]  ;;  %v928_v39 = vld.sshfl [vmem:[#allocation1 + $0x18] sm:$0xff pattern:$0x73625140]  ;;  %v519_v40 = vmul.f32 %v517_v33, %v515_v36  ;;  %v524_v41 = vmul.f32 %v522_v34, %v515_v36  ;;  %v516_v42 = vsel %vm514_vm6, %v509_v37, %v511_v35 }
  0xea   : > { %934 = vrot.lane.b32.xlu1 %v927_v38, %s2459_s15  ;;  %v926_v43 = vld.sshfl [vmem:[#allocation1 + $0x8] sm:$0xff pattern:$0x73625140]  ;;  %v518_v44 = vmul.f32 %v517_v33, %v516_v42  ;;  %v523_v45 = vmul.f32 %v522_v34, %v516_v42  ;;  %936 = vrot.lane.b32.xlu2 %v928_v39, %s2459_s15  ;;  %vm874_vm6 = vcmp.lt.s32.totalorder %v2642_v52, 17 }
  0xeb   : > { %932 = vrot.lane.b32.xlu0 %v926_v43, %s2459_s15  ;;  %957 = vst [vmem:[#allocation1] ss:$4 sm:$0xff] %v2626_v14  ;;  %v521_v46 = vadd.f32 %v519_v40, %v500_v30  ;;  %v528_v47 = vrot.slane %v524_v41, 1  ;;  %s2760_s15 = sld [smem:[#allocation7 + $0x24]] }
  0xec   : > { %v520_v48 = vadd.f32 %v518_v44, %v499_v32  ;;  %v527_v49 = vrot.slane %v523_v45, 1  ;;  %v2697_v50 = vpop.permute.xlu2 %612 }
  0xed   : > { %v532_v51 = vadd.f32 %v528_v47, %v521_v46 }
  0xee   : > { %v531_v53 = vadd.f32 %v527_v49, %v520_v48 }
  0xf0   : > { %v543_v56 = vpop.permute.xlu1 %542 }
  0xf1   : > { %v547_v57 = vsel %vm546_vm7, %v543_v56, %v545_v11  ;;  %v541_v58 = vpop.permute.xlu0 %540  ;;  %v590_v11 = vstv %s2702_s20  ;;  %s2762_s20 = sld [smem:[#allocation7 + $0x55]] }
  0xf2   : > { %v959_v59 = vld.sshfl [vmem:[#allocation1 + $0x10] sm:$0xff pattern:$0x73625140]  ;;  %v960_v60 = vld.sshfl [vmem:[#allocation1 + $0x18] sm:$0xff pattern:$0x73625140]  ;;  %v551_v61 = vmul.f32 %v549_v54, %v547_v57  ;;  %v556_v62 = vmul.f32 %v554_v55, %v547_v57  ;;  %v548_v63 = vsel %vm546_vm7, %v541_v58, %v543_v56 }
  0xf3   : > { %966 = vrot.lane.b32.xlu1 %v959_v59, %s2460_s4  ;;  %v958_v0 = vld.sshfl [vmem:[#allocation1 + $0x8] sm:$0xff pattern:$0x73625140]  ;;  %v550_v1 = vmul.f32 %v549_v54, %v548_v63  ;;  %v555_v2 = vmul.f32 %v554_v55, %v548_v63  ;;  %968 = vrot.lane.b32.xlu2 %v960_v60, %s2460_s4  ;;  %vm906_vm7 = vcmp.lt.s32.totalorder %v2642_v52, 1 }
  0xf4   : > { %964 = vrot.lane.b32.xlu0 %v958_v0, %s2460_s4  ;;  %989 = vst [vmem:[#allocation1] ss:$4 sm:$0xff] %v2626_v14  ;;  %v553_v3 = vadd.f32 %v551_v61, %v532_v51  ;;  %v560_v4 = vrot.slane %v556_v62, 1  ;;  %v2707_v5 = vpop.permute.xlu2 %644  ;;  %v654_v51 = vstv %s2729_s17  ;;  %s2775_s4 = sld [smem:[#allocation7 + $0x2b]] }
  0xf5   : > { %v552_v6 = vadd.f32 %v550_v1, %v531_v53  ;;  %v559_v7 = vrot.slane %v555_v2, 1  ;;  %s2815_s17 = sld [smem:[#allocation7 + $0x9]] }
  0xf6   : > { %v2709_v8 = vadd.f32 %v560_v4, %v553_v3 }
  0xf7   : > { %v2711_v9 = vadd.f32 %v559_v7, %v552_v6  ;;  %v681_v7 = vstv %s2738_s19  ;;  %s2467_s19 = smov 80  }
  0xf9   : > { %v579_v12 = vpop.permute.xlu1 %578 }
  0xfa   : > { %v583_v13 = vsel %vm582_vm8, %v579_v12, %v2687_v31  ;;  %v577_v15 = vpop.permute.xlu0 %576 }
  0xfb   : > { %v991_v16 = vld.sshfl [vmem:[#allocation1 + $0x10] sm:$0xff pattern:$0x73625140]  ;;  %v990_v17 = vld.sshfl [vmem:[#allocation1 + $0x8] sm:$0xff pattern:$0x73625140]  ;;  %v592_v19 = vmul.f32 %v590_v11, %v583_v13  ;;  %v584_v20 = vsel %vm582_vm8, %v577_v15, %v579_v12  ;;  %v587_v24 = vmul.f32 %v585_v18, %v583_v13 }
  0xfc   : > { %998 = vrot.lane.b32.xlu1 %v991_v16, %s2461_s8  ;;  %996 = vrot.lane.b32.xlu0 %v990_v17, %s2461_s8  ;;  %v591_v21 = vmul.f32 %v590_v11, %v584_v20  ;;  %v992_v22 = vld.sshfl [vmem:[#allocation1 + $0x18] sm:$0xff pattern:$0x73625140]  ;;  %v2721_v23 = vpop.permute.xlu2 %676  ;;  %v586_v26 = vmul.f32 %v585_v18, %v584_v20  ;;  %v686_v11 = vstv %s2740_s22  ;;  %s2836_s22 = sld [smem:[#allocation7 + $0x10]]  ;;  %vm938_vm8 = vcmp.lt.s32.totalorder %v2642_v52, 113 }
  0xfd   : > { %1000 = vrot.lane.b32.xlu2 %v992_v22, %s2461_s8  ;;  %1025 = vst [vmem:[#allocation1] ss:$4 sm:$0xff] %v2626_v14  ;;  %v596_v25 = vrot.slane %v592_v19, 1  ;;  %s2466_s8 = smov 96  }
  0xfe   : > { %v595_v27 = vrot.slane %v591_v21, 1 }
  0xff   : > { %v600_v30 = vadd.f32 %v596_v25, %v587_v24 }
 0x100   : > { %v599_v32 = vadd.f32 %v595_v27, %v586_v26 }
 0x102   : > { %v611_v31 = vpop.permute.xlu1 %610 }
 0x103   : > { %v615_v33 = vsel %vm614_vm9, %v611_v31, %v2697_v50  ;;  %v609_v34 = vpop.permute.xlu0 %608  ;;  %v649_v50 = vstv %s2727_s14  ;;  %s2804_s14 = sld [smem:[#allocation7 + $0x2]] }
 0x104   : > { %v1027_v35 = vld.sshfl [vmem:[#allocation1 + $0x8] sm:$0xff pattern:$0x73625140]  ;;  %v1026_v36 = vld.sshfl [vmem:[#allocation1] sm:$0xff pattern:$0x73625140]  ;;  %v619_v37 = vmul.f32 %v617_v28, %v615_v33  ;;  %v624_v38 = vmul.f32 %v622_v29, %v615_v33  ;;  %v616_v39 = vsel %vm614_vm9, %v609_v34, %v611_v31  ;;  %v713_v31 = vstv %s2749_s24 }
 0x105   : > { %1034 = vrot.lane.b32.xlu1 %v1027_v35, %s2462_s18  ;;  %1032 = vrot.lane.b32.xlu0 %v1026_v36, %s2462_s18  ;;  %v618_v40 = vmul.f32 %v617_v28, %v616_v39  ;;  %v623_v41 = vmul.f32 %v622_v29, %v616_v39  ;;  %v1028_v42 = vld.sshfl [vmem:[#allocation1 + $0x10] sm:$0xff pattern:$0x73625140]  ;;  %v2732_v43 = vpop.permute.xlu2 %708  ;;  %s2468_s24 = smov 47   ;;  %vm970_vm9 = vcmp.lt.s32.totalorder %v2642_v52, 97 }
 0x106   : > { %v621_v44 = vadd.f32 %v619_v37, %v600_v30  ;;  %v628_v45 = vrot.slane %v624_v38, 1  ;;  %1036 = vrot.lane.b32.xlu2 %v1028_v42, %s2462_s18  ;;  %1057 = vst [vmem:[#allocation1] ss:$4 sm:$0xff] %v2626_v14  ;;  %s2820_s18 = sld [smem:[#allocation7 + $0x3a]] }
 0x107   : > { %v620_v46 = vadd.f32 %v618_v40, %v599_v32  ;;  %v627_v47 = vrot.slane %v623_v41, 1  ;;  %v718_v32 = vstv %s2751_s28  ;;  %s2851_s28 = sld [smem:[#allocation7 + $0x17]] }
 0x108   : > { %v632_v48 = vadd.f32 %v628_v45, %v621_v44 }
 0x109   : > { %v631_v49 = vadd.f32 %v627_v47, %v620_v46 }
 0x10b   : > { %v643_v53 = vpop.permute.xlu1 %642 }
 0x10c   : > { %v647_v54 = vsel %vm646_vm10, %v643_v53, %v2707_v5  ;;  %v641_v55 = vpop.permute.xlu0 %640 }
 0x10d   : > { %v1059_v56 = vld.sshfl [vmem:[#allocation1 + $0x8] sm:$0xff pattern:$0x73625140]  ;;  %v1058_v57 = vld.sshfl [vmem:[#allocation1] sm:$0xff pattern:$0x73625140]  ;;  %v651_v58 = vmul.f32 %v649_v50, %v647_v54  ;;  %v656_v59 = vmul.f32 %v654_v51, %v647_v54  ;;  %v648_v60 = vsel %vm646_vm10, %v641_v55, %v643_v53 }
 0x10e   : > { %1066 = vrot.lane.b32.xlu1 %v1059_v56, %s2463_s23  ;;  %1064 = vrot.lane.b32.xlu0 %v1058_v57, %s2463_s23  ;;  %v650_v61 = vmul.f32 %v649_v50, %v648_v60  ;;  %v655_v62 = vmul.f32 %v654_v51, %v648_v60  ;;  %v1060_v63 = vld.sshfl [vmem:[#allocation1 + $0x10] sm:$0xff pattern:$0x73625140]  ;;  %v2743_v0 = vpop.permute.xlu2 %740  ;;  %v745_v50 = vstv %s2760_s15  ;;  %v750_v51 = vstv %s2762_s20  ;;  %s2469_s15 = smov 31   ;;  %s2866_s20 = sld [smem:[#allocation7 + $0x1e]] }
 0x10f   : > { %v653_v1 = vadd.f32 %v651_v58, %v632_v48  ;;  %v660_v2 = vrot.slane %v656_v59, 1  ;;  %1068 = vrot.lane.b32.xlu2 %v1060_v63, %s2463_s23  ;;  %1089 = vst [vmem:[#allocation1] ss:$4 sm:$0xff] %v2626_v14  ;;  %s2838_s23 = sld [smem:[#allocation7 + $0x41]]  ;;  %vm1002_vm10 = vcmp.lt.s32.totalorder %v2642_v52, 81 }
 0x110   : > { %v652_v3 = vadd.f32 %v650_v61, %v631_v49  ;;  %v659_v4 = vrot.slane %v655_v62, 1 }
 0x111   : > { %v664_v5 = vadd.f32 %v660_v2, %v653_v1 }
 0x112   : > { %v663_v6 = vadd.f32 %v659_v4, %v652_v3  ;;  %v277_v3 = vadd.s32 128, %v2642_v52 }
 0x114   : > { %v675_v12 = vpop.permute.xlu1 %674 }
 0x115   : > { %v679_v13 = vsel %vm678_vm11, %v675_v12, %v2721_v23  ;;  %v673_v15 = vpop.permute.xlu0 %672 }
 0x116   : > { %v1091_v16 = vld.sshfl [vmem:[#allocation1 + $0x8] sm:$0xff pattern:$0x73625140]  ;;  %v1090_v17 = vld.sshfl [vmem:[#allocation1] sm:$0xff pattern:$0x73625140]  ;;  %v683_v18 = vmul.f32 %v681_v7, %v679_v13  ;;  %v688_v19 = vmul.f32 %v686_v11, %v679_v13  ;;  %v680_v20 = vsel %vm678_vm11, %v673_v15, %v675_v12  ;;  %v782_v12 = vstv %s2777_s5 }
 0x117   : > { %1098 = vrot.lane.b32.xlu1 %v1091_v16, %s2464_s30  ;;  %1096 = vrot.lane.b32.xlu0 %v1090_v17, %s2464_s30  ;;  %v682_v21 = vmul.f32 %v681_v7, %v680_v20  ;;  %v687_v22 = vmul.f32 %v686_v11, %v680_v20  ;;  %v1092_v24 = vld.sshfl [vmem:[#allocation1 + $0x10] sm:$0xff pattern:$0x73625140]  ;;  %v2754_v25 = vpop.permute.xlu2 %772  ;;  %v777_v11 = vstv %s2775_s4  ;;  %v2791_v13 = vand.u32 15, %v277_v3  ;;  %s2868_s4 = sld [smem:[#allocation7 + $0x4f]]  ;;  %s2470_s5 = smov 15  }
 0x118   : > { %v685_v26 = vadd.f32 %v683_v18, %v664_v5  ;;  %v692_v27 = vrot.slane %v688_v19, 1  ;;  %1100 = vrot.lane.b32.xlu2 %v1092_v24, %s2464_s30  ;;  %1121 = vst [vmem:[#allocation1] ss:$4 sm:$0xff] %v2626_v14  ;;  %v2799_v20 = vand.u32 15, %v2642_v52  ;;  %s2853_s30 = sld [smem:[#allocation7 + $0x48]] }
 0x119   : > { %v684_v23 = vadd.f32 %v682_v21, %v663_v6  ;;  %v691_v28 = vrot.slane %v687_v22, 1  ;;  %vm281_vm15 = vcmp.ge.s32.totalorder %v2791_v13, 3  ;;  %vm287_vm1 = vcmp.ge.s32.totalorder %v2791_v13, 2 }
 0x11a   : > { %v696_v29 = vadd.f32 %v692_v27, %v685_v26  ;;  %vm280_vm2 = vcmp.ge.s32.totalorder %v2799_v20, 3  ;;  %vm286_vm3 = vcmp.ge.s32.totalorder %v2799_v20, 2  ;;  %vm293_vm11 = vcmp.ge.s32.totalorder %v2791_v13, 1 }
 0x11b   : > { %v695_v30 = vadd.f32 %v691_v28, %v684_v23 }
 0x11d   : > { %v707_v33 = vpop.permute.xlu1 %706 }
 0x11e   : > { %v711_v34 = vsel %vm710_vm12, %v707_v33, %v2732_v43  ;;  %v705_v35 = vpop.permute.xlu0 %704 }
 0x11f   : > { %v2765_v36 = vld.sshfl [vmem:[#allocation1 + $0x8] sm:$0xff pattern:$0x73625140]  ;;  %v2767_v37 = vld.sshfl [vmem:[#allocation1 + $0x10] sm:$0xff pattern:$0x73625140]  ;;  %v715_v38 = vmul.f32 %v713_v31, %v711_v34  ;;  %v720_v39 = vmul.f32 %v718_v32, %v711_v34  ;;  %v712_v40 = vsel %vm710_vm12, %v705_v35, %v707_v33 }
 0x120   : > { %1142 = vst [vmem:[#allocation1] ss:$4 sm:$0xff] %v2626_v14  ;;  %v714_v41 = vmul.f32 %v713_v31, %v712_v40  ;;  %v719_v42 = vmul.f32 %v718_v32, %v712_v40  ;;  %v2770_v44 = vpop.permute.xlu2 %808  ;;  %v566_v34 = vsel %vm281_vm15, %v2709_v8, 0.0  ;;  %vm292_vm12 = vcmp.ge.s32.totalorder %v2799_v20, 1 }
 0x121   : > { %v717_v45 = vadd.f32 %v715_v38, %v696_v29  ;;  %v724_v46 = vrot.slane %v720_v39, 1  ;;  %v818_v38 = vstv %s2793_s7  ;;  %v565_v39 = vsel %vm280_vm2, %v2711_v9, 0.0  ;;  %s2881_s7 = sld [smem:[#allocation7 + $0x56]] }
 0x122   : > { %v716_v47 = vadd.f32 %v714_v41, %v695_v30  ;;  %v723_v43 = vrot.slane %v719_v42, 1  ;;  %vm1102_vm15 = vcmp.lt.s32.totalorder %v2642_v52, 16  ;;  %vm1187_vm2 = vcmp.lt.s32.totalorder %v2642_v52, 96 }
 0x123   : > { %v728_v48 = vadd.f32 %v724_v46, %v717_v45 }
 0x124   : > { %v727_v49 = vadd.f32 %v723_v43, %v716_v47 }
 0x126   : > { %v739_v53 = vpop.permute.xlu1 %738 }
 0x127   : > { %v1144_v54 = vld.sshfl [vmem:[#allocation1 + $0x10] sm:$0xff pattern:$0x73625140]  ;;  %v1143_v55 = vld.sshfl [vmem:[#allocation1 + $0x8] sm:$0xff pattern:$0x73625140]  ;;  %v743_v56 = vsel %vm742_vm13, %v739_v53, %v2743_v0  ;;  %v737_v57 = vpop.permute.xlu0 %736 }
 0x128   : > { %1151 = vrot.lane.b32.xlu1 %v1144_v54, %s2465_s6  ;;  %1149 = vrot.lane.b32.xlu0 %v1143_v55, %s2465_s6  ;;  %v1145_v58 = vld.sshfl [vmem:[#allocation1 + $0x18] sm:$0xff pattern:$0x73625140]  ;;  %v747_v59 = vmul.f32 %v745_v50, %v743_v56  ;;  %v752_v60 = vmul.f32 %v750_v51, %v743_v56  ;;  %v744_v61 = vsel %vm742_vm13, %v737_v57, %v739_v53  ;;  %v845_v57 = vstv %s2815_s17  ;;  %s2894_s17 = sld [smem:[#allocation7 + $0x5d]] }
 0x129   : > { %1153 = vrot.lane.b32.xlu2 %v1145_v58, %s2465_s6  ;;  %1174 = vst [vmem:[#allocation1] ss:$4 sm:$0xff] %v2626_v14  ;;  %v746_v62 = vmul.f32 %v745_v50, %v744_v61  ;;  %v751_v63 = vmul.f32 %v750_v51, %v744_v61  ;;  %v2785_v1 = vpop.permute.xlu2 %840  ;;  %v850_v58 = vstv %s2820_s18  ;;  %s2879_s6 = sld [smem:[#allocation7 + $0x25]]  ;;  %s2472_s18 = smov 111   ;;  %vm1038_vm13 = vcmp.lt.s32.totalorder %v2642_v52, 48 }
 0x12a   : > { %v749_v0 = vadd.f32 %v747_v59, %v728_v48  ;;  %v756_v2 = vrot.slane %v752_v60, 1  ;;  %v813_v48 = vstv %s2804_s14  ;;  %s2892_s14 = sld [smem:[#allocation7 + $0x2c]] }
 0x12b   : > { %v748_v4 = vadd.f32 %v746_v62, %v727_v49  ;;  %v755_v5 = vrot.slane %v751_v63, 1 }
 0x12c   : > { %v760_v6 = vadd.f32 %v756_v2, %v749_v0 }
 0x12d   : > { %v759_v7 = vadd.f32 %v755_v5, %v748_v4 }
 0x12f   : > { %v771_v15 = vpop.permute.xlu1 %770 }
 0x130   : > { %v1176_v16 = vld.sshfl [vmem:[#allocation1 + $0x10] sm:$0xff pattern:$0x73625140]  ;;  %v1175_v17 = vld.sshfl [vmem:[#allocation1 + $0x8] sm:$0xff pattern:$0x73625140]  ;;  %v775_v18 = vsel %vm774_vm14, %v771_v15, %v2754_v25  ;;  %v769_v19 = vpop.permute.xlu0 %768 }
 0x131   : > { %1183 = vrot.lane.b32.xlu1 %v1176_v16, %s2466_s8  ;;  %1181 = vrot.lane.b32.xlu0 %v1175_v17, %s2466_s8  ;;  %v1177_v21 = vld.sshfl [vmem:[#allocation1 + $0x18] sm:$0xff pattern:$0x73625140]  ;;  %v779_v22 = vmul.f32 %v777_v11, %v775_v18  ;;  %v784_v24 = vmul.f32 %v782_v12, %v775_v18  ;;  %v776_v26 = vsel %vm774_vm14, %v769_v19, %v771_v15  ;;  %vm1070_vm14 = vcmp.lt.s32.totalorder %v2642_v52, 32 }
 0x132   : > { %1185 = vrot.lane.b32.xlu2 %v1177_v21, %s2466_s8  ;;  %1206 = vst [vmem:[#allocation1] ss:$4 sm:$0xff] %v2626_v14  ;;  %v778_v27 = vmul.f32 %v777_v11, %v776_v26  ;;  %v783_v23 = vmul.f32 %v782_v12, %v776_v26  ;;  %v2806_v29 = vpop.permute.xlu2 %872  ;;  %v877_v21 = vstv %s2836_s22  ;;  %s2471_s8 = smov 127   ;;  %s2473_s22 = smov 95  }
 0x133   : > { %v781_v25 = vadd.f32 %v779_v22, %v760_v6  ;;  %v788_v28 = vrot.slane %v784_v24, 1  ;;  %v882_v22 = vstv %s2838_s23  ;;  %s2910_s23 = sld [smem:[#allocation7 + $0x3]] }
 0x134   : > { %v780_v30 = vadd.f32 %v778_v27, %v759_v7  ;;  %v787_v31 = vrot.slane %v783_v23, 1 }
 0x135   : > { %v792_v32 = vadd.f32 %v788_v28, %v781_v25 }
 0x136   : > { %v791_v33 = vadd.f32 %v787_v31, %v780_v30 }
 0x137   : > { %v794_v35 = vsel %vm287_vm1, %v792_v32, 0.0  ;;  %vm1155_vm1 = vcmp.lt.s32.totalorder %v2642_v52, 112 }
 0x138   : > { %v2818_v40 = vadd.f32 %v794_v35, %v566_v34  ;;  %v793_v41 = vsel %vm286_vm3, %v791_v33, 0.0  ;;  %v807_v42 = vpop.permute.xlu1 %806  ;;  %vm1219_vm3 = vcmp.lt.s32.totalorder %v2642_v52, 80 }
 0x139   : > { %v1208_v45 = vld.sshfl [vmem:[#allocation1 + $0x10] sm:$0xff pattern:$0x73625140]  ;;  %v1207_v46 = vld.sshfl [vmem:[#allocation1 + $0x8] sm:$0xff pattern:$0x73625140]  ;;  %v2822_v47 = vadd.f32 %v793_v41, %v565_v39  ;;  %v811_v8 = vsel %vm810_vm4, %v807_v42, %v2770_v44  ;;  %v805_v43 = vpop.permute.xlu0 %804 }
 0x13a   : > { %1215 = vrot.lane.b32.xlu1 %v1208_v45, %s2467_s19  ;;  %1213 = vrot.lane.b32.xlu0 %v1207_v46, %s2467_s19  ;;  %v1209_v9 = vld.sshfl [vmem:[#allocation1 + $0x18] sm:$0xff pattern:$0x73625140]  ;;  %v820_v49 = vmul.f32 %v818_v38, %v811_v8  ;;  %v812_v50 = vsel %vm810_vm4, %v805_v43, %v807_v42  ;;  %v815_v53 = vmul.f32 %v813_v48, %v811_v8  ;;  %v909_v46 = vstv %s2851_s28  ;;  %s2921_s28 = sld [smem:[#allocation7 + $0x3b]] }
 0x13b   : > { %1217 = vrot.lane.b32.xlu2 %v1209_v9, %s2467_s19  ;;  %1240 = vst [vmem:[#allocation1] ss:$4 sm:$0xff] %v2626_v14  ;;  %v819_v51 = vmul.f32 %v818_v38, %v812_v50  ;;  %v2831_v55 = vpop.permute.xlu2 %904  ;;  %v814_v44 = vmul.f32 %v813_v48, %v812_v50  ;;  %v914_v8 = vstv %s2853_s30  ;;  %s2907_s19 = sld [smem:[#allocation7 + $0x34]]  ;;  %s2474_s30 = smov 79   ;;  %vm1253_vm4 = vcmp.lt.s32.totalorder %v2642_v52, 47 }
 0x13c   : > { %v824_v54 = vrot.slane %v820_v49, 1 }
 0x13d   : > { %v823_v56 = vrot.slane %v819_v51, 1 }
 0x13e   : > { %v828_v59 = vadd.f32 %v824_v54, %v815_v53 }
 0x13f   : > { %v827_v63 = vadd.f32 %v823_v56, %v814_v44 }
 0x141   : > { %v839_v60 = vpop.permute.xlu1 %838 }
 0x142   : > { %v1242_v61 = vld.sshfl [vmem:[#allocation1 + $0x8] sm:$0xff pattern:$0x73625140]  ;;  %v1241_v62 = vld.sshfl [vmem:[#allocation1] sm:$0xff pattern:$0x73625140]  ;;  %v843_v0 = vsel %vm842_vm5, %v839_v60, %v2785_v1  ;;  %v837_v2 = vpop.permute.xlu0 %836 }
 0x143   : > { %1249 = vrot.lane.b32.xlu1 %v1242_v61, %s2468_s24  ;;  %1247 = vrot.lane.b32.xlu0 %v1241_v62, %s2468_s24  ;;  %v1243_v3 = vld.sshfl [vmem:[#allocation1 + $0x10] sm:$0xff pattern:$0x73625140]  ;;  %v847_v4 = vmul.f32 %v845_v57, %v843_v0  ;;  %v852_v5 = vmul.f32 %v850_v58, %v843_v0  ;;  %v844_v6 = vsel %vm842_vm5, %v837_v2, %v839_v60  ;;  %v946_v0 = vstv %s2868_s4  ;;  %s2475_s4 = smov 46  }
 0x144   : > { %1251 = vrot.lane.b32.xlu2 %v1243_v3, %s2468_s24  ;;  %1272 = vst [vmem:[#allocation1] ss:$4 sm:$0xff] %v2626_v14  ;;  %v846_v7 = vmul.f32 %v845_v57, %v844_v6  ;;  %v851_v11 = vmul.f32 %v850_v58, %v844_v6  ;;  %v2846_v18 = vpop.permute.xlu2 %936  ;;  %s2916_s24 = sld [smem:[#allocation7 + $0xa]]  ;;  %vm1285_vm5 = vcmp.lt.s32.totalorder %v2642_v52, 31 }
 0x145   : > { %v849_v12 = vadd.f32 %v847_v4, %v828_v59  ;;  %v856_v15 = vrot.slane %v852_v5, 1 }
 0x146   : > { %v848_v1 = vadd.f32 %v846_v7, %v827_v63  ;;  %v855_v16 = vrot.slane %v851_v11, 1  ;;  %v941_v63 = vstv %s2866_s20  ;;  %s2934_s20 = sld [smem:[#allocation7 + $0x42]] }
 0x147   : > { %v860_v17 = vadd.f32 %v856_v15, %v849_v12 }
 0x148   : > { %v859_v19 = vadd.f32 %v855_v16, %v848_v1 }
 0x14a   : > { %v871_v24 = vpop.permute.xlu1 %870 }
 0x14b   : > { %v1274_v26 = vld.sshfl [vmem:[#allocation1 + $0x8] sm:$0xff pattern:$0x73625140]  ;;  %v1273_v27 = vld.sshfl [vmem:[#allocation1] sm:$0xff pattern:$0x73625140]  ;;  %v875_v23 = vsel %vm874_vm6, %v871_v24, %v2806_v29  ;;  %v869_v25 = vpop.permute.xlu0 %868 }
 0x14c   : > { %1281 = vrot.lane.b32.xlu1 %v1274_v26, %s2469_s15  ;;  %1279 = vrot.lane.b32.xlu0 %v1273_v27, %s2469_s15  ;;  %v1275_v28 = vld.sshfl [vmem:[#allocation1 + $0x10] sm:$0xff pattern:$0x73625140]  ;;  %v879_v30 = vmul.f32 %v877_v21, %v875_v23  ;;  %v884_v31 = vmul.f32 %v882_v22, %v875_v23  ;;  %v876_v32 = vsel %vm874_vm6, %v869_v25, %v871_v24  ;;  %v973_v27 = vstv %s2879_s6  ;;  %s2942_s6 = sld [smem:[#allocation7 + $0x49]] }
 0x14d   : > { %1283 = vrot.lane.b32.xlu2 %v1275_v28, %s2469_s15  ;;  %1304 = vst [vmem:[#allocation1] ss:$4 sm:$0xff] %v2626_v14  ;;  %v878_v33 = vmul.f32 %v877_v21, %v876_v32  ;;  %v883_v34 = vmul.f32 %v882_v22, %v876_v32  ;;  %v2862_v45 = vpop.permute.xlu2 %968  ;;  %v978_v23 = vstv %s2881_s7  ;;  %s2932_s15 = sld [smem:[#allocation7 + $0x11]]  ;;  %s2476_s7 = smov 30   ;;  %vm1317_vm6 = vcmp.lt.s32.totalorder %v2642_v52, 15 }
 0x14e   : > { %v881_v35 = vadd.f32 %v879_v30, %v860_v17  ;;  %v888_v38 = vrot.slane %v884_v31, 1 }
 0x14f   : > { %v880_v29 = vadd.f32 %v878_v33, %v859_v19  ;;  %v887_v39 = vrot.slane %v883_v34, 1 }
 0x150   : > { %v892_v41 = vadd.f32 %v888_v38, %v881_v35 }
 0x151   : > { %v891_v42 = vadd.f32 %v887_v39, %v880_v29 }
 0x153   : > { %v903_v43 = vpop.permute.xlu1 %902 }
 0x154   : > { %v1306_v9 = vld.sshfl [vmem:[#allocation1 + $0x8] sm:$0xff pattern:$0x73625140]  ;;  %v1305_v48 = vld.sshfl [vmem:[#allocation1] sm:$0xff pattern:$0x73625140]  ;;  %v907_v49 = vsel %vm906_vm7, %v903_v43, %v2831_v55  ;;  %v901_v50 = vpop.permute.xlu0 %900 }
 0x155   : > { %1313 = vrot.lane.b32.xlu1 %v1306_v9, %s2470_s5  ;;  %1311 = vrot.lane.b32.xlu0 %v1305_v48, %s2470_s5  ;;  %v1307_v51 = vld.sshfl [vmem:[#allocation1 + $0x10] sm:$0xff pattern:$0x73625140]  ;;  %v911_v53 = vmul.f32 %v909_v46, %v907_v49  ;;  %v916_v54 = vmul.f32 %v914_v8, %v907_v49  ;;  %v908_v44 = vsel %vm906_vm7, %v901_v50, %v903_v43  ;;  %v1005_v48 = vstv %s2892_s14  ;;  %s2953_s14 = sld [smem:[#allocation7 + $0x50]] }
 0x156   : > { %1315 = vrot.lane.b32.xlu2 %v1307_v51, %s2470_s5  ;;  %1336 = vst [vmem:[#allocation1] ss:$4 sm:$0xff] %v2626_v14  ;;  %v910_v56 = vmul.f32 %v909_v46, %v908_v44  ;;  %v915_v57 = vmul.f32 %v914_v8, %v908_v44  ;;  %v1010_v49 = vstv %s2894_s17  ;;  %s2939_s5 = sld [smem:[#allocation7 + $0x18]]  ;;  %s2477_s17 = smov 14   ;;  %vm1349_vm7 = vcmp.lt.s32.totalorder %v2642_v52, 127 }
 0x157   : > { %v913_v58 = vadd.f32 %v911_v53, %v892_v41  ;;  %v920_v59 = vrot.slane %v916_v54, 1  ;;  %v1001_v2 = vpop.permute.xlu2 %1000 }
 0x158   : > { %v912_v55 = vadd.f32 %v910_v56, %v891_v42  ;;  %v919_v60 = vrot.slane %v915_v57, 1 }
 0x159   : > { %v924_v61 = vadd.f32 %v920_v59, %v913_v58 }
 0x15a   : > { %v923_v62 = vadd.f32 %v919_v60, %v912_v55 }
 0x15c   : > { %v935_v3 = vpop.permute.xlu1 %934 }
 0x15d   : > { %v1338_v4 = vld.sshfl [vmem:[#allocation1 + $0x10] sm:$0xff pattern:$0x73625140]  ;;  %v1337_v5 = vld.sshfl [vmem:[#allocation1 + $0x8] sm:$0xff pattern:$0x73625140]  ;;  %v939_v6 = vsel %vm938_vm8, %v935_v3, %v2846_v18  ;;  %v933_v7 = vpop.permute.xlu0 %932 }
 0x15e   : > { %1345 = vrot.lane.b32.xlu1 %v1338_v4, %s2471_s8  ;;  %1343 = vrot.lane.b32.xlu0 %v1337_v5, %s2471_s8  ;;  %v1339_v11 = vld.sshfl [vmem:[#allocation1 + $0x18] sm:$0xff pattern:$0x73625140]  ;;  %v943_v12 = vmul.f32 %v941_v63, %v939_v6  ;;  %v948_v15 = vmul.f32 %v946_v0, %v939_v6  ;;  %v940_v1 = vsel %vm938_vm8, %v933_v7, %v935_v3  ;;  %v1046_v6 = vstv %s2907_s19  ;;  %s2967_s19 = sld [smem:[#allocation7 + $0x57]] }
 0x15f   : > { %1347 = vrot.lane.b32.xlu2 %v1339_v11, %s2471_s8  ;;  %1368 = vst [vmem:[#allocation1] ss:$4 sm:$0xff] %v2626_v14  ;;  %v942_v16 = vmul.f32 %v941_v63, %v940_v1  ;;  %v947_v17 = vmul.f32 %v946_v0, %v940_v1  ;;  %s2951_s8 = sld [smem:[#allocation7 + $0x1f]]  ;;  %vm1381_vm8 = vcmp.lt.s32.totalorder %v2642_v52, 111 }
 0x160   : > { %v945_v19 = vadd.f32 %v943_v12, %v924_v61  ;;  %v952_v21 = vrot.slane %v948_v15, 1  ;;  %v2896_v28 = vpop.permute.xlu2 %1036 }
 0x161   : > { %v944_v18 = vadd.f32 %v942_v16, %v923_v62  ;;  %v951_v22 = vrot.slane %v947_v17, 1 }
 0x162   : > { %v956_v24 = vadd.f32 %v952_v21, %v945_v19 }
 0x163   : > { %v955_v26 = vadd.f32 %v951_v22, %v944_v18  ;;  %v1041_v18 = vstv %s2910_s23  ;;  %s2976_s23 = sld [smem:[#allocation7 + $0x2d]] }
 0x165   : > { %v967_v25 = vpop.permute.xlu1 %966 }
 0x166   : > { %v1370_v30 = vld.sshfl [vmem:[#allocation1 + $0x10] sm:$0xff pattern:$0x73625140]  ;;  %v1369_v31 = vld.sshfl [vmem:[#allocation1 + $0x8] sm:$0xff pattern:$0x73625140]  ;;  %v971_v32 = vsel %vm970_vm9, %v967_v25, %v2862_v45  ;;  %v965_v33 = vpop.permute.xlu0 %964 }
 0x167   : > { %1377 = vrot.lane.b32.xlu1 %v1370_v30, %s2472_s18  ;;  %1375 = vrot.lane.b32.xlu0 %v1369_v31, %s2472_s18  ;;  %v1371_v34 = vld.sshfl [vmem:[#allocation1 + $0x18] sm:$0xff pattern:$0x73625140]  ;;  %v975_v35 = vmul.f32 %v973_v27, %v971_v32  ;;  %v980_v38 = vmul.f32 %v978_v23, %v971_v32  ;;  %v972_v29 = vsel %vm970_vm9, %v965_v33, %v967_v25  ;;  %v1078_v30 = vstv %s2921_s28  ;;  %s2479_s28 = smov 110  }
 0x168   : > { %1379 = vrot.lane.b32.xlu2 %v1371_v34, %s2472_s18  ;;  %1400 = vst [vmem:[#allocation1] ss:$4 sm:$0xff] %v2626_v14  ;;  %v974_v39 = vmul.f32 %v973_v27, %v972_v29  ;;  %v979_v41 = vmul.f32 %v978_v23, %v972_v29  ;;  %s2965_s18 = sld [smem:[#allocation7 + $0x26]]  ;;  %vm1413_vm9 = vcmp.lt.s32.totalorder %v2642_v52, 95 }
 0x169   : > { %v977_v42 = vadd.f32 %v975_v35, %v956_v24  ;;  %v984_v46 = vrot.slane %v980_v38, 1  ;;  %v1069_v57 = vpop.permute.xlu2 %1068 }
 0x16a   : > { %v976_v45 = vadd.f32 %v974_v39, %v955_v26  ;;  %v983_v8 = vrot.slane %v979_v41, 1 }
 0x16b   : > { %v988_v43 = vadd.f32 %v984_v46, %v977_v42 }
 0x16c   : > { %v987_v9 = vadd.f32 %v983_v8, %v976_v45 }
 0x16e   : > { %v999_v50 = vpop.permute.xlu1 %998  ;;  %v997_v51 = vpop.permute.xlu0 %996 }
 0x16f   : > { %v1402_v53 = vld.sshfl [vmem:[#allocation1 + $0x10] sm:$0xff pattern:$0x73625140]  ;;  %v1401_v54 = vld.sshfl [vmem:[#allocation1 + $0x8] sm:$0xff pattern:$0x73625140]  ;;  %v1003_v44 = vsel %vm1002_vm10, %v999_v50, %v1001_v2  ;;  %v1004_v56 = vsel %vm1002_vm10, %v997_v51, %v999_v50 }
 0x170   : > { %1409 = vrot.lane.b32.xlu1 %v1402_v53, %s2473_s22  ;;  %1407 = vrot.lane.b32.xlu0 %v1401_v54, %s2473_s22  ;;  %v1403_v58 = vld.sshfl [vmem:[#allocation1 + $0x18] sm:$0xff pattern:$0x73625140]  ;;  %v1007_v59 = vmul.f32 %v1005_v48, %v1003_v44  ;;  %v1012_v55 = vmul.f32 %v1010_v49, %v1003_v44  ;;  %v1006_v60 = vmul.f32 %v1005_v48, %v1004_v56  ;;  %v1105_v54 = vstv %s2932_s15  ;;  %s2994_s15 = sld [smem:[#allocation7 + $0x4]] }
 0x171   : > { %1411 = vrot.lane.b32.xlu2 %v1403_v58, %s2473_s22  ;;  %1432 = vst [vmem:[#allocation1] ss:$4 sm:$0xff] %v2626_v14  ;;  %v1011_v61 = vmul.f32 %v1010_v49, %v1004_v56  ;;  %v1110_v44 = vstv %s2934_s20  ;;  %s2478_s22 = smov 126   ;;  %s2480_s20 = smov 94   ;;  %vm1445_vm10 = vcmp.lt.s32.totalorder %v2642_v52, 79 }
 0x172   : > { %v1009_v62 = vadd.f32 %v1007_v59, %v988_v43  ;;  %v1016_v63 = vrot.slane %v1012_v55, 1  ;;  %v1008_v0 = vadd.f32 %v1006_v60, %v987_v9  ;;  %v1101_v24 = vpop.permute.xlu2 %1100 }
 0x173   : > { %v1015_v2 = vrot.slane %v1011_v61, 1 }
 0x174   : > { %v1020_v3 = vadd.f32 %v1016_v63, %v1009_v62 }
 0x175   : > { %v1019_v4 = vadd.f32 %v1015_v2, %v1008_v0 }
 0x176   : > { %v1022_v5 = vsel %vm293_vm11, %v1020_v3, 0.0  ;;  %vm301_vm11 = vcmp.lt.s32.totalorder %v2791_v13, 15 }
 0x177   : > { %v2919_v7 = vadd.f32 %v1022_v5, %v2818_v40  ;;  %v1021_v11 = vsel %vm292_vm12, %v1019_v4, 0.0  ;;  %v1035_v12 = vpop.permute.xlu1 %1034  ;;  %v1033_v15 = vpop.permute.xlu0 %1032  ;;  %vm300_vm12 = vcmp.lt.s32.totalorder %v2799_v20, 15 }
 0x178   : > { %v1434_v1 = vld.sshfl [vmem:[#allocation1 + $0x10] sm:$0xff pattern:$0x73625140]  ;;  %v1433_v16 = vld.sshfl [vmem:[#allocation1 + $0x8] sm:$0xff pattern:$0x73625140]  ;;  %v2924_v17 = vadd.f32 %v1021_v11, %v2822_v47  ;;  %v1039_v19 = vsel %vm1038_vm13, %v1035_v12, %v2896_v28  ;;  %v1040_v21 = vsel %vm1038_vm13, %v1033_v15, %v1035_v12  ;;  %v1073_v28 = vstv %s2916_s24 }
 0x179   : > { %1441 = vrot.lane.b32.xlu1 %v1434_v1, %s2474_s30  ;;  %1439 = vrot.lane.b32.xlu0 %v1433_v16, %s2474_s30  ;;  %v1435_v40 = vld.sshfl [vmem:[#allocation1 + $0x18] sm:$0xff pattern:$0x73625140]  ;;  %v1048_v22 = vmul.f32 %v1046_v6, %v1039_v19  ;;  %v1047_v26 = vmul.f32 %v1046_v6, %v1040_v21  ;;  %v1043_v27 = vmul.f32 %v1041_v18, %v1039_v19  ;;  %v1126_v15 = vstv %s2939_s5  ;;  %s2978_s24 = sld [smem:[#allocation7 + $0x5e]] }
 0x17a   : > { %1443 = vrot.lane.b32.xlu2 %v1435_v40, %s2474_s30  ;;  %1468 = vst [vmem:[#allocation1] ss:$4 sm:$0xff] %v2626_v14  ;;  %v1042_v47 = vmul.f32 %v1041_v18, %v1040_v21  ;;  %v1131_v16 = vstv %s2942_s6  ;;  %v1128_v19 = vmul.f32 %v1126_v15, %v2767_v37  ;;  %v1127_v21 = vmul.f32 %v1126_v15, %v2765_v36  ;;  %s2988_s30 = sld [smem:[#allocation7 + $0x35]] }
 0x17b   : > { %v1052_v23 = vrot.slane %v1048_v22, 1  ;;  %v1051_v25 = vrot.slane %v1047_v26, 1  ;;  %v1133_v40 = vmul.f32 %v1131_v16, %v2767_v37  ;;  %v1132_v18 = vmul.f32 %v1131_v16, %v2765_v36  ;;  %s3011_s5 = sld [smem:[#allocation7 + $0x3c]] }
 0x17c   : > { %v1158_v37 = vstv %s2951_s8  ;;  %v1222_v15 = vstv %s2976_s23  ;;  %s3026_s6 = sld [smem:[#allocation7 + $0x12]]  ;;  %s2481_s8 = smov 45   ;;  %vm1481_vm13 = vcmp.lt.s32.totalorder %v2642_v52, 46 }
 0x17d   : > { %v1056_v31 = vadd.f32 %v1052_v23, %v1043_v27  ;;  %v1055_v32 = vadd.f32 %v1051_v25, %v1042_v47  ;;  %v1137_v25 = vrot.slane %v1133_v40, 1  ;;  %s3057_s23 = sld [smem:[#allocation7 + $0x51]] }
 0x180   : > { %v1067_v33 = vpop.permute.xlu1 %1066  ;;  %v1065_v34 = vpop.permute.xlu0 %1064 }
 0x181   : > { %v1469_v35 = vld.sshfl [vmem:[#allocation1] sm:$0xff pattern:$0x73625140]  ;;  %v1470_v38 = vld.sshfl [vmem:[#allocation1 + $0x8] sm:$0xff pattern:$0x73625140]  ;;  %v1071_v29 = vsel %vm1070_vm14, %v1067_v33, %v1069_v57  ;;  %v1072_v39 = vsel %vm1070_vm14, %v1065_v34, %v1067_v33 }
 0x182   : > { %1475 = vrot.lane.b32.xlu0 %v1469_v35, %s2475_s4  ;;  %v1471_v41 = vld.sshfl [vmem:[#allocation1 + $0x10] sm:$0xff pattern:$0x73625140]  ;;  %v1075_v42 = vmul.f32 %v1073_v28, %v1071_v29  ;;  %v1080_v46 = vmul.f32 %v1078_v30, %v1071_v29  ;;  %v1074_v45 = vmul.f32 %v1073_v28, %v1072_v39  ;;  %v1079_v8 = vmul.f32 %v1078_v30, %v1072_v39 }
 0x183   : > { %1479 = vrot.lane.b32.xlu2 %v1471_v41, %s2475_s4  ;;  %1500 = vst [vmem:[#allocation1] ss:$4 sm:$0xff] %v2626_v14  ;;  %v2937_v43 = vpop.permute.xlu2 %1153  ;;  %1477 = vrot.lane.b32.xlu1 %v1470_v38, %s2475_s4  ;;  %v1136_v28 = vrot.slane %v1132_v18, 1  ;;  %v1163_v30 = vstv %s2953_s14  ;;  %s3008_s4 = sld [smem:[#allocation7 + $0xb]]  ;;  %vm1513_vm14 = vcmp.lt.s32.totalorder %v2642_v52, 30 }
 0x184   : > { %v1077_v9 = vadd.f32 %v1075_v42, %v1056_v31  ;;  %v1084_v48 = vrot.slane %v1080_v46, 1  ;;  %v1076_v49 = vadd.f32 %v1074_v45, %v1055_v32  ;;  %v1083_v50 = vrot.slane %v1079_v8, 1  ;;  %s3041_s14 = sld [smem:[#allocation7 + $0x19]] }
 0x186   : > { %v1088_v51 = vadd.f32 %v1084_v48, %v1077_v9  ;;  %v1087_v53 = vadd.f32 %v1083_v50, %v1076_v49 }
 0x189   : > { %v1099_v56 = vpop.permute.xlu1 %1098  ;;  %v1097_v57 = vpop.permute.xlu0 %1096 }
 0x18a   : > { %v1501_v58 = vld.sshfl [vmem:[#allocation1] sm:$0xff pattern:$0x73625140]  ;;  %v1502_v59 = vld.sshfl [vmem:[#allocation1 + $0x8] sm:$0xff pattern:$0x73625140]  ;;  %v1103_v55 = vsel %vm1102_vm15, %v1099_v56, %v1101_v24  ;;  %v1104_v60 = vsel %vm1102_vm15, %v1097_v57, %v1099_v56 }
 0x18b   : > { %1507 = vrot.lane.b32.xlu0 %v1501_v58, %s2476_s7  ;;  %v1503_v61 = vld.sshfl [vmem:[#allocation1 + $0x10] sm:$0xff pattern:$0x73625140]  ;;  %v1107_v62 = vmul.f32 %v1105_v54, %v1103_v55  ;;  %v1112_v63 = vmul.f32 %v1110_v44, %v1103_v55  ;;  %v1106_v0 = vmul.f32 %v1105_v54, %v1104_v60  ;;  %v1111_v2 = vmul.f32 %v1110_v44, %v1104_v60 }
 0x18c   : > { %1511 = vrot.lane.b32.xlu2 %v1503_v61, %s2476_s7  ;;  %1532 = vst [vmem:[#allocation1] ss:$4 sm:$0xff] %v2626_v14  ;;  %v2947_v3 = vpop.permute.xlu2 %1185  ;;  %1509 = vrot.lane.b32.xlu1 %v1502_v59, %s2476_s7  ;;  %v1195_v54 = vstv %s2967_s19  ;;  %s3028_s7 = sld [smem:[#allocation7 + $0x43]]  ;;  %s2483_s19 = smov 29   ;;  %vm1577_vm15 = vcmp.lt.s32.totalorder %v2642_v52, 126 }
 0x18d   : > { %v1109_v4 = vadd.f32 %v1107_v62, %v1088_v51  ;;  %v1116_v5 = vrot.slane %v1112_v63, 1  ;;  %v1108_v6 = vadd.f32 %v1106_v0, %v1087_v53  ;;  %v1115_v11 = vrot.slane %v1111_v2, 1 }
 0x18e   : > { %v1190_v53 = vstv %s2965_s18  ;;  %s2482_s18 = smov 78  }
 0x18f   : > { %v1120_v12 = vadd.f32 %v1116_v5, %v1109_v4  ;;  %v1119_v1 = vadd.f32 %v1115_v11, %v1108_v6 }
 0x191   : > { %v1130_v23 = vadd.f32 %v1128_v19, %v1120_v12  ;;  %v1129_v47 = vadd.f32 %v1127_v21, %v1119_v1  ;;  %v1227_v1 = vstv %s2978_s24  ;;  %s2484_s24 = smov 13  }
 0x193   : > { %v1533_v22 = vld.sshfl [vmem:[#allocation1] sm:$0xff pattern:$0x73625140]  ;;  %v1535_v24 = vld.sshfl [vmem:[#allocation1 + $0x10] sm:$0xff pattern:$0x73625140]  ;;  %v1141_v31 = vadd.f32 %v1137_v25, %v1130_v23  ;;  %v1140_v33 = vadd.f32 %v1136_v28, %v1129_v47 }
 0x194   : > { %1539 = vrot.lane.b32.xlu0 %v1533_v22, %s2477_s17  ;;  %v1534_v26 = vld.sshfl [vmem:[#allocation1 + $0x8] sm:$0xff pattern:$0x73625140]  ;;  %1543 = vrot.lane.b32.xlu1 %v1535_v24, %s2477_s17 }
 0x195   : > { %1564 = vst [vmem:[#allocation1] ss:$4 sm:$0xff] %v2626_v14  ;;  %v2960_v27 = vpop.permute.xlu2 %1217 }
 0x19a   : > { %v1152_v36 = vpop.permute.xlu1 %1151  ;;  %v1150_v32 = vpop.permute.xlu0 %1149 }
 0x19b   : > { %v1156_v34 = vsel %vm1155_vm1, %v1152_v36, %v2937_v43  ;;  %v1157_v35 = vsel %vm1155_vm1, %v1150_v32, %v1152_v36  ;;  %vm1545_vm1 = vcmp.lt.s32.totalorder %v2642_v52, 14 }
 0x19c   : > { %1541 = vrot.lane.b32.xlu0 %v1534_v26, %s2477_s17  ;;  %v1566_v38 = vld.sshfl [vmem:[#allocation1 + $0x10] sm:$0xff pattern:$0x73625140]  ;;  %v1567_v29 = vld.sshfl [vmem:[#allocation1 + $0x18] sm:$0xff pattern:$0x73625140]  ;;  %v1160_v39 = vmul.f32 %v1158_v37, %v1156_v34  ;;  %v1165_v41 = vmul.f32 %v1163_v30, %v1156_v34  ;;  %v1159_v42 = vmul.f32 %v1158_v37, %v1157_v35  ;;  %v1164_v46 = vmul.f32 %v1163_v30, %v1157_v35 }
 0x19d   : > { %1573 = vrot.lane.b32.xlu2 %v1566_v38, %s2478_s22  ;;  %v1565_v45 = vld.sshfl [vmem:[#allocation1 + $0x8] sm:$0xff pattern:$0x73625140]  ;;  %v1261_v35 = vstv %s2988_s30  ;;  %s3043_s17 = sld [smem:[#allocation7 + $0x4a]] }
 0x19e   : > { %1596 = vst [vmem:[#allocation1] ss:$4 sm:$0xff] %v2626_v14  ;;  %v1162_v8 = vadd.f32 %v1160_v39, %v1141_v31  ;;  %v1169_v9 = vrot.slane %v1165_v41, 1  ;;  %v1161_v48 = vadd.f32 %v1159_v42, %v1140_v33  ;;  %v1168_v49 = vrot.slane %v1164_v46, 1  ;;  %v2971_v43 = vpop.permute.xlu2 %1251  ;;  %s3067_s30 = sld [smem:[#allocation7 + $0x58]] }
 0x1a0   : > { %v1173_v50 = vadd.f32 %v1169_v9, %v1162_v8  ;;  %v1172_v51 = vadd.f32 %v1168_v49, %v1161_v48 }
 0x1a3   : > { %v1184_v44 = vpop.permute.xlu1 %1183  ;;  %v1182_v56 = vpop.permute.xlu0 %1181 }
 0x1a4   : > { %1575 = vrot.lane.b32.xlu0 %v1567_v29, %s2478_s22  ;;  %v1188_v57 = vsel %vm1187_vm2, %v1184_v44, %v2947_v3  ;;  %v1189_v58 = vsel %vm1187_vm2, %v1182_v56, %v1184_v44  ;;  %vm1609_vm2 = vcmp.lt.s32.totalorder %v2642_v52, 110 }
 0x1a5   : > { %1571 = vrot.lane.b32.xlu2 %v1565_v45, %s2478_s22  ;;  %v1599_v59 = vld.sshfl [vmem:[#allocation1 + $0x18] sm:$0xff pattern:$0x73625140]  ;;  %v1598_v55 = vld.sshfl [vmem:[#allocation1 + $0x10] sm:$0xff pattern:$0x73625140]  ;;  %v1192_v60 = vmul.f32 %v1190_v53, %v1188_v57  ;;  %v1197_v61 = vmul.f32 %v1195_v54, %v1188_v57  ;;  %v1191_v62 = vmul.f32 %v1190_v53, %v1189_v58  ;;  %v1196_v63 = vmul.f32 %v1195_v54, %v1189_v58 }
 0x1a6   : > { %v1597_v0 = vld.sshfl [vmem:[#allocation1 + $0x8] sm:$0xff pattern:$0x73625140]  ;;  %v1293_v53 = vstv %s3011_s5  ;;  %s3055_s22 = sld [smem:[#allocation7 + $0x20]]  ;;  %s2486_s5 = smov 109  }
 0x1a7   : > { %v1194_v2 = vadd.f32 %v1192_v60, %v1173_v50  ;;  %v1201_v4 = vrot.slane %v1197_v61, 1  ;;  %v1193_v5 = vadd.f32 %v1191_v62, %v1172_v51  ;;  %v1200_v6 = vrot.slane %v1196_v63, 1  ;;  %1628 = vst [vmem:[#allocation1] ss:$4 sm:$0xff] %v2626_v14  ;;  %v2982_v11 = vpop.permute.xlu2 %1283 }
 0x1a9   : > { %v1205_v3 = vadd.f32 %v1201_v4, %v1194_v2  ;;  %v1204_v12 = vadd.f32 %v1200_v6, %v1193_v5 }
 0x1ac   : > { %1607 = vrot.lane.b32.xlu0 %v1599_v59, %s2479_s28  ;;  %v1216_v16 = vpop.permute.xlu1 %1215  ;;  %v1214_v19 = vpop.permute.xlu0 %1213 }
 0x1ad   : > { %1605 = vrot.lane.b32.xlu2 %v1598_v55, %s2479_s28  ;;  %v1220_v21 = vsel %vm1219_vm3, %v1216_v16, %v2960_v27  ;;  %v1221_v40 = vsel %vm1219_vm3, %v1214_v19, %v1216_v16  ;;  %v1325_v16 = vstv %s3028_s7  ;;  %s2487_s7 = smov 93   ;;  %vm1641_vm3 = vcmp.lt.s32.totalorder %v2642_v52, 94 }
 0x1ae   : > { %v1631_v18 = vld.sshfl [vmem:[#allocation1 + $0x18] sm:$0xff pattern:$0x73625140]  ;;  %v2992_v22 = vld.sshfl [vmem:[#allocation1 + $0x8] sm:$0xff pattern:$0x73625140]  ;;  %v1224_v24 = vmul.f32 %v1222_v15, %v1220_v21  ;;  %v1229_v26 = vmul.f32 %v1227_v1, %v1220_v21  ;;  %v1223_v23 = vmul.f32 %v1222_v15, %v1221_v40  ;;  %v1228_v47 = vmul.f32 %v1227_v1, %v1221_v40 }
 0x1af   : > { %v1630_v25 = vld.sshfl [vmem:[#allocation1 + $0x10] sm:$0xff pattern:$0x73625140]  ;;  %v1320_v1 = vstv %s3026_s6  ;;  %s3090_s6 = sld [smem:[#allocation7 + $0x36]] }
 0x1b0   : > { %v1226_v28 = vadd.f32 %v1224_v24, %v1205_v3  ;;  %v1233_v37 = vrot.slane %v1229_v26, 1  ;;  %v1225_v30 = vadd.f32 %v1223_v23, %v1204_v12  ;;  %v1232_v36 = vrot.slane %v1228_v47, 1  ;;  %1660 = vst [vmem:[#allocation1] ss:$4 sm:$0xff] %v2626_v14  ;;  %v2997_v31 = vpop.permute.xlu2 %1315 }
 0x1b2   : > { %v1237_v27 = vadd.f32 %v1233_v37, %v1226_v28  ;;  %v1236_v32 = vadd.f32 %v1232_v36, %v1225_v30 }
 0x1b4   : > { %1639 = vrot.lane.b32.xlu0 %v1631_v18, %s2480_s20  ;;  %v3002_v33 = vadd.f32 %v1237_v27, %v2919_v7  ;;  %v3005_v34 = vadd.f32 %v1236_v32, %v2924_v17  ;;  %v1256_v17 = vstv %s2994_s15  ;;  %s2485_s15 = smov 125  }
 0x1b5   : > { %1603 = vrot.lane.b32.xlu2 %v1597_v0, %s2479_s28  ;;  %v1250_v38 = vpop.permute.xlu1 %1249  ;;  %v1248_v29 = vpop.permute.xlu0 %1247  ;;  %s3065_s28 = sld [smem:[#allocation7 + $0x27]] }
 0x1b6   : > { %v1254_v39 = vsel %vm1253_vm4, %v1250_v38, %v2971_v43  ;;  %v1255_v41 = vsel %vm1253_vm4, %v1248_v29, %v1250_v38  ;;  %v1288_v43 = vstv %s3008_s4  ;;  %v1352_v38 = vstv %s3041_s14  ;;  %s3078_s4 = sld [smem:[#allocation7 + $0x5f]] }
 0x1b7   : > { %v3014_v42 = vld.sshfl [vmem:[#allocation1 + $0x8] sm:$0xff pattern:$0x73625140]  ;;  %v3016_v7 = vld.sshfl [vmem:[#allocation1 + $0x10] sm:$0xff pattern:$0x73625140]  ;;  %v1263_v46 = vmul.f32 %v1261_v35, %v1254_v39  ;;  %v1262_v45 = vmul.f32 %v1261_v35, %v1255_v41  ;;  %v1258_v9 = vmul.f32 %v1256_v17, %v1254_v39  ;;  %v1257_v49 = vmul.f32 %v1256_v17, %v1255_v41 }
 0x1b8   : > { %v1663_v8 = vld.sshfl [vmem:[#allocation1 + $0x18] sm:$0xff pattern:$0x73625140]  ;;  %v1357_v29 = vstv %s3043_s17  ;;  %s2104_s14 = sld [smem:[#allocation7 + $0xc]]  ;;  %vm1673_vm4 = vcmp.lt.s32.totalorder %v2642_v52, 78 }
 0x1b9   : > { %1696 = vst [vmem:[#allocation1] ss:$4 sm:$0xff] %v2626_v14  ;;  %v1267_v48 = vrot.slane %v1263_v46, 1  ;;  %v1266_v50 = vrot.slane %v1262_v45, 1  ;;  %v3020_v51 = vpop.permute.xlu2 %1347  ;;  %s2153_s17 = sld [smem:[#allocation7 + $0x3d]] }
 0x1bb   : > { %v1271_v54 = vadd.f32 %v1267_v48, %v1258_v9  ;;  %v1270_v44 = vadd.f32 %v1266_v50, %v1257_v49 }
 0x1bd   : > { %1637 = vrot.lane.b32.xlu2 %v1630_v25, %s2480_s20 }
 0x1be   : > { %v1282_v56 = vpop.permute.xlu1 %1281  ;;  %v1280_v57 = vpop.permute.xlu0 %1279 }
 0x1bf   : > { %v1286_v58 = vsel %vm1285_vm5, %v1282_v56, %v2982_v11  ;;  %v1287_v59 = vsel %vm1285_vm5, %v1280_v57, %v1282_v56  ;;  %vm307_vm5 = vcmp.lt.s32.totalorder %v2791_v13, 14 }
 0x1c0   : > { %v1698_v55 = vld.sshfl [vmem:[#allocation1 + $0x8] sm:$0xff pattern:$0x73625140]  ;;  %v1699_v60 = vld.sshfl [vmem:[#allocation1 + $0x10] sm:$0xff pattern:$0x73625140]  ;;  %v1290_v61 = vmul.f32 %v1288_v43, %v1286_v58  ;;  %v1295_v62 = vmul.f32 %v1293_v53, %v1286_v58  ;;  %v1289_v63 = vmul.f32 %v1288_v43, %v1287_v59  ;;  %v1294_v0 = vmul.f32 %v1293_v53, %v1287_v59 }
 0x1c1   : > { %1705 = vrot.lane.b32.xlu1 %v1698_v55, %s2481_s8  ;;  %v1697_v2 = vld.sshfl [vmem:[#allocation1] sm:$0xff pattern:$0x73625140]  ;;  %v1384_v58 = vstv %s3055_s22  ;;  %v1389_v59 = vstv %s3057_s23  ;;  %s2111_s22 = sld [smem:[#allocation7 + $0x13]] }
 0x1c2   : > { %1703 = vrot.lane.b32.xlu0 %v1697_v2, %s2481_s8  ;;  %1728 = vst [vmem:[#allocation1] ss:$4 sm:$0xff] %v2626_v14  ;;  %v1292_v4 = vadd.f32 %v1290_v61, %v1271_v54  ;;  %v1299_v5 = vrot.slane %v1295_v62, 1  ;;  %v1291_v6 = vadd.f32 %v1289_v63, %v1270_v44  ;;  %v1298_v11 = vrot.slane %v1294_v0, 1  ;;  %v3034_v15 = vpop.permute.xlu2 %1379  ;;  %s2160_s23 = sld [smem:[#allocation7 + $0x44]] }
 0x1c4   : > { %v1303_v3 = vadd.f32 %v1299_v5, %v1292_v4  ;;  %v1302_v12 = vadd.f32 %v1298_v11, %v1291_v6 }
 0x1c5   : > { %1635 = vrot.lane.b32.xlu2 %v2992_v22, %s2480_s20  ;;  %s3076_s20 = sld [smem:[#allocation7 + $0x2e]] }
 0x1c7   : > { %v1314_v19 = vpop.permute.xlu1 %1313  ;;  %v1312_v21 = vpop.permute.xlu0 %1311 }
 0x1c8   : > { %v1318_v40 = vsel %vm1317_vm6, %v1314_v19, %v2997_v31  ;;  %v1319_v18 = vsel %vm1317_vm6, %v1312_v21, %v1314_v19  ;;  %vm306_vm6 = vcmp.lt.s32.totalorder %v2799_v20, 14 }
 0x1c9   : > { %v1730_v24 = vld.sshfl [vmem:[#allocation1 + $0x8] sm:$0xff pattern:$0x73625140]  ;;  %v1731_v26 = vld.sshfl [vmem:[#allocation1 + $0x10] sm:$0xff pattern:$0x73625140]  ;;  %v1322_v23 = vmul.f32 %v1320_v1, %v1318_v40  ;;  %v1327_v47 = vmul.f32 %v1325_v16, %v1318_v40  ;;  %v1321_v25 = vmul.f32 %v1320_v1, %v1319_v18  ;;  %v1326_v28 = vmul.f32 %v1325_v16, %v1319_v18 }
 0x1ca   : > { %1671 = vrot.lane.b32.xlu0 %v1663_v8, %s2482_s18  ;;  %1737 = vrot.lane.b32.xlu1 %v1730_v24, %s2483_s19  ;;  %v1729_v22 = vld.sshfl [vmem:[#allocation1] sm:$0xff pattern:$0x73625140]  ;;  %v1416_v40 = vstv %s3065_s28  ;;  %v1421_v18 = vstv %s3067_s30  ;;  %s2125_s28 = sld [smem:[#allocation7 + $0x21]] }
 0x1cb   : > { %1760 = vst [vmem:[#allocation1] ss:$4 sm:$0xff] %v2626_v14  ;;  %v1324_v37 = vadd.f32 %v1322_v23, %v1303_v3  ;;  %v1331_v30 = vrot.slane %v1327_v47, 1  ;;  %v1323_v36 = vadd.f32 %v1321_v25, %v1302_v12  ;;  %v1330_v31 = vrot.slane %v1326_v28, 1  ;;  %v3051_v35 = vpop.permute.xlu2 %1411  ;;  %s2174_s30 = sld [smem:[#allocation7 + $0x52]] }
 0x1cd   : > { %1707 = vrot.lane.b32.xlu2 %v1699_v60, %s2481_s8  ;;  %v1335_v27 = vadd.f32 %v1331_v30, %v1324_v37  ;;  %v1334_v32 = vadd.f32 %v1330_v31, %v1323_v36  ;;  %s2097_s8 = sld [smem:[#allocation7 + $0x5]] }
 0x1d0   : > { %v1346_v39 = vpop.permute.xlu1 %1345  ;;  %v1344_v41 = vpop.permute.xlu0 %1343 }
 0x1d1   : > { %v1350_v17 = vsel %vm1349_vm7, %v1346_v39, %v3020_v51  ;;  %v1351_v46 = vsel %vm1349_vm7, %v1344_v41, %v1346_v39  ;;  %vm1709_vm7 = vcmp.lt.s32.totalorder %v2642_v52, 45 }
 0x1d2   : > { %v1763_v45 = vld.sshfl [vmem:[#allocation1 + $0x10] sm:$0xff pattern:$0x73625140]  ;;  %v1762_v8 = vld.sshfl [vmem:[#allocation1 + $0x8] sm:$0xff pattern:$0x73625140]  ;;  %v1354_v9 = vmul.f32 %v1352_v38, %v1350_v17  ;;  %v1359_v48 = vmul.f32 %v1357_v29, %v1350_v17  ;;  %v1353_v49 = vmul.f32 %v1352_v38, %v1351_v46  ;;  %v1358_v50 = vmul.f32 %v1357_v29, %v1351_v46 }
 0x1d3   : > { %1771 = vrot.lane.b32.xlu1 %v1763_v45, %s2484_s24  ;;  %1769 = vrot.lane.b32.xlu0 %v1762_v8, %s2484_s24  ;;  %v1761_v43 = vld.sshfl [vmem:[#allocation1] sm:$0xff pattern:$0x73625140]  ;;  %v1448_v17 = vstv %s3076_s20  ;;  %v1453_v46 = vstv %s3078_s4  ;;  %s3138_s20 = sld [smem:[#allocation7 + $0x59]] }
 0x1d4   : > { %1792 = vst [vmem:[#allocation1] ss:$4 sm:$0xff] %v2626_v14  ;;  %v1356_v53 = vadd.f32 %v1354_v9, %v1335_v27  ;;  %v1363_v54 = vrot.slane %v1359_v48, 1  ;;  %v1355_v44 = vadd.f32 %v1353_v49, %v1334_v32  ;;  %v1362_v56 = vrot.slane %v1358_v50, 1  ;;  %v1444_v55 = vpop.permute.xlu2 %1443  ;;  %s3145_s4 = sld [smem:[#allocation7 + $0x2f]] }
 0x1d5   : > { %1739 = vrot.lane.b32.xlu2 %v1731_v26, %s2483_s19 }
 0x1d6   : > { %v1367_v51 = vadd.f32 %v1363_v54, %v1356_v53  ;;  %v1366_v57 = vadd.f32 %v1362_v56, %v1355_v44 }
 0x1d9   : > { %v1378_v60 = vpop.permute.xlu1 %1377  ;;  %v1376_v61 = vpop.permute.xlu0 %1375 }
 0x1da   : > { %v1382_v62 = vsel %vm1381_vm8, %v1378_v60, %v3034_v15  ;;  %v1383_v63 = vsel %vm1381_vm8, %v1376_v61, %v1378_v60  ;;  %vm1741_vm8 = vcmp.lt.s32.totalorder %v2642_v52, 29 }
 0x1db   : > { %1767 = vrot.lane.b32.xlu1 %v1761_v43, %s2484_s24  ;;  %v1794_v0 = vld.sshfl [vmem:[#allocation1 + $0x10] sm:$0xff pattern:$0x73625140]  ;;  %v1386_v2 = vmul.f32 %v1384_v58, %v1382_v62  ;;  %v1391_v4 = vmul.f32 %v1389_v59, %v1382_v62  ;;  %v1385_v5 = vmul.f32 %v1384_v58, %v1383_v63  ;;  %v1390_v6 = vmul.f32 %v1389_v59, %v1383_v63  ;;  %v1795_v11 = vld.sshfl [vmem:[#allocation1 + $0x18] sm:$0xff pattern:$0x73625140] }
 0x1dc   : > { %1801 = vrot.lane.b32.xlu0 %v1794_v0, %s2485_s15  ;;  %v1793_v3 = vld.sshfl [vmem:[#allocation1 + $0x8] sm:$0xff pattern:$0x73625140]  ;;  %v1489_v0 = vstv %s3090_s6  ;;  %s3122_s24 = sld [smem:[#allocation7 + $0x1a]] }
 0x1dd   : > { %1735 = vrot.lane.b32.xlu2 %v1729_v22, %s2483_s19  ;;  %v1388_v12 = vadd.f32 %v1386_v2, %v1367_v51  ;;  %v1395_v1 = vrot.slane %v1391_v4, 1  ;;  %v1387_v16 = vadd.f32 %v1385_v5, %v1366_v57  ;;  %v1394_v15 = vrot.slane %v1390_v6, 1  ;;  %1824 = vst [vmem:[#allocation1] ss:$4 sm:$0xff] %v2626_v14  ;;  %v1480_v25 = vpop.permute.xlu2 %1479  ;;  %s3119_s19 = sld [smem:[#allocation7 + $0x4b]] }
 0x1de   : > { %s2147_s6 = sld [smem:[#allocation7 + $0x37]] }
 0x1df   : > { %v1399_v19 = vadd.f32 %v1395_v1, %v1388_v12  ;;  %v1398_v21 = vadd.f32 %v1394_v15, %v1387_v16 }
 0x1e2   : > { %v1410_v24 = vpop.permute.xlu1 %1409  ;;  %v1408_v26 = vpop.permute.xlu0 %1407 }
 0x1e3   : > { %1803 = vrot.lane.b32.xlu1 %v1795_v11, %s2485_s15  ;;  %v1414_v23 = vsel %vm1413_vm9, %v1410_v24, %v3051_v35  ;;  %v1415_v47 = vsel %vm1413_vm9, %v1408_v26, %v1410_v24  ;;  %vm1773_vm9 = vcmp.lt.s32.totalorder %v2642_v52, 13 }
 0x1e4   : > { %v1418_v28 = vmul.f32 %v1416_v40, %v1414_v23  ;;  %v1423_v22 = vmul.f32 %v1421_v18, %v1414_v23  ;;  %v1417_v37 = vmul.f32 %v1416_v40, %v1415_v47  ;;  %v1422_v30 = vmul.f32 %v1421_v18, %v1415_v47  ;;  %v1826_v36 = vld.sshfl [vmem:[#allocation1 + $0x10] sm:$0xff pattern:$0x73625140]  ;;  %v1827_v31 = vld.sshfl [vmem:[#allocation1 + $0x18] sm:$0xff pattern:$0x73625140] }
 0x1e5   : > { %1669 = vrot.lane.b32.xlu2 %v3016_v7, %s2482_s18  ;;  %1833 = vrot.lane.b32.xlu0 %v1826_v36, %s2486_s5  ;;  %v1825_v27 = vld.sshfl [vmem:[#allocation1 + $0x8] sm:$0xff pattern:$0x73625140]  ;;  %v1521_v40 = vstv %s2153_s17  ;;  %s3179_s17 = sld [smem:[#allocation7 + $0x14]] }
 0x1e6   : > { %v1420_v32 = vadd.f32 %v1418_v28, %v1399_v19  ;;  %v1427_v38 = vrot.slane %v1423_v22, 1  ;;  %v1419_v35 = vadd.f32 %v1417_v37, %v1398_v21  ;;  %v1426_v29 = vrot.slane %v1422_v30, 1  ;;  %1856 = vst [vmem:[#allocation1] ss:$4 sm:$0xff] %v2626_v14  ;;  %v1512_v53 = vpop.permute.xlu2 %1511 }
 0x1e7   : > { %v1516_v21 = vstv %s2104_s14  ;;  %s2154_s14 = sld [smem:[#allocation7 + $0x3e]] }
 0x1e8   : > { %v1431_v39 = vadd.f32 %v1427_v38, %v1420_v32  ;;  %v1430_v41 = vadd.f32 %v1426_v29, %v1419_v35 }
 0x1eb   : > { %1799 = vrot.lane.b32.xlu1 %v1793_v3, %s2485_s15  ;;  %v1442_v7 = vpop.permute.xlu1 %1441  ;;  %v1440_v45 = vpop.permute.xlu0 %1439  ;;  %v1484_v3 = vstv %s2097_s8  ;;  %s3136_s15 = sld [smem:[#allocation7 + $0x28]] }
 0x1ec   : > { %v1446_v8 = vsel %vm1445_vm10, %v1442_v7, %v1444_v55  ;;  %v1447_v9 = vsel %vm1445_vm10, %v1440_v45, %v1442_v7  ;;  %v1585_v7 = vstv %s3119_s19  ;;  %v1548_v45 = vstv %s2111_s22  ;;  %s2105_s8 = sld [smem:[#allocation7 + $0xd]] }
 0x1ed   : > { %1667 = vrot.lane.b32.xlu2 %v3014_v42, %s2482_s18  ;;  %v1450_v48 = vmul.f32 %v1448_v17, %v1446_v8  ;;  %v1455_v49 = vmul.f32 %v1453_v46, %v1446_v8  ;;  %v1449_v50 = vmul.f32 %v1448_v17, %v1447_v9  ;;  %v1454_v43 = vmul.f32 %v1453_v46, %v1447_v9  ;;  %v1858_v54 = vld.sshfl [vmem:[#allocation1 + $0x10] sm:$0xff pattern:$0x73625140]  ;;  %v1859_v44 = vld.sshfl [vmem:[#allocation1 + $0x18] sm:$0xff pattern:$0x73625140] }
 0x1ee   : > { %1865 = vrot.lane.b32.xlu0 %v1858_v54, %s2487_s7  ;;  %v3095_v56 = vld.sshfl [vmem:[#allocation1 + $0x8] sm:$0xff pattern:$0x73625140]  ;;  %s2488_s18 = smov 77   ;;  %v1553_v8 = vstv %s2160_s23  ;;  %s3188_s19 = sld [smem:[#allocation7 + $0x1b]]  ;;  %vm1805_vm10 = vcmp.lt.s32.totalorder %v2642_v52, 125 }
 0x1ef   : > { %v1452_v51 = vadd.f32 %v1450_v48, %v1431_v39  ;;  %v1459_v57 = vrot.slane %v1455_v49, 1  ;;  %v1451_v58 = vadd.f32 %v1449_v50, %v1430_v41  ;;  %v1458_v59 = vrot.slane %v1454_v43, 1  ;;  %1888 = vst [vmem:[#allocation1] ss:$4 sm:$0xff] %v2626_v14  ;;  %s3190_s22 = sld [smem:[#allocation7 + $0x4c]] }
 0x1f0   : > { %v1580_v48 = vstv %s3122_s24  ;;  %s3195_s23 = sld [smem:[#allocation7 + $0x22]] }
 0x1f1   : > { %v1463_v42 = vadd.f32 %v1459_v57, %v1452_v51  ;;  %v1462_v55 = vadd.f32 %v1458_v59, %v1451_v58  ;;  %s3197_s24 = sld [smem:[#allocation7 + $0x53]] }
 0x1f3   : > { %1835 = vrot.lane.b32.xlu1 %v1827_v31, %s2486_s5  ;;  %v1465_v60 = vsel %vm301_vm11, %v1463_v42, 0.0  ;;  %v1464_v61 = vsel %vm300_vm12, %v1462_v55, 0.0  ;;  %vm1837_vm11 = vcmp.lt.s32.totalorder %v2642_v52, 109  ;;  %vm1901_vm12 = vcmp.lt.s32.totalorder %v2642_v52, 77 }
 0x1f4   : > { %v3103_v62 = vadd.f32 %v1465_v60, %v3002_v33  ;;  %v3106_v63 = vadd.f32 %v1464_v61, %v3005_v34  ;;  %v1476_v14 = vpop.permute.xlu0 %1475 }
 0x1f5   : > { %v1478_v2 = vpop.permute.xlu1 %1477 }
 0x1f6   : > { %v1890_v4 = vld.sshfl [vmem:[#allocation1 + $0x10] sm:$0xff pattern:$0x73625140]  ;;  %v1482_v5 = vsel %vm1481_vm13, %v1478_v2, %v1480_v25  ;;  %v1483_v6 = vsel %vm1481_vm13, %v1476_v14, %v1478_v2  ;;  %v1889_v39 = vld.sshfl [vmem:[#allocation1 + $0x8] sm:$0xff pattern:$0x73625140] }
 0x1f7   : > { %v3109_v11 = vpop.permute.xlu2 %1573  ;;  %1897 = vrot.lane.b32.xlu0 %v1890_v4, %s2488_s18  ;;  %v1490_v12 = vmul.f32 %v1489_v0, %v1483_v6  ;;  %v1491_v33 = vmul.f32 %v1489_v0, %v1482_v5  ;;  %v1485_v1 = vmul.f32 %v1484_v3, %v1483_v6  ;;  %v1486_v16 = vmul.f32 %v1484_v3, %v1482_v5  ;;  %v1891_v54 = vld.sshfl [vmem:[#allocation1 + $0x18] sm:$0xff pattern:$0x73625140] }
 0x1f8   : > { %1895 = vrot.lane.b32.xlu2 %v1889_v39, %s2488_s18  ;;  %vm1869_vm13 = vcmp.lt.s32.totalorder %v2642_v52, 93 }
 0x1f9   : > { %v1494_v34 = vrot.slane %v1490_v12, 1  ;;  %v1495_v15 = vrot.slane %v1491_v33, 1 }
 0x1fb   : > { %1831 = vrot.lane.b32.xlu1 %v1825_v27, %s2486_s5  ;;  %v1498_v18 = vadd.f32 %v1494_v34, %v1485_v1  ;;  %v1499_v24 = vadd.f32 %v1495_v15, %v1486_v16  ;;  %s3153_s5 = sld [smem:[#allocation7 + $0x60]] }
 0x1fd   : > { %v1508_v19 = vpop.permute.xlu0 %1507 }
 0x1fe   : > { %v1510_v26 = vpop.permute.xlu1 %1509 }
 0x1ff   : > { %v1572_v23 = vpop.permute.xlu2 %1571  ;;  %v1514_v47 = vsel %vm1513_vm14, %v1510_v26, %v1512_v53  ;;  %v1515_v25 = vsel %vm1513_vm14, %v1508_v19, %v1510_v26  ;;  %vm312_vm14 = vcmp.lt.s32.totalorder %v2799_v20, 13 }
 0x200   : > { %v1579_v28 = vsel %vm1577_vm15, %v1572_v23, %v3109_v11  ;;  %v1517_v22 = vmul.f32 %v1516_v21, %v1515_v25  ;;  %v1518_v37 = vmul.f32 %v1516_v21, %v1514_v47  ;;  %v1522_v30 = vmul.f32 %v1521_v40, %v1515_v25 }
 0x201   : > { %v1523_v36 = vmul.f32 %v1521_v40, %v1514_v47  ;;  %v1586_v53 = vmul.f32 %v1585_v7, %v1579_v28  ;;  %v1581_v59 = vmul.f32 %v1580_v48, %v1579_v28 }
 0x202   : > { %v1519_v31 = vadd.f32 %v1517_v22, %v1498_v18  ;;  %v1520_v27 = vadd.f32 %v1518_v37, %v1499_v24  ;;  %v1526_v32 = vrot.slane %v1522_v30, 1  ;;  %v1617_v18 = vstv %s2174_s30  ;;  %s3204_s30 = sld [smem:[#allocation7 + $0x61]] }
 0x203   : > { %1867 = vrot.lane.b32.xlu1 %v1859_v44, %s2487_s7  ;;  %v1527_v38 = vrot.slane %v1523_v36, 1  ;;  %v1590_v61 = vrot.slane %v1586_v53, 1  ;;  %v1644_v36 = vstv %s3136_s15  ;;  %s3206_s15 = sld [smem:[#allocation7 + $0x5a]] }
 0x204   : > { %v1530_v35 = vadd.f32 %v1526_v32, %v1519_v31  ;;  %v1649_v31 = vstv %s3138_s20  ;;  %s3210_s20 = sld [smem:[#allocation7 + $0x30]] }
 0x205   : > { %v1531_v29 = vadd.f32 %v1527_v38, %v1520_v27 }
 0x206   : > { %v1540_v41 = vpop.permute.xlu0 %1539  ;;  %v1544_v46 = vpop.permute.xlu1 %1543 }
 0x207   : > { %v1606_v17 = vpop.permute.xlu2 %1605 }
 0x20b   : > { %1863 = vrot.lane.b32.xlu1 %v3095_v56, %s2487_s7  ;;  %s2098_s7 = sld [smem:[#allocation7 + $0x6]] }
 0x20e   : > { %v1542_v9 = vpop.permute.xlu0 %1541 }
 0x20f   : > { %v1547_v49 = vsel %vm1545_vm1, %v1540_v41, %v1542_v9  ;;  %v1604_v50 = vpop.permute.xlu2 %1603  ;;  %v1546_v43 = vsel %vm1545_vm1, %v1542_v9, %v1544_v46 }
 0x210   : > { %v1549_v44 = vmul.f32 %v1548_v45, %v1547_v49  ;;  %v1554_v51 = vmul.f32 %v1553_v8, %v1547_v49  ;;  %v1550_v57 = vmul.f32 %v1548_v45, %v1546_v43  ;;  %v1555_v58 = vmul.f32 %v1553_v8, %v1546_v43 }
 0x211   : > { %v1611_v28 = vsel %vm1609_vm2, %v1604_v50, %v1606_v17  ;;  %v1676_v49 = vstv %s3145_s4  ;;  %v1681_v50 = vstv %s3153_s5  ;;  %s2207_s4 = sshll.u32 %s2525_s13, 3  ;;  %s175_s13 = scalar_lea.vmem [#allocation8], %s2090_s29 }
 0x212   : > { %v1558_v42 = vrot.slane %v1554_v51, 1  ;;  %v1551_v56 = vadd.f32 %v1549_v44, %v1530_v35  ;;  %v1552_v55 = vadd.f32 %v1550_v57, %v1531_v29  ;;  %v1559_v60 = vrot.slane %v1555_v58, 1 }
 0x213   : > { %1899 = vrot.lane.b32.xlu1 %v1891_v54, %s2488_s18  ;;  %v1618_v35 = vmul.f32 %v1617_v18, %v1611_v28  ;;  %s3183_s18 = sld [smem:[#allocation7 + $0x45]] }
 0x214   : > { %v1562_v14 = vadd.f32 %v1558_v42, %v1551_v56  ;;  %v1563_v0 = vadd.f32 %v1559_v60, %v1552_v55 }
 0x215   : > { %v1622_v46 = vrot.slane %v1618_v35, 1 }
 0x216   : > { %v1583_v2 = vadd.f32 %v1581_v59, %v1562_v14  ;;  %v1576_v4 = vpop.permute.xlu0 %1575 }
 0x217   : > { %v1578_v5 = vsel %vm1577_vm15, %v3109_v11, %v1576_v4  ;;  %v1638_v6 = vpop.permute.xlu2 %1637  ;;  %v1612_v11 = vstv %s2125_s28  ;;  %s3202_s28 = sld [smem:[#allocation7 + $0x29]]  ;;  %vm313_vm15 = vcmp.lt.s32.totalorder %v2791_v13, 13 }
 0x218   : > { %v1582_v3 = vmul.f32 %v1580_v48, %v1578_v5  ;;  %v1587_v12 = vmul.f32 %v1585_v7, %v1578_v5  ;;  %v1594_v33 = vadd.f32 %v1590_v61, %v1583_v2  ;;  %v1613_v38 = vmul.f32 %v1612_v11, %v1611_v28 }
 0x21a   : > { %v1591_v1 = vrot.slane %v1587_v12, 1  ;;  %v1584_v16 = vadd.f32 %v1582_v3, %v1563_v0  ;;  %v1615_v7 = vadd.f32 %v1613_v38, %v1594_v33 }
 0x21c   : > { %v1595_v34 = vadd.f32 %v1591_v1, %v1584_v16  ;;  %v1626_v53 = vadd.f32 %v1622_v46, %v1615_v7 }
 0x21e   : > { %v1608_v19 = vpop.permute.xlu0 %1607 }
 0x21f   : > { %v1636_v15 = vpop.permute.xlu2 %1635  ;;  %v1610_v24 = vsel %vm1609_vm2, %v1606_v17, %v1608_v19 }
 0x220   : > { %v1614_v23 = vmul.f32 %v1612_v11, %v1610_v24  ;;  %v1619_v47 = vmul.f32 %v1617_v18, %v1610_v24  ;;  %v1643_v45 = vsel %vm1641_vm3, %v1636_v15, %v1638_v6  ;;  %v1717_v11 = vstv %s2147_s6 }
 0x221   : > { %v1645_v54 = vmul.f32 %v1644_v36, %v1643_v45  ;;  %v1650_v44 = vmul.f32 %v1649_v31, %v1643_v45 }
 0x222   : > { %v1616_v22 = vadd.f32 %v1614_v23, %v1595_v34  ;;  %v1623_v37 = vrot.slane %v1619_v47, 1 }
 0x223   : > { %v1647_v55 = vadd.f32 %v1645_v54, %v1626_v53  ;;  %v1654_v60 = vrot.slane %v1650_v44, 1 }
 0x224   : > { %v1627_v29 = vadd.f32 %v1623_v37, %v1616_v22  ;;  %v1744_v37 = vstv %s2105_s8  ;;  %s1997_s8 = sshll.u32 %s175_s13, 4  ;;  %s1998_s8 = int_to_ptr.vmem [resolvable:$true] %s1997_s8 }
 0x225   : > { %v1658_v5 = vadd.f32 %v1654_v60, %v1647_v55  ;;  %v1808_v60 = vstv %s3188_s19 }
 0x226   : > { %v1640_v40 = vpop.permute.xlu0 %1639 }
 0x227   : > { %v3133_v21 = vpop.permute.xlu2 %1707  ;;  %v1642_v27 = vsel %vm1641_vm3, %v1638_v6, %v1640_v40 }
 0x228   : > { %v1646_v39 = vmul.f32 %v1644_v36, %v1642_v27  ;;  %v1651_v41 = vmul.f32 %v1649_v31, %v1642_v27  ;;  %v1749_v36 = vstv %s2154_s14 }
 0x22a   : > { %v1648_v8 = vadd.f32 %v1646_v39, %v1627_v29  ;;  %v1655_v9 = vrot.slane %v1651_v41, 1 }
 0x22c   : > { %v1659_v57 = vadd.f32 %v1655_v9, %v1648_v8  ;;  %v1776_v9 = vstv %s3179_s17 }
 0x22f   : > { %v3140_v26 = vpop.permute.xlu2 %1739 }
 0x233   : > { %v3142_v25 = vpop.permute.xlu1 %1705 }
 0x234   : > { %v1704_v30 = vpop.permute.xlu0 %1703  ;;  %v1710_v23 = vsel %vm1709_vm7, %v3142_v25, %v3133_v21 }
 0x235   : > { %v1711_v18 = vsel %vm1709_vm7, %v1704_v30, %v3142_v25  ;;  %v1719_v22 = vmul.f32 %v1717_v11, %v1710_v23 }
 0x236   : > { %v1718_v47 = vmul.f32 %v1717_v11, %v1711_v18  ;;  %v1845_v11 = vstv %s3197_s24 }
 0x237   : > { %v3151_v32 = vpop.permute.xlu2 %1735  ;;  %v1723_v35 = vrot.slane %v1719_v22, 1 }
 0x238   : > { %v1722_v30 = vrot.slane %v1718_v47, 1 }
 0x23c   : > { %v3155_v17 = vpop.permute.xlu1 %1737  ;;  %v1672_v43 = vpop.permute.xlu0 %1671 }
 0x23d   : > { %v1743_v31 = vsel %vm1741_vm8, %v3151_v32, %v3155_v17  ;;  %v1742_v21 = vsel %vm1741_vm8, %v3155_v17, %v3140_v26  ;;  %vm1966_vm8 = vcmask 1040384  }
 0x23e   : > { %v1745_v25 = vmul.f32 %v1744_v37, %v1743_v31  ;;  %v1750_v38 = vmul.f32 %v1749_v36, %v1743_v31  ;;  %v1746_v32 = vmul.f32 %v1744_v37, %v1742_v21  ;;  %v1751_v46 = vmul.f32 %v1749_v36, %v1742_v21 }
 0x23f   : > { %v1670_v48 = vpop.permute.xlu2 %1669 }
 0x240   : > { %v1674_v51 = vsel %vm1673_vm4, %v1670_v48, %v1672_v43  ;;  %v1754_v8 = vrot.slane %v1750_v38, 1  ;;  %v1755_v54 = vrot.slane %v1751_v46, 1 }
 0x241   : > { %v1678_v58 = vmul.f32 %v1676_v49, %v1674_v51  ;;  %v1683_v59 = vmul.f32 %v1681_v50, %v1674_v51 }
 0x243   : > { %v1680_v42 = vadd.f32 %v1678_v58, %v1659_v57  ;;  %v1687_v56 = vrot.slane %v1683_v59, 1 }
 0x245   : > { %v1772_v61 = vpop.permute.xlu1 %1771  ;;  %v1691_v14 = vadd.f32 %v1687_v56, %v1680_v42 }
 0x247   : > { %v1668_v0 = vpop.permute.xlu2 %1667  ;;  %v1693_v2 = vsel %vm307_vm5, %v1691_v14, 0.0 }
 0x248   : > { %v1675_v4 = vsel %vm1673_vm4, %v1668_v0, %v1670_v48  ;;  %v3168_v6 = vadd.f32 %v1693_v2, %v3103_v62  ;;  %v1770_v62 = vpop.permute.xlu0 %1769  ;;  %v1781_v48 = vstv %s3183_s18 }
 0x249   : > { %v1677_v3 = vmul.f32 %v1676_v49, %v1675_v4  ;;  %v1682_v12 = vmul.f32 %v1681_v50, %v1675_v4  ;;  %v1774_v49 = vsel %vm1773_vm9, %v1770_v62, %v1772_v61  ;;  %v1813_v61 = vstv %s3190_s22  ;;  %s2387_s22 = scalar_lea.hbm %s3281_s2, 16 }
 0x24a   : > { %v1778_v51 = vmul.f32 %v1776_v9, %v1774_v49  ;;  %v1783_v57 = vmul.f32 %v1781_v48, %v1774_v49 }
 0x24b   : > { %v1679_v33 = vadd.f32 %v1677_v3, %v1658_v5  ;;  %v1686_v1 = vrot.slane %v1682_v12, 1 }
 0x24c   : > { %v1787_v3 = vrot.slane %v1783_v57, 1 }
 0x24d   : > { %v1768_v16 = vpop.permute.xlu1 %1767  ;;  %v1690_v34 = vadd.f32 %v1686_v1, %v1679_v33 }
 0x24e   : > { %v1775_v7 = vsel %vm1773_vm9, %v1768_v16, %v1770_v62  ;;  %v1840_v62 = vstv %s3195_s23 }
 0x24f   : > { %v1692_v15 = vsel %vm306_vm6, %v1690_v34, 0.0  ;;  %v1777_v50 = vmul.f32 %v1776_v9, %v1775_v7  ;;  %v1782_v43 = vmul.f32 %v1781_v48, %v1775_v7 }
 0x250   : > { %v3172_v19 = vadd.f32 %v1692_v15, %v3106_v63  ;;  %v1712_v63 = vstv %s2098_s7  ;;  %v1802_v28 = vpop.permute.xlu0 %1801  ;;  %s1995_s7 = scalar_lea.hbm %s3281_s2, %s2207_s4 }
 0x251   : > { %v1713_v27 = vmul.f32 %v1712_v63, %v1711_v18  ;;  %v1714_v41 = vmul.f32 %v1712_v63, %v1710_v23  ;;  %v1786_v56 = vrot.slane %v1782_v43, 1  ;;  %s1999_s14 = sshll.u32 %s1995_s7, 4  ;;  %s2000_s14 = int_to_ptr.hbm [resolvable:$true] %s1999_s14 }
 0x252   : > { %v1896_v36 = vpop.permute.xlu2 %1895  ;;  %s2381_s17 = sshra.s32 %s2000_s14, 4  ;;  %s2382_s17 = int_to_ptr.hbm [resolvable:$true] %s2381_s17 }
 0x253   : > { %v1726_v39 = vadd.f32 %v1722_v30, %v1713_v27  ;;  %v1727_v17 = vadd.f32 %v1723_v35, %v1714_v41  ;;  %v1909_v35 = vstv %s3204_s30  ;;  %v1877_v41 = vstv %s3206_s15  ;;  %s2383_s29 = scalar_lea.hbm %s2382_s17, 8  ;;  %p2388_p9 = scmp.lt.s32.totalorder %s2382_s17, %s3281_s2 }
 0x254   : > { %p2384_p1 = scmp.ne.s32.totalorder %s2382_s17, %s2383_s29  ;;  %p2389_p10 = scmp.lt.s32.totalorder %s2387_s22, %s2383_s29 }
 0x255   : > { %v1804_v40 = vpop.permute.xlu1 %1803  ;;  %v1747_v45 = vadd.f32 %v1745_v25, %v1726_v39  ;;  %v1748_v53 = vadd.f32 %v1746_v32, %v1727_v17  ;;  %v1872_v39 = vstv %s3202_s28 }
 0x256   : > { %v1806_v14 = vsel %vm1805_vm10, %v1802_v28, %v1804_v40  ;;  %p2385_p4 = pnand %p2384_p1, %p2570_p3  ;;  %p2390_p2 = por %p2389_p10, %p2388_p9 }
 0x257   : > { %v1758_v44 = vadd.f32 %v1754_v8, %v1747_v45  ;;  %v1759_v55 = vadd.f32 %v1755_v54, %v1748_v53  ;;  %v1810_v33 = vmul.f32 %v1808_v60, %v1806_v14  ;;  %v1815_v1 = vmul.f32 %v1813_v61, %v1806_v14 }
 0x258   : > { %v1834_v26 = vpop.permute.xlu0 %1833  ;;  %p2386_p8 = pneg %p2385_p4 }
 0x259   : > { %v1779_v42 = vadd.f32 %v1777_v50, %v1758_v44  ;;  %v1780_v5 = vadd.f32 %v1778_v51, %v1759_v55 }
 0x25a   : > { %p2391_p11 = pnand %p2390_p2, %p2386_p8 }
 0x25b   : > { %v1790_v12 = vadd.f32 %v1786_v56, %v1779_v42  ;;  %v1791_v40 = vadd.f32 %v1787_v3, %v1780_v5 }
 0x25d   : > { %v1800_v24 = vpop.permute.xlu1 %1799  ;;  %v1812_v63 = vadd.f32 %v1810_v33, %v1791_v40 }
 0x25e   : > { %v1807_v58 = vsel %vm1805_vm10, %v1800_v24, %v1802_v28  ;;  %v1819_v28 = vrot.slane %v1815_v1, 1 }
 0x25f   : > { %v1809_v0 = vmul.f32 %v1808_v60, %v1807_v58  ;;  %v1814_v2 = vmul.f32 %v1813_v61, %v1807_v58 }
 0x260   : > { %v1866_v4 = vpop.permute.xlu0 %1865  ;;  %v1823_v25 = vadd.f32 %v1819_v28, %v1812_v63 }
 0x261   : > { %v1811_v34 = vadd.f32 %v1809_v0, %v1790_v12  ;;  %v1818_v15 = vrot.slane %v1814_v2, 1 }
 0x263   : > { %v1822_v22 = vadd.f32 %v1818_v15, %v1811_v34 }
 0x265   : > { %v1836_v29 = vpop.permute.xlu1 %1835 }
 0x266   : > { %v1838_v24 = vsel %vm1837_vm11, %v1834_v26, %v1836_v29 }
 0x267   : > { %v1842_v31 = vmul.f32 %v1840_v62, %v1838_v24  ;;  %v1847_v30 = vmul.f32 %v1845_v11, %v1838_v24 }
 0x269   : > { %v1898_v37 = vpop.permute.xlu0 %1897  ;;  %v1844_v32 = vadd.f32 %v1842_v31, %v1823_v25  ;;  %v1851_v46 = vrot.slane %v1847_v30, 1  ;;  %v1962_v25 = vld [vmem:[%s2603_s3] ss:$4 sm:$0x3] }
 0x26a   : > { %v1903_v38 = vsel %vm1901_vm12, %v1896_v36, %v1898_v37 }
 0x26b   : > { %v1910_v17 = vmul.f32 %v1909_v35, %v1903_v38  ;;  %v1855_v43 = vadd.f32 %v1851_v46, %v1844_v32  ;;  %v2199_v46 = vld [vmem:[%s2603_s3 + $0x3] ss:$4 sm:$0x3] }
 0x26d   : > { %v1832_v59 = vpop.permute.xlu1 %1831 }
 0x26e   : > { %v1839_v16 = vsel %vm1837_vm11, %v1832_v59, %v1834_v26  ;;  %v1904_v26 = vstv %s3210_s20  ;;  %v1914_v59 = vrot.slane %v1910_v17, 1 }
 0x26f   : > { %v1841_v23 = vmul.f32 %v1840_v62, %v1839_v16  ;;  %v1846_v47 = vmul.f32 %v1845_v11, %v1839_v16  ;;  %v1905_v44 = vmul.f32 %v1904_v26, %v1903_v38 }
 0x271   : > { %v1843_v27 = vadd.f32 %v1841_v23, %v1822_v22  ;;  %v1850_v21 = vrot.slane %v1846_v47, 1 }
 0x273   : > { %v1854_v45 = vadd.f32 %v1850_v21, %v1843_v27 }
 0x275   : > { %v1868_v18 = vpop.permute.xlu1 %1867 }
 0x276   : > { %v1870_v29 = vsel %vm1869_vm13, %v1866_v4, %v1868_v18 }
 0x277   : > { %v1874_v9 = vmul.f32 %v1872_v39, %v1870_v29  ;;  %v1879_v48 = vmul.f32 %v1877_v41, %v1870_v29  ;;  %v2195_v29 = vld [vmem:[%s2603_s3 + $0x1] ss:$4 sm:$0x3] }
 0x279   : > { %v1876_v51 = vadd.f32 %v1874_v9, %v1855_v43  ;;  %v1883_v57 = vrot.slane %v1879_v48, 1 }
 0x27b   : > { %v1887_v60 = vadd.f32 %v1883_v57, %v1876_v51 }
 0x27d   : > { %v1864_v7 = vpop.permute.xlu1 %1863 }
 0x27e   : > { %v1871_v8 = vsel %vm1869_vm13, %v1864_v7, %v1866_v4 }
 0x27f   : > { %v1873_v49 = vmul.f32 %v1872_v39, %v1871_v8  ;;  %v1878_v50 = vmul.f32 %v1877_v41, %v1871_v8  ;;  %v2197_v41 = vld [vmem:[%s2603_s3 + $0x2] ss:$4 sm:$0x3]  ;;  %s1984_s3 = scalar_lea.sflag [#allocation5], %s2597_s27 }
 0x281   : > { %v1875_v53 = vadd.f32 %v1873_v49, %v1854_v45  ;;  %v1882_v54 = vrot.slane %v1878_v50, 1 }
 0x283   : > { %v1886_v58 = vadd.f32 %v1882_v54, %v1875_v53 }
 0x285   : > { %v1907_v42 = vadd.f32 %v1905_v44, %v1886_v58  ;;  %v1900_v56 = vpop.permute.xlu1 %1899 }
 0x286   : > { %v1902_v55 = vsel %vm1901_vm12, %v1898_v37, %v1900_v56 }
 0x287   : > { %v1918_v61 = vadd.f32 %v1914_v59, %v1907_v42  ;;  %v1906_v14 = vmul.f32 %v1904_v26, %v1902_v55  ;;  %v1911_v0 = vmul.f32 %v1909_v35, %v1902_v55 }
 0x289   : > { %v1920_v2 = vsel %vm312_vm14, %v1918_v61, 0.0  ;;  %v1908_v4 = vadd.f32 %v1906_v14, %v1887_v60  ;;  %v1915_v5 = vrot.slane %v1911_v0, 1 }
 0x28a   : > { %v1922_v3 = vadd.f32 %v1920_v2, %v3172_v19 }
 0x28b   : > { %v1919_v12 = vadd.f32 %v1915_v5, %v1908_v4 }
 0x28c   : > { %v2193_v33 = vmul.f32 -1.442695, %v1922_v3 }
 0x28d   : > { %v1921_v1 = vsel %vm313_vm15, %v1919_v12, 0.0 }
 0x28e   : > { %2314 = vpow2.f32 %v2193_v33  ;;  %v1923_v20 = vadd.f32 %v1921_v1, %v3168_v6 }
 0x290   : > { %v2194_v16 = vmul.f32 -1.442695, %v1923_v20 }
 0x292   : > { %2316 = vpow2.f32 %v2194_v16 }
 0x294   : > { %v2315_v52 = vpop.eup %2314 }
 0x295   : > { %v1930_v34 = vadd.f32 1.0, %v2315_v52 }
 0x297   : > { %2318 = vrcp.f32 %v1930_v34  ;;  %vm1937_vm3 = vweird.f32 %v1930_v34  ;;  %v1943_v22 = vand.u32 2147483648, %v1930_v34  ;;  %v1941_v36 = vand.u32 2147483647, %v1930_v34 }
 0x298   : > { %v2317_v15 = vpop.eup %2316 }
 0x299   : > { %v1931_v40 = vadd.f32 1.0, %v2317_v15  ;;  %v1944_v38 = vor.u32 1.1754944e-38, %v1943_v22  ;;  %vm1942_vm9 = vcmp.eq.f32.partialorder %v1941_v36, 8.507059e+37 }
 0x29b   : > { %2320 = vrcp.f32 %v1931_v40  ;;  %v1958_v47 = vand.u32 2147483648, %v1931_v40  ;;  %v1956_v28 = vand.u32 2147483647, %v1931_v40  ;;  %vm1952_vm5 = vweird.f32 %v1931_v40 }
 0x29d   : > { %v2319_v62 = vpop.eup %2318  ;;  %v1959_v30 = vor.u32 1.1754944e-38, %v1958_v47  ;;  %vm1957_vm7 = vcmp.eq.f32.partialorder %v1956_v28, 8.507059e+37 }
 0x29e   : > { %v1933_v11 = vmul.f32 %v2319_v62, %v1930_v34  ;;  %vm1938_vm1 = vweird.f32 %v2319_v62 }
 0x29f   : > { %vm3226_vm4 = vmor %vm1937_vm3, %vm1938_vm1 }
 0x2a0   : > { %v1934_v18 = vsub.f32 1.0, %v1933_v11 }
 0x2a1   : > { %v2321_v19 = vpop.eup %2320 }
 0x2a2   : > { %v1935_v24 = vmul.f32 %v2319_v62, %v1934_v18  ;;  %v1948_v13 = vmul.f32 %v2321_v19, %v1931_v40  ;;  %vm1953_vm2 = vweird.f32 %v2321_v19 }
 0x2a3   : > { %vm1954_vm6 = vmor %vm1952_vm5, %vm1953_vm2 }
 0x2a4   : > { %v1949_v23 = vsub.f32 1.0, %v1948_v13  ;;  %v1936_v63 = vadd.f32 %v2319_v62, %v1935_v24 }
 0x2a6   : > { %v1950_v6 = vmul.f32 %v2321_v19, %v1949_v23  ;;  %v1940_v21 = vsel %vm3226_vm4, %v2319_v62, %v1936_v63 }
 0x2a7   : > { %v1945_v32 = vsel %vm1942_vm9, %v1944_v38, %v1940_v21 }
 0x2a8   : > { %v1951_v31 = vadd.f32 %v2321_v19, %v1950_v6 }
 0x2aa   : > { %v1955_v27 = vsel %vm1954_vm6, %v2321_v19, %v1951_v31 }
 0x2ab   : > { %v1960_v35 = vsel %vm1957_vm7, %v1959_v30, %v1955_v27 }
 0x2ac   : > { %v1965_v39 = vrot.slane %v1960_v35, 7 }
 0x2ae   : > { %v1967_v7 = vsel %vm1966_vm8, %v1945_v32, %v1965_v39 }
 0x2af   : > { %v1969_v45 = vmul.f32 %v1967_v7, %v1962_v25  ;;  %v1972_v8 = vmul.f32 %v2195_v29, %v1967_v7  ;;  %v1976_v26 = vmul.f32 %v2197_v41, %v1967_v7  ;;  %v1980_v17 = vmul.f32 %v2199_v46, %v1967_v7 }
 0x2b1   : > { %1970 = vst.msk [vmem:[%s175_s13] ss:$4 sm:$0x3] %vm2618_vm0, %v1969_v45 }
 0x2b2   : > { %2196 = vst.msk [vmem:[%s175_s13 + $0x1] ss:$4 sm:$0x3] %vm2618_vm0, %v1972_v8 }
 0x2b3   : > { %2198 = vst.msk [vmem:[%s175_s13 + $0x2] ss:$4 sm:$0x3] %vm2618_vm0, %v1976_v26 }
 0x2b4   : > { %2200 = vst.msk [vmem:[%s175_s13 + $0x3] ss:$4 sm:$0x3] %vm2618_vm0, %v1980_v17 }
 0x2b5   : > { %2394 = shalt.err (!%p2391_p11)
}
 0x2b6   : > { %2214 = dma.vmem_to_hbm [thread:$0]  (%p2570_p3), %s1998_s8, 128, %s2000_s14, %s1984_s3  }
 0x2b7 PF: > { %s2011_s27 = sand.u32 1, %s2425_s9   ;;  %p3291_p12 = scmp.ge.s32.totalorder %s2437_s12, 2 }
 0x2b8   : > { %s2012_s28 = scalar_lea.sflag [#allocation5], %s2011_s27 }
 0x2b9   : > { %p2225_p13 = pnand %p3291_p12, %p2539_p6 }
 0x2bb   : > { %p2226_p0 = pneg %p2225_p13 }
 0x2bd   : > { %2420 = dma.done.wait (%p2226_p0), %s2012_s28, 128  }
 0x2be   : > { %2422 = vsyncadd (%p2226_p0), %s2012_s28, 4294967168  ;;  %p16_p5 = scmp.ge.s32.totalorder %s2555_s21, 4   ;;  %s3292_s9 = smov %s2429_s10 }
 0x2bf   : > { %s3293_s10 = smov %s2433_s11  ;;  %s3294_s11 = smov %s2565_s25 }
 0x2c0   : > { %s3295_s12 = smov %s2555_s21  ;;  %18 = sbr.rel (!%p16_p5) target bundleno = 6 (0x6), region = 86 }
 0x2c5   :  { %2018 = vsyncpa [#allocation4], 1 }
 0x2c6   :  { %2020 = vsyncpa [#allocation4 + $0x1], 1 }
 0x2c7   :  { %2021 = vsyncpa [#allocation5], 1 }
 0x2c8   :  { %2023 = vsyncpa [#allocation5 + $0x1], 1 }
 0x2c9   :  { %2024 = vsyncpa [#allocation6], 1 }
 0x2ca   :  { %2026 = vsyncpa [#allocation6 + $0x1], 1 }

</bundles_post_ra>
